<compile_context>
chip_gen: v7x
topology: tpu7x:2x2x1
jax: 0.10.0
libtpu: 0.0.40
codegen_flags: <defaults>
</compile_context>

<pallas_src>
import functools
import math

import jax
import jax.numpy as jnp
from jax.experimental import pallas as pl
from jax.experimental.pallas import tpu as pltpu


_VMEM_BUDGET = 8 * 1024 * 1024  # conservative vs. 16 MiB default scoped VMEM (v5e)


# ----------------------------------------------------------------------------
# Pallas kernels
# ----------------------------------------------------------------------------
def _fused_conv_bn_relu_kernel(p_ref, w_ref, b_ref, g_ref, beta_ref, o_ref, *,
                               eps, tm):
    """Conv-as-GEMM (+bias) into a VMEM-resident output block; on the last grid step
    compute per-channel batch stats on the resident block and apply BN + ReLU."""
    i = pl.program_id(0)
    y = (jnp.dot(p_ref[...], w_ref[...], preferred_element_type=jnp.float32)
         + b_ref[...])
    row0 = pl.multiple_of(i * tm, tm)
    o_ref[pl.ds(row0, tm), :] = y

    @pl.when(i == pl.num_programs(0) - 1)
    def _():
        yy = o_ref[...]                                  # full (M, Co), VMEM resident
        mean = jnp.mean(yy, axis=0, keepdims=True)
        var = jnp.mean((yy - mean) * (yy - mean), axis=0, keepdims=True)
        scale = g_ref[...] / jnp.sqrt(var + eps)
        shift = beta_ref[...] - mean * scale
        o_ref[...] = jnp.maximum(yy * scale + shift, 0.0)


def _matmul_bias_kernel(a_ref, b_ref, bias_ref, o_ref):
    o_ref[...] = (
        jnp.dot(a_ref[...], b_ref[...], preferred_element_type=jnp.float32)
        + bias_ref[...]
    )


def _bn_sums_kernel(x_ref, sum_ref, sq_ref):
    """Single-pass per-channel sum / sum-of-squares, accumulated across the M grid."""
    @pl.when(pl.program_id(0) == 0)
    def _():
        sum_ref[...] = jnp.zeros_like(sum_ref)
        sq_ref[...] = jnp.zeros_like(sq_ref)

    x = x_ref[...]
    sum_ref[...] += jnp.sum(x, axis=0, keepdims=True)
    sq_ref[...] += jnp.sum(x * x, axis=0, keepdims=True)


def _scale_shift_relu_kernel(x_ref, scale_ref, shift_ref, o_ref):
    o_ref[...] = jnp.maximum(x_ref[...] * scale_ref[...] + shift_ref[...], 0.0)


# ----------------------------------------------------------------------------
# Pallas wrappers
# ----------------------------------------------------------------------------
def _pick_tile_m(M, row_bytes, fixed_bytes=0):
    """Biggest M-tile dividing M whose double-buffered per-row bytes plus fixed
    residents fit the VMEM budget; tiny/awkward M falls back to one full block."""
    for tm in (2048, 1024, 512, 256, 128):
        if M % tm == 0 and 2 * tm * row_bytes + fixed_bytes <= _VMEM_BUDGET:
            return tm
    return M


def fused_conv_bn_relu(patches, w_mat, bias, gamma, beta, eps):
    """One pallas_call per layer: GEMM+bias, batch stats, BN affine + ReLU."""
    M, K = patches.shape
    Co = w_mat.shape[1]
    fixed = 4 * (M * Co + 2 * K * Co + 6 * Co)          # resident out + params
    tm = _pick_tile_m(M, 4 * K, fixed_bytes=fixed)
    kernel = functools.partial(_fused_conv_bn_relu_kernel, eps=eps, tm=tm)
    return pl.pallas_call(
        kernel,
        out_shape=jax.ShapeDtypeStruct((M, Co), jnp.float32),
        grid=(M // tm,),
        in_specs=[
            pl.BlockSpec((tm, K), lambda i: (i, 0)),
            pl.BlockSpec((K, Co), lambda i: (0, 0)),
            pl.BlockSpec((1, Co), lambda i: (0, 0)),
            pl.BlockSpec((1, Co), lambda i: (0, 0)),
            pl.BlockSpec((1, Co), lambda i: (0, 0)),
        ],
        # Constant block index => output stays VMEM-resident across the grid and is
        # written back to HBM exactly once (accumulator pattern).
        out_specs=pl.BlockSpec((M, Co), lambda i: (0, 0)),
        compiler_params=pltpu.CompilerParams(
            dimension_semantics=("arbitrary",)),
    )(patches, w_mat, bias, gamma, beta)


def matmul_bias_tiled(a, b, bias):
    M, K = a.shape
    N = b.shape[1]
    tm = _pick_tile_m(M, 4 * (K + N), fixed_bytes=4 * (2 * K * N + 2 * N))
    return pl.pallas_call(
        _matmul_bias_kernel,
        out_shape=jax.ShapeDtypeStruct((M, N), jnp.float32),
        grid=(M // tm,),
        in_specs=[
            pl.BlockSpec((tm, K), lambda i: (i, 0)),
            pl.BlockSpec((K, N), lambda i: (0, 0)),
            pl.BlockSpec((1, N), lambda i: (0, 0)),
        ],
        out_specs=pl.BlockSpec((tm, N), lambda i: (i, 0)),
        compiler_params=pltpu.CompilerParams(dimension_semantics=("parallel",)),
    )(a, b, bias)


def bn_sums_tiled(x):
    M, C = x.shape
    tm = _pick_tile_m(M, 4 * C)
    return pl.pallas_call(
        _bn_sums_kernel,
        out_shape=(jax.ShapeDtypeStruct((1, C), jnp.float32),
                   jax.ShapeDtypeStruct((1, C), jnp.float32)),
        grid=(M // tm,),
        in_specs=[pl.BlockSpec((tm, C), lambda i: (i, 0))],
        out_specs=(pl.BlockSpec((1, C), lambda i: (0, 0)),
                   pl.BlockSpec((1, C), lambda i: (0, 0))),
        compiler_params=pltpu.CompilerParams(dimension_semantics=("arbitrary",)),
    )(x)


def scale_shift_relu_tiled(x, scale, shift):
    M, C = x.shape
    tm = _pick_tile_m(M, 4 * 2 * C)
    return pl.pallas_call(
        _scale_shift_relu_kernel,
        out_shape=jax.ShapeDtypeStruct((M, C), jnp.float32),
        grid=(M // tm,),
        in_specs=[
            pl.BlockSpec((tm, C), lambda i: (i, 0)),
            pl.BlockSpec((1, C), lambda i: (0, 0)),
            pl.BlockSpec((1, C), lambda i: (0, 0)),
        ],
        out_specs=pl.BlockSpec((tm, C), lambda i: (i, 0)),
        compiler_params=pltpu.CompilerParams(dimension_semantics=("parallel",)),
    )(x, scale, shift)


def matmul_bias(a, b, bias):
    """Single-block GEMM + bias (tiny FC head: full arrays in VMEM)."""
    M = a.shape[0]
    N = b.shape[1]
    return pl.pallas_call(
        _matmul_bias_kernel,
        out_shape=jax.ShapeDtypeStruct((M, N), jnp.float32),
    )(a, b, bias)


# ----------------------------------------------------------------------------
# JAX glue: channels-last im2col, layer composition, parameter prep/init
# ----------------------------------------------------------------------------
def im2col_3d(x, k=3, stride=2, pad=1):
    """Channels-last x: (N, D, H, W, C) -> patches (N*Do*Ho*Wo, k^3*C).

    K ordering is (kd, kh, kw, c); the conv weight is pre-reordered to match, so the
    patch matrix is just a last-axis concatenation of strided slices + a free reshape
    (no big stack/transpose)."""
    N, D, H, W, C = x.shape
    Do = (D + 2 * pad - k) // stride + 1
    Ho = (H + 2 * pad - k) // stride + 1
    Wo = (W + 2 * pad - k) // stride + 1
    xp = jnp.pad(x, ((0, 0), (pad, pad), (pad, pad), (pad, pad), (0, 0)))
    views = []
    for kd in range(k):
        for kh in range(k):
            for kw in range(k):
                views.append(
                    xp[:,
                       kd: kd + stride * (Do - 1) + 1: stride,
                       kh: kh + stride * (Ho - 1) + 1: stride,
                       kw: kw + stride * (Wo - 1) + 1: stride,
                       :])
    p = jnp.concatenate(views, axis=-1)                 # (N, Do, Ho, Wo, 27*C)
    return p.reshape(N * Do * Ho * Wo, k * k * k * C), (Do, Ho, Wo)


def conv3d_bn_relu(x, w_mat, bias, gamma, beta, eps=1e-5):
    """Conv3d(k=3,s=2,p=1) + BatchNorm3d (training-mode batch stats) + ReLU.
    Input/output are channels-last (N, D, H, W, C)."""
    N = x.shape[0]
    K, Co = w_mat.shape
    patches, (Do, Ho, Wo) = im2col_3d(x)
    M = patches.shape[0]

    # Fused single-kernel path needs the full (M, Co) layer output VMEM-resident.
    if 4 * (M * Co + 2 * 128 * K + 2 * K * Co) <= _VMEM_BUDGET:
        y = fused_conv_bn_relu(patches, w_mat, bias, gamma, beta, eps)
    else:
        # Large-activation fallback: tiled GEMM -> single-pass sums -> BN+ReLU.
        y = matmul_bias_tiled(patches, w_mat, bias)
        s, sq = bn_sums_tiled(y)
        mean = s / M
        var = sq / M - mean * mean
        scale = gamma / jnp.sqrt(var + eps)
        shift = beta - mean * scale
        y = scale_shift_relu_tiled(y, scale, shift)
    return y.reshape(N, Do, Ho, Wo, Co)                 # stay channels-last


def prepare_params(params):
    """One-time re-layout of PyTorch-format parameters for the channels-last kernels."""
    (w1, b1, g1, be1), (w2, b2, g2, be2), (w3, b3, g3, be3), (wf, bf) = params

    def conv(w, b, g, be):
        co = w.shape[0]
        # (Co, Ci, kd, kh, kw) -> (kd, kh, kw, Ci, Co) -> (k^3*Ci, Co): matches im2col K order
        w_mat = jnp.transpose(w, (2, 3, 4, 1, 0)).reshape(-1, co)
        return w_mat, b.reshape(1, co), g.reshape(1, co), be.reshape(1, co)

    return (conv(w1, b1, g1, be1), conv(w2, b2, g2, be2), conv(w3, b3, g3, be3),
            (wf.T, bf.reshape(1, -1)))


@jax.jit
def conv3dnet_forward(x, prepared):
    c1, c2, c3, (fc_w, fc_b) = prepared
    x = jnp.transpose(x, (0, 2, 3, 4, 1))               # NCDHW -> NDHWC, once
    for (w_mat, b, g, be) in (c1, c2, c3):
        x = conv3d_bn_relu(x, w_mat, b, g, be)
    N = x.shape[0]
    # Match torch Flatten over (C, D, H, W): transpose the tiny final tensor back.
    x = jnp.transpose(x, (0, 4, 1, 2, 3)).reshape(N, -1)
    return matmul_bias(x, fc_w, fc_b)                    # Linear: x @ W^T + b


def init_conv(key, ci, co, k=3):
    fan_in = ci * k * k * k
    bound = 1.0 / math.sqrt(fan_in)
    kw, kb = jax.random.split(key)
    w = jax.random.uniform(kw, (co, ci, k, k, k), jnp.float32, -bound, bound)
    b = jax.random.uniform(kb, (co,), jnp.float32, -bound, bound)
    return w, b


def init_linear(key, fin, fout):
    bound = 1.0 / math.sqrt(fin)
    kw, kb = jax.random.split(key)
    w = jax.random.uniform(kw, (fout, fin), jnp.float32, -bound, bound)
    b = jax.random.uniform(kb, (fout,), jnp.float32, -bound, bound)
    return w, b


# ----------------------------------------------------------------------------
# Pure-JAX reference (correctness check only)
# ----------------------------------------------------------------------------
def _ref_conv_bn_relu(x, w, b, gamma, beta, eps=1e-5):
    y = jax.lax.conv_general_dilated(
        x, w, window_strides=(2, 2, 2), padding=((1, 1), (1, 1), (1, 1)),
        dimension_numbers=("NCDHW", "OIDHW", "NCDHW"),
    ) + b.reshape(1, -1, 1, 1, 1)
    mean = jnp.mean(y, axis=(0, 2, 3, 4), keepdims=True)
    var = jnp.var(y, axis=(0, 2, 3, 4), keepdims=True)
    yn = (y - mean) / jnp.sqrt(var + eps)
    yn = yn * gamma.reshape(1, -1, 1, 1, 1) + beta.reshape(1, -1, 1, 1, 1)
    return jnp.maximum(yn, 0.0)


def conv3dnet_forward_ref(x, params):
    (w1, b1, g1, be1), (w2, b2, g2, be2), (w3, b3, g3, be3), (wf, bf) = params
    x = _ref_conv_bn_relu(x, w1, b1, g1, be1)
    x = _ref_conv_bn_relu(x, w2, b2, g2, be2)
    x = _ref_conv_bn_relu(x, w3, b3, g3, be3)
    x = x.reshape(x.shape[0], -1)
    return x @ wf.T + bf


# ----------------------------------------------------------------------------
if __name__ == "__main__":
    # Module config (small, consistent with Conv3DNet.__init__)
    input_channels = 2
    temporal_dim = 16
    width = 16
    height = 16
    channel_multiplier = 1
    num_classes = 10
    batch = 2

    out_c1 = input_channels * channel_multiplier * 2      # 4
    out_c2 = out_c1 * 2                                    # 8
    out_c3 = out_c1 * 4                                    # 16
    in_fc = (out_c3
             * math.ceil(temporal_dim / 8)
             * math.ceil(width / 8)
             * math.ceil(height / 8))                      # 128

    key = jax.random.PRNGKey(0)
    kx, k1, k2, k3, kf = jax.random.split(key, 5)

    x = jax.random.normal(kx, (batch, input_channels, temporal_dim, width, height),
                          jnp.float32)

    w1, b1 = init_conv(k1, input_channels, out_c1)
    w2, b2 = init_conv(k2, out_c1, out_c2)
    w3, b3 = init_conv(k3, out_c2, out_c3)
    wf, bf = init_linear(kf, in_fc, num_classes)
    # BatchNorm3d affine params (PyTorch defaults: gamma=1, beta=0)
    g1, be1 = jnp.ones((out_c1,), jnp.float32), jnp.zeros((out_c1,), jnp.float32)
    g2, be2 = jnp.ones((out_c2,), jnp.float32), jnp.zeros((out_c2,), jnp.float32)
    g3, be3 = jnp.ones((out_c3,), jnp.float32), jnp.zeros((out_c3,), jnp.float32)

    params = ((w1, b1, g1, be1), (w2, b2, g2, be2), (w3, b3, g3, be3), (wf, bf))
    prepared = prepare_params(params)                      # one-time re-layout

    out = jax.block_until_ready(conv3dnet_forward(x, prepared))
    assert out.shape == (batch, num_classes), out.shape

    ref = jax.block_until_ready(conv3dnet_forward_ref(x, params))
    assert jnp.allclose(out, ref, rtol=1e-3, atol=1e-3), (
        float(jnp.max(jnp.abs(out - ref)))
    )

    print("KERNEL_OK")
</pallas_src>

<mosaic_0001>
module attributes {stable_mosaic.version = 11 : i64} {
  func.func @_fused_conv_bn_relu_kernel(%arg0: i32, %arg1: memref<1024x54xf32, #tpu.memory_space<vmem>>, %arg2: memref<54x4xf32, #tpu.memory_space<vmem>>, %arg3: memref<1x4xf32, #tpu.memory_space<vmem>>, %arg4: memref<1x4xf32, #tpu.memory_space<vmem>>, %arg5: memref<1x4xf32, #tpu.memory_space<vmem>>, %arg6: memref<1024x4xf32, #tpu.memory_space<vmem>>) attributes {dimension_semantics = [#tpu.dimension_semantics<arbitrary>], iteration_bounds = array<i64: 1>, scalar_prefetch = 0 : i64, scratch_operands = 0 : i64, tpu.core_type = #tpu.core_type<tc>, window_params = [{transform_indices = @transform_0, window_bounds = array<i64: 1024, 54>}, {pipeline_mode = #tpu.pipeline_mode<synchronous>, transform_indices = @transform_1, window_bounds = array<i64: 54, 4>}, {pipeline_mode = #tpu.pipeline_mode<synchronous>, transform_indices = @transform_2, window_bounds = array<i64: 1, 4>}, {pipeline_mode = #tpu.pipeline_mode<synchronous>, transform_indices = @transform_3, window_bounds = array<i64: 1, 4>}, {pipeline_mode = #tpu.pipeline_mode<synchronous>, transform_indices = @transform_4, window_bounds = array<i64: 1, 4>}, {pipeline_mode = #tpu.pipeline_mode<synchronous>, transform_indices = @transform_5, window_bounds = array<i64: 1024, 4>}]} {
    %c0 = arith.constant 0 : index
    %c0_0 = arith.constant 0 : index
    %0 = vector.load %arg1[%c0, %c0_0] : memref<1024x54xf32, #tpu.memory_space<vmem>>, vector<1024x54xf32>
    %c0_1 = arith.constant 0 : index
    %c0_2 = arith.constant 0 : index
    %1 = vector.load %arg2[%c0_1, %c0_2] : memref<54x4xf32, #tpu.memory_space<vmem>>, vector<54x4xf32>
    %cst = arith.constant dense<0.000000e+00> : vector<1024x4xf32>
    %2 = tpu.matmul %0, %1, %cst {dimension_numbers = #tpu.dot_dimension_numbers<[1], [0], [0], [1], [0, 0, 1, 1], [], []>} : vector<1024x54xf32>, vector<54x4xf32>, vector<1024x4xf32> -> vector<1024x4xf32>
    %c0_3 = arith.constant 0 : index
    %c0_4 = arith.constant 0 : index
    %3 = vector.load %arg3[%c0_3, %c0_4] : memref<1x4xf32, #tpu.memory_space<vmem>>, vector<1x4xf32>
    %4 = vector.broadcast %3 : vector<1x4xf32> to vector<1024x4xf32>
    %5 = arith.addf %2, %4 : vector<1024x4xf32>
    %c1024_i32 = arith.constant 1024 : i32
    %6 = arith.muli %arg0, %c1024_i32 : i32
    %7 = tpu.assume_multiple %6, 1024 : i32
    %8 = arith.index_cast %7 : i32 to index
    %c0_5 = arith.constant 0 : index
    %9 = vector.load %arg6[%8, %c0_5] : memref<1024x4xf32, #tpu.memory_space<vmem>>, vector<1024x4xf32>
    tpu.vector_store %arg6[%8, %c0_5], %5 {strides = array<i32>} : memref<1024x4xf32, #tpu.memory_space<vmem>>, vector<1024x4xf32>,
    %c0_i32 = arith.constant 0 : i32
    %10 = arith.cmpi eq, %arg0, %c0_i32 : i32
    %11 = arith.extui %10 : i1 to i32
    %c0_i32_6 = arith.constant 0 : i32
    %12 = arith.cmpi ne, %11, %c0_i32_6 : i32
    scf.if %12 {
      %c0_7 = arith.constant 0 : index
      %c0_8 = arith.constant 0 : index
      %13 = vector.load %arg6[%c0_7, %c0_8] : memref<1024x4xf32, #tpu.memory_space<vmem>>, vector<1024x4xf32>
      %cst_9 = arith.constant dense<0.000000e+00> : vector<4xf32>
      %14 = vector.multi_reduction <add>, %13, %cst_9 [0] : vector<1024x4xf32> to vector<4xf32>
      %15 = vector.shape_cast %14 : vector<4xf32> to vector<1x4xf32>
      %cst_10 = arith.constant 1.024000e+03 : f32
      %16 = vector.broadcast %cst_10 : f32 to vector<1x4xf32>
      %17 = arith.divf %15, %16 : vector<1x4xf32>
      %18 = vector.broadcast %17 : vector<1x4xf32> to vector<1024x4xf32>
      %19 = arith.subf %13, %18 : vector<1024x4xf32>
      %20 = vector.broadcast %17 : vector<1x4xf32> to vector<1024x4xf32>
      %21 = arith.subf %13, %20 : vector<1024x4xf32>
      %22 = arith.mulf %19, %21 : vector<1024x4xf32>
      %cst_11 = arith.constant dense<0.000000e+00> : vector<4xf32>
      %23 = vector.multi_reduction <add>, %22, %cst_11 [0] : vector<1024x4xf32> to vector<4xf32>
      %24 = vector.shape_cast %23 : vector<4xf32> to vector<1x4xf32>
      %cst_12 = arith.constant 1.024000e+03 : f32
      %25 = vector.broadcast %cst_12 : f32 to vector<1x4xf32>
      %26 = arith.divf %24, %25 : vector<1x4xf32>
      %c0_13 = arith.constant 0 : index
      %c0_14 = arith.constant 0 : index
      %27 = vector.load %arg4[%c0_13, %c0_14] : memref<1x4xf32, #tpu.memory_space<vmem>>, vector<1x4xf32>
      %cst_15 = arith.constant 9.99999974E-6 : f32
      %28 = vector.broadcast %cst_15 : f32 to vector<1x4xf32>
      %29 = arith.addf %26, %28 : vector<1x4xf32>
      %30 = math.sqrt %29 : vector<1x4xf32>
      %31 = arith.divf %27, %30 : vector<1x4xf32>
      %c0_16 = arith.constant 0 : index
      %c0_17 = arith.constant 0 : index
      %32 = vector.load %arg5[%c0_16, %c0_17] : memref<1x4xf32, #tpu.memory_space<vmem>>, vector<1x4xf32>
      %33 = arith.mulf %17, %31 : vector<1x4xf32>
      %34 = arith.subf %32, %33 : vector<1x4xf32>
      %35 = vector.broadcast %31 : vector<1x4xf32> to vector<1024x4xf32>
      %36 = arith.mulf %13, %35 : vector<1024x4xf32>
      %37 = vector.broadcast %34 : vector<1x4xf32> to vector<1024x4xf32>
      %38 = arith.addf %36, %37 : vector<1024x4xf32>
      %cst_18 = arith.constant 0.000000e+00 : f32
      %39 = vector.broadcast %cst_18 : f32 to vector<1024x4xf32>
      %40 = arith.maximumf %38, %39 : vector<1024x4xf32>
      %c0_19 = arith.constant 0 : index
      %c0_20 = arith.constant 0 : index
      %41 = vector.load %arg6[%c0_19, %c0_20] : memref<1024x4xf32, #tpu.memory_space<vmem>>, vector<1024x4xf32>
      tpu.vector_store %arg6[%c0_19, %c0_20], %40 {strides = array<i32>} : memref<1024x4xf32, #tpu.memory_space<vmem>>, vector<1024x4xf32>,
    } else {
    }
    return
  }
  func.func @transform_0(%arg0: i32) -> (i32, i32) {
    %c0_i32 = arith.constant 0 : i32
    %c0_i32_0 = arith.constant 0 : i32
    return %arg0, %c0_i32 : i32, i32
  }
  func.func @transform_1(%arg0: i32) -> (i32, i32) {
    %c0_i32 = arith.constant 0 : i32
    %c0_i32_0 = arith.constant 0 : i32
    %c0_i32_1 = arith.constant 0 : i32
    return %c0_i32, %c0_i32_0 : i32, i32
  }
  func.func @transform_2(%arg0: i32) -> (i32, i32) {
    %c0_i32 = arith.constant 0 : i32
    %c0_i32_0 = arith.constant 0 : i32
    %c0_i32_1 = arith.constant 0 : i32
    return %c0_i32, %c0_i32_0 : i32, i32
  }
  func.func @transform_3(%arg0: i32) -> (i32, i32) {
    %c0_i32 = arith.constant 0 : i32
    %c0_i32_0 = arith.constant 0 : i32
    %c0_i32_1 = arith.constant 0 : i32
    return %c0_i32, %c0_i32_0 : i32, i32
  }
  func.func @transform_4(%arg0: i32) -> (i32, i32) {
    %c0_i32 = arith.constant 0 : i32
    %c0_i32_0 = arith.constant 0 : i32
    %c0_i32_1 = arith.constant 0 : i32
    return %c0_i32, %c0_i32_0 : i32, i32
  }
  func.func @transform_5(%arg0: i32) -> (i32, i32) {
    %c0_i32 = arith.constant 0 : i32
    %c0_i32_0 = arith.constant 0 : i32
    %c0_i32_1 = arith.constant 0 : i32
    return %c0_i32, %c0_i32_0 : i32, i32
  }
}

module attributes {stable_mosaic.version = 11 : i64} {
  func.func @_fused_conv_bn_relu_kernel(%arg0: i32, %arg1: memref<128x108xf32, #tpu.memory_space<vmem>>, %arg2: memref<108x8xf32, #tpu.memory_space<vmem>>, %arg3: memref<1x8xf32, #tpu.memory_space<vmem>>, %arg4: memref<1x8xf32, #tpu.memory_space<vmem>>, %arg5: memref<1x8xf32, #tpu.memory_space<vmem>>, %arg6: memref<128x8xf32, #tpu.memory_space<vmem>>) attributes {dimension_semantics = [#tpu.dimension_semantics<arbitrary>], iteration_bounds = array<i64: 1>, scalar_prefetch = 0 : i64, scratch_operands = 0 : i64, tpu.core_type = #tpu.core_type<tc>, window_params = [{transform_indices = @transform_0, window_bounds = array<i64: 128, 108>}, {pipeline_mode = #tpu.pipeline_mode<synchronous>, transform_indices = @transform_1, window_bounds = array<i64: 108, 8>}, {pipeline_mode = #tpu.pipeline_mode<synchronous>, transform_indices = @transform_2, window_bounds = array<i64: 1, 8>}, {pipeline_mode = #tpu.pipeline_mode<synchronous>, transform_indices = @transform_3, window_bounds = array<i64: 1, 8>}, {pipeline_mode = #tpu.pipeline_mode<synchronous>, transform_indices = @transform_4, window_bounds = array<i64: 1, 8>}, {pipeline_mode = #tpu.pipeline_mode<synchronous>, transform_indices = @transform_5, window_bounds = array<i64: 128, 8>}]} {
    %c0 = arith.constant 0 : index
    %c0_0 = arith.constant 0 : index
    %0 = vector.load %arg1[%c0, %c0_0] : memref<128x108xf32, #tpu.memory_space<vmem>>, vector<128x108xf32>
    %c0_1 = arith.constant 0 : index
    %c0_2 = arith.constant 0 : index
    %1 = vector.load %arg2[%c0_1, %c0_2] : memref<108x8xf32, #tpu.memory_space<vmem>>, vector<108x8xf32>
    %cst = arith.constant dense<0.000000e+00> : vector<128x8xf32>
    %2 = tpu.matmul %0, %1, %cst {dimension_numbers = #tpu.dot_dimension_numbers<[1], [0], [0], [1], [0, 0, 1, 1], [], []>} : vector<128x108xf32>, vector<108x8xf32>, vector<128x8xf32> -> vector<128x8xf32>
    %c0_3 = arith.constant 0 : index
    %c0_4 = arith.constant 0 : index
    %3 = vector.load %arg3[%c0_3, %c0_4] : memref<1x8xf32, #tpu.memory_space<vmem>>, vector<1x8xf32>
    %4 = vector.broadcast %3 : vector<1x8xf32> to vector<128x8xf32>
    %5 = arith.addf %2, %4 : vector<128x8xf32>
    %c128_i32 = arith.constant 128 : i32
    %6 = arith.muli %arg0, %c128_i32 : i32
    %7 = tpu.assume_multiple %6, 128 : i32
    %8 = arith.index_cast %7 : i32 to index
    %c0_5 = arith.constant 0 : index
    %9 = vector.load %arg6[%8, %c0_5] : memref<128x8xf32, #tpu.memory_space<vmem>>, vector<128x8xf32>
    tpu.vector_store %arg6[%8, %c0_5], %5 {strides = array<i32>} : memref<128x8xf32, #tpu.memory_space<vmem>>, vector<128x8xf32>,
    %c0_i32 = arith.constant 0 : i32
    %10 = arith.cmpi eq, %arg0, %c0_i32 : i32
    %11 = arith.extui %10 : i1 to i32
    %c0_i32_6 = arith.constant 0 : i32
    %12 = arith.cmpi ne, %11, %c0_i32_6 : i32
    scf.if %12 {
      %c0_7 = arith.constant 0 : index
      %c0_8 = arith.constant 0 : index
      %13 = vector.load %arg6[%c0_7, %c0_8] : memref<128x8xf32, #tpu.memory_space<vmem>>, vector<128x8xf32>
      %cst_9 = arith.constant dense<0.000000e+00> : vector<8xf32>
      %14 = vector.multi_reduction <add>, %13, %cst_9 [0] : vector<128x8xf32> to vector<8xf32>
      %15 = vector.shape_cast %14 : vector<8xf32> to vector<1x8xf32>
      %cst_10 = arith.constant 1.280000e+02 : f32
      %16 = vector.broadcast %cst_10 : f32 to vector<1x8xf32>
      %17 = arith.divf %15, %16 : vector<1x8xf32>
      %18 = vector.broadcast %17 : vector<1x8xf32> to vector<128x8xf32>
      %19 = arith.subf %13, %18 : vector<128x8xf32>
      %20 = vector.broadcast %17 : vector<1x8xf32> to vector<128x8xf32>
      %21 = arith.subf %13, %20 : vector<128x8xf32>
      %22 = arith.mulf %19, %21 : vector<128x8xf32>
      %cst_11 = arith.constant dense<0.000000e+00> : vector<8xf32>
      %23 = vector.multi_reduction <add>, %22, %cst_11 [0] : vector<128x8xf32> to vector<8xf32>
      %24 = vector.shape_cast %23 : vector<8xf32> to vector<1x8xf32>
      %cst_12 = arith.constant 1.280000e+02 : f32
      %25 = vector.broadcast %cst_12 : f32 to vector<1x8xf32>
      %26 = arith.divf %24, %25 : vector<1x8xf32>
      %c0_13 = arith.constant 0 : index
      %c0_14 = arith.constant 0 : index
      %27 = vector.load %arg4[%c0_13, %c0_14] : memref<1x8xf32, #tpu.memory_space<vmem>>, vector<1x8xf32>
      %cst_15 = arith.constant 9.99999974E-6 : f32
      %28 = vector.broadcast %cst_15 : f32 to vector<1x8xf32>
      %29 = arith.addf %26, %28 : vector<1x8xf32>
      %30 = math.sqrt %29 : vector<1x8xf32>
      %31 = arith.divf %27, %30 : vector<1x8xf32>
      %c0_16 = arith.constant 0 : index
      %c0_17 = arith.constant 0 : index
      %32 = vector.load %arg5[%c0_16, %c0_17] : memref<1x8xf32, #tpu.memory_space<vmem>>, vector<1x8xf32>
      %33 = arith.mulf %17, %31 : vector<1x8xf32>
      %34 = arith.subf %32, %33 : vector<1x8xf32>
      %35 = vector.broadcast %31 : vector<1x8xf32> to vector<128x8xf32>
      %36 = arith.mulf %13, %35 : vector<128x8xf32>
      %37 = vector.broadcast %34 : vector<1x8xf32> to vector<128x8xf32>
      %38 = arith.addf %36, %37 : vector<128x8xf32>
      %cst_18 = arith.constant 0.000000e+00 : f32
      %39 = vector.broadcast %cst_18 : f32 to vector<128x8xf32>
      %40 = arith.maximumf %38, %39 : vector<128x8xf32>
      %c0_19 = arith.constant 0 : index
      %c0_20 = arith.constant 0 : index
      %41 = vector.load %arg6[%c0_19, %c0_20] : memref<128x8xf32, #tpu.memory_space<vmem>>, vector<128x8xf32>
      tpu.vector_store %arg6[%c0_19, %c0_20], %40 {strides = array<i32>} : memref<128x8xf32, #tpu.memory_space<vmem>>, vector<128x8xf32>,
    } else {
    }
    return
  }
  func.func @transform_0(%arg0: i32) -> (i32, i32) {
    %c0_i32 = arith.constant 0 : i32
    %c0_i32_0 = arith.constant 0 : i32
    return %arg0, %c0_i32 : i32, i32
  }
  func.func @transform_1(%arg0: i32) -> (i32, i32) {
    %c0_i32 = arith.constant 0 : i32
    %c0_i32_0 = arith.constant 0 : i32
    %c0_i32_1 = arith.constant 0 : i32
    return %c0_i32, %c0_i32_0 : i32, i32
  }
  func.func @transform_2(%arg0: i32) -> (i32, i32) {
    %c0_i32 = arith.constant 0 : i32
    %c0_i32_0 = arith.constant 0 : i32
    %c0_i32_1 = arith.constant 0 : i32
    return %c0_i32, %c0_i32_0 : i32, i32
  }
  func.func @transform_3(%arg0: i32) -> (i32, i32) {
    %c0_i32 = arith.constant 0 : i32
    %c0_i32_0 = arith.constant 0 : i32
    %c0_i32_1 = arith.constant 0 : i32
    return %c0_i32, %c0_i32_0 : i32, i32
  }
  func.func @transform_4(%arg0: i32) -> (i32, i32) {
    %c0_i32 = arith.constant 0 : i32
    %c0_i32_0 = arith.constant 0 : i32
    %c0_i32_1 = arith.constant 0 : i32
    return %c0_i32, %c0_i32_0 : i32, i32
  }
  func.func @transform_5(%arg0: i32) -> (i32, i32) {
    %c0_i32 = arith.constant 0 : i32
    %c0_i32_0 = arith.constant 0 : i32
    %c0_i32_1 = arith.constant 0 : i32
    return %c0_i32, %c0_i32_0 : i32, i32
  }
}

module attributes {stable_mosaic.version = 11 : i64} {
  func.func @_fused_conv_bn_relu_kernel(%arg0: i32, %arg1: memref<16x216xf32, #tpu.memory_space<vmem>>, %arg2: memref<216x16xf32, #tpu.memory_space<vmem>>, %arg3: memref<1x16xf32, #tpu.memory_space<vmem>>, %arg4: memref<1x16xf32, #tpu.memory_space<vmem>>, %arg5: memref<1x16xf32, #tpu.memory_space<vmem>>, %arg6: memref<16x16xf32, #tpu.memory_space<vmem>>) attributes {dimension_semantics = [#tpu.dimension_semantics<arbitrary>], iteration_bounds = array<i64: 1>, scalar_prefetch = 0 : i64, scratch_operands = 0 : i64, tpu.core_type = #tpu.core_type<tc>, window_params = [{transform_indices = @transform_0, window_bounds = array<i64: 16, 216>}, {pipeline_mode = #tpu.pipeline_mode<synchronous>, transform_indices = @transform_1, window_bounds = array<i64: 216, 16>}, {pipeline_mode = #tpu.pipeline_mode<synchronous>, transform_indices = @transform_2, window_bounds = array<i64: 1, 16>}, {pipeline_mode = #tpu.pipeline_mode<synchronous>, transform_indices = @transform_3, window_bounds = array<i64: 1, 16>}, {pipeline_mode = #tpu.pipeline_mode<synchronous>, transform_indices = @transform_4, window_bounds = array<i64: 1, 16>}, {pipeline_mode = #tpu.pipeline_mode<synchronous>, transform_indices = @transform_5, window_bounds = array<i64: 16, 16>}]} {
    %c0 = arith.constant 0 : index
    %c0_0 = arith.constant 0 : index
    %0 = vector.load %arg1[%c0, %c0_0] : memref<16x216xf32, #tpu.memory_space<vmem>>, vector<16x216xf32>
    %c0_1 = arith.constant 0 : index
    %c0_2 = arith.constant 0 : index
    %1 = vector.load %arg2[%c0_1, %c0_2] : memref<216x16xf32, #tpu.memory_space<vmem>>, vector<216x16xf32>
    %cst = arith.constant dense<0.000000e+00> : vector<16x16xf32>
    %2 = tpu.matmul %0, %1, %cst {dimension_numbers = #tpu.dot_dimension_numbers<[1], [0], [0], [1], [0, 0, 1, 1], [], []>} : vector<16x216xf32>, vector<216x16xf32>, vector<16x16xf32> -> vector<16x16xf32>
    %c0_3 = arith.constant 0 : index
    %c0_4 = arith.constant 0 : index
    %3 = vector.load %arg3[%c0_3, %c0_4] : memref<1x16xf32, #tpu.memory_space<vmem>>, vector<1x16xf32>
    %4 = vector.broadcast %3 : vector<1x16xf32> to vector<16x16xf32>
    %5 = arith.addf %2, %4 : vector<16x16xf32>
    %c16_i32 = arith.constant 16 : i32
    %6 = arith.muli %arg0, %c16_i32 : i32
    %7 = tpu.assume_multiple %6, 16 : i32
    %8 = arith.index_cast %7 : i32 to index
    %c0_5 = arith.constant 0 : index
    %9 = vector.load %arg6[%8, %c0_5] : memref<16x16xf32, #tpu.memory_space<vmem>>, vector<16x16xf32>
    tpu.vector_store %arg6[%8, %c0_5], %5 {strides = array<i32>} : memref<16x16xf32, #tpu.memory_space<vmem>>, vector<16x16xf32>,
    %c0_i32 = arith.constant 0 : i32
    %10 = arith.cmpi eq, %arg0, %c0_i32 : i32
    %11 = arith.extui %10 : i1 to i32
    %c0_i32_6 = arith.constant 0 : i32
    %12 = arith.cmpi ne, %11, %c0_i32_6 : i32
    scf.if %12 {
      %c0_7 = arith.constant 0 : index
      %c0_8 = arith.constant 0 : index
      %13 = vector.load %arg6[%c0_7, %c0_8] : memref<16x16xf32, #tpu.memory_space<vmem>>, vector<16x16xf32>
      %cst_9 = arith.constant dense<0.000000e+00> : vector<16xf32>
      %14 = vector.multi_reduction <add>, %13, %cst_9 [0] : vector<16x16xf32> to vector<16xf32>
      %15 = vector.shape_cast %14 : vector<16xf32> to vector<1x16xf32>
      %cst_10 = arith.constant 1.600000e+01 : f32
      %16 = vector.broadcast %cst_10 : f32 to vector<1x16xf32>
      %17 = arith.divf %15, %16 : vector<1x16xf32>
      %18 = vector.broadcast %17 : vector<1x16xf32> to vector<16x16xf32>
      %19 = arith.subf %13, %18 : vector<16x16xf32>
      %20 = vector.broadcast %17 : vector<1x16xf32> to vector<16x16xf32>
      %21 = arith.subf %13, %20 : vector<16x16xf32>
      %22 = arith.mulf %19, %21 : vector<16x16xf32>
      %cst_11 = arith.constant dense<0.000000e+00> : vector<16xf32>
      %23 = vector.multi_reduction <add>, %22, %cst_11 [0] : vector<16x16xf32> to vector<16xf32>
      %24 = vector.shape_cast %23 : vector<16xf32> to vector<1x16xf32>
      %cst_12 = arith.constant 1.600000e+01 : f32
      %25 = vector.broadcast %cst_12 : f32 to vector<1x16xf32>
      %26 = arith.divf %24, %25 : vector<1x16xf32>
      %c0_13 = arith.constant 0 : index
      %c0_14 = arith.constant 0 : index
      %27 = vector.load %arg4[%c0_13, %c0_14] : memref<1x16xf32, #tpu.memory_space<vmem>>, vector<1x16xf32>
      %cst_15 = arith.constant 9.99999974E-6 : f32
      %28 = vector.broadcast %cst_15 : f32 to vector<1x16xf32>
      %29 = arith.addf %26, %28 : vector<1x16xf32>
      %30 = math.sqrt %29 : vector<1x16xf32>
      %31 = arith.divf %27, %30 : vector<1x16xf32>
      %c0_16 = arith.constant 0 : index
      %c0_17 = arith.constant 0 : index
      %32 = vector.load %arg5[%c0_16, %c0_17] : memref<1x16xf32, #tpu.memory_space<vmem>>, vector<1x16xf32>
      %33 = arith.mulf %17, %31 : vector<1x16xf32>
      %34 = arith.subf %32, %33 : vector<1x16xf32>
      %35 = vector.broadcast %31 : vector<1x16xf32> to vector<16x16xf32>
      %36 = arith.mulf %13, %35 : vector<16x16xf32>
      %37 = vector.broadcast %34 : vector<1x16xf32> to vector<16x16xf32>
      %38 = arith.addf %36, %37 : vector<16x16xf32>
      %cst_18 = arith.constant 0.000000e+00 : f32
      %39 = vector.broadcast %cst_18 : f32 to vector<16x16xf32>
      %40 = arith.maximumf %38, %39 : vector<16x16xf32>
      %c0_19 = arith.constant 0 : index
      %c0_20 = arith.constant 0 : index
      %41 = vector.load %arg6[%c0_19, %c0_20] : memref<16x16xf32, #tpu.memory_space<vmem>>, vector<16x16xf32>
      tpu.vector_store %arg6[%c0_19, %c0_20], %40 {strides = array<i32>} : memref<16x16xf32, #tpu.memory_space<vmem>>, vector<16x16xf32>,
    } else {
    }
    return
  }
  func.func @transform_0(%arg0: i32) -> (i32, i32) {
    %c0_i32 = arith.constant 0 : i32
    %c0_i32_0 = arith.constant 0 : i32
    return %arg0, %c0_i32 : i32, i32
  }
  func.func @transform_1(%arg0: i32) -> (i32, i32) {
    %c0_i32 = arith.constant 0 : i32
    %c0_i32_0 = arith.constant 0 : i32
    %c0_i32_1 = arith.constant 0 : i32
    return %c0_i32, %c0_i32_0 : i32, i32
  }
  func.func @transform_2(%arg0: i32) -> (i32, i32) {
    %c0_i32 = arith.constant 0 : i32
    %c0_i32_0 = arith.constant 0 : i32
    %c0_i32_1 = arith.constant 0 : i32
    return %c0_i32, %c0_i32_0 : i32, i32
  }
  func.func @transform_3(%arg0: i32) -> (i32, i32) {
    %c0_i32 = arith.constant 0 : i32
    %c0_i32_0 = arith.constant 0 : i32
    %c0_i32_1 = arith.constant 0 : i32
    return %c0_i32, %c0_i32_0 : i32, i32
  }
  func.func @transform_4(%arg0: i32) -> (i32, i32) {
    %c0_i32 = arith.constant 0 : i32
    %c0_i32_0 = arith.constant 0 : i32
    %c0_i32_1 = arith.constant 0 : i32
    return %c0_i32, %c0_i32_0 : i32, i32
  }
  func.func @transform_5(%arg0: i32) -> (i32, i32) {
    %c0_i32 = arith.constant 0 : i32
    %c0_i32_0 = arith.constant 0 : i32
    %c0_i32_1 = arith.constant 0 : i32
    return %c0_i32, %c0_i32_0 : i32, i32
  }
}

module attributes {stable_mosaic.version = 11 : i64} {
  func.func @_matmul_bias_kernel(%arg0: memref<2x128xf32, #tpu.memory_space<vmem>>, %arg1: memref<128x10xf32, #tpu.memory_space<vmem>>, %arg2: memref<1x10xf32, #tpu.memory_space<vmem>>, %arg3: memref<2x10xf32, #tpu.memory_space<vmem>>) attributes {dimension_semantics = [], scalar_prefetch = 0 : i64, scratch_operands = 0 : i64, tpu.core_type = #tpu.core_type<tc>} {
    %c0 = arith.constant 0 : index
    %c0_0 = arith.constant 0 : index
    %0 = vector.load %arg0[%c0, %c0_0] : memref<2x128xf32, #tpu.memory_space<vmem>>, vector<2x128xf32>
    %c0_1 = arith.constant 0 : index
    %c0_2 = arith.constant 0 : index
    %1 = vector.load %arg1[%c0_1, %c0_2] : memref<128x10xf32, #tpu.memory_space<vmem>>, vector<128x10xf32>
    %cst = arith.constant dense<0.000000e+00> : vector<2x10xf32>
    %2 = tpu.matmul %0, %1, %cst {dimension_numbers = #tpu.dot_dimension_numbers<[1], [0], [0], [1], [0, 0, 1, 1], [], []>} : vector<2x128xf32>, vector<128x10xf32>, vector<2x10xf32> -> vector<2x10xf32>
    %c0_3 = arith.constant 0 : index
    %c0_4 = arith.constant 0 : index
    %3 = vector.load %arg2[%c0_3, %c0_4] : memref<1x10xf32, #tpu.memory_space<vmem>>, vector<1x10xf32>
    %4 = vector.broadcast %3 : vector<1x10xf32> to vector<2x10xf32>
    %5 = arith.addf %2, %4 : vector<2x10xf32>
    %c0_5 = arith.constant 0 : index
    %c0_6 = arith.constant 0 : index
    %6 = vector.load %arg3[%c0_5, %c0_6] : memref<2x10xf32, #tpu.memory_space<vmem>>, vector<2x10xf32>
    tpu.vector_store %arg3[%c0_5, %c0_6], %5 {strides = array<i32>} : memref<2x10xf32, #tpu.memory_space<vmem>>, vector<2x10xf32>,
    return
  }
}

</mosaic_0001>

<bundles_post_ra>
// kernel: conv3dnet_forward.4
= control target key start
LH: loop header
LB: loop body
LE: loop exit
PB: predicated region body
PF: predicated region fallthrough
CT: control target
= control target key end

     0   :  { %vm162_vm0 = vcmask 441344   ;;  %vm547_vm1 = vcmask 1045504   ;;  %vm1258_vm2 = vcmask 31744   ;;  %s7894_s1 = inlined_call_operand.vmem [shape: f32[54,4], index: 1, kind: input, shape index: {}]   ;;  %s7895_s0 = inlined_call_operand.vmem [shape: f32[1024,54], index: 0, kind: input, shape index: {}]   ;;  %s7896_s2 = inlined_call_operand.vmem [shape: f32[1,4], index: 2, kind: input, shape index: {}]   ;;  %s7897_s5 = inlined_call_operand.vmem [shape: f32[1024,4], index: 5, kind: output, shape index: {}]   ;;  %s7898_s3 = inlined_call_operand.vmem [shape: f32[1,4], index: 3, kind: input, shape index: {}]   ;;  %s7899_s4 = inlined_call_operand.vmem [shape: f32[1,4], index: 4, kind: input, shape index: {}]  }
   0x1   :  { %v148_v0 = vld [vmem:[%s7894_s1] sm:$0xff]  ;;  %v149_v1 = vld [vmem:[%s7894_s1 + $0x8] sm:$0xff]  ;;  %v150_v2 = vld [vmem:[%s7894_s1 + $0x10] sm:$0xff] }
   0x2   :  { %v3313_v3 = vpack.c.bf16 %v149_v1, %v148_v0  ;;  %v151_v4 = vld [vmem:[%s7894_s1 + $0x18] sm:$0xff]  ;;  %v152_v6 = vld [vmem:[%s7894_s1 + $0x20] sm:$0xff]  ;;  %v153_v7 = vld [vmem:[%s7894_s1 + $0x28] sm:$0xff] }
   0x3   :  { %v3317_v5 = vpack.c.bf16 %v151_v4, %v150_v2  ;;  %v20_v8 = vld [vmem:[%s7895_s0] sm:$0xff]  ;;  %v3321_v9 = vpack.c.bf16 %v153_v7, %v152_v6  ;;  %v154_v10 = vld [vmem:[%s7894_s1 + $0x30] sm:$0x3f]  ;;  %v21_v11 = vld [vmem:[%s7895_s0 + $0x8] sm:$0xff] }
   0x4   :  { %3314 = vmatprep.subr.bf16.mxu0 %v3313_v3  ;;  %3121 = vmatprep.mubr.msk.f32.mxu0 %vm162_vm0, %v20_v8  ;;  %v22_v12 = vld [vmem:[%s7895_s0 + $0x10] sm:$0xff]  ;;  %v23_v13 = vld [vmem:[%s7895_s0 + $0x18] sm:$0xff]  ;;  %v24_v14 = vld [vmem:[%s7895_s0 + $0x20] sm:$0xff] }
   0x5   :  { %3316 = vmatpush3.bf16.msra.mxu0 %v3313_v3  ;;  %3325 = vmatprep.subr.bf16.mxu1 %v3313_v3  ;;  %v25_v15 = vld [vmem:[%s7895_s0 + $0x28] sm:$0xff]  ;;  %v26_v16 = vld [vmem:[%s7895_s0 + $0x30] sm:$0xff]  ;;  %v84_v17 = vld [vmem:[%s7895_s0 + $0x200] sm:$0xff] }
   0x6   :  { %3318 = vmatprep.subr.bf16.mxu0 %v3317_v5  ;;  %3329 = vmatpush3.bf16.msra.mxu1 %v3313_v3  ;;  %v85_v18 = vld [vmem:[%s7895_s0 + $0x208] sm:$0xff]  ;;  %v86_v19 = vld [vmem:[%s7895_s0 + $0x210] sm:$0xff]  ;;  %v27_v20 = vld [vmem:[%s7895_s0 + $0x38] sm:$0xff] }
   0x7   :  { %3326 = vmatprep.subr.bf16.mxu1 %v3317_v5  ;;  %3217 = vmatprep.mubr.msk.f32.mxu1 %vm162_vm0, %v84_v17  ;;  %v87_v21 = vld [vmem:[%s7895_s0 + $0x218] sm:$0xff]  ;;  %v28_v22 = vld [vmem:[%s7895_s0 + $0x40] sm:$0xff]  ;;  %v29_v24 = vld [vmem:[%s7895_s0 + $0x48] sm:$0xff] }
   0x8   :  { %v88_v23 = vld [vmem:[%s7895_s0 + $0x220] sm:$0xff]  ;;  %v89_v25 = vld [vmem:[%s7895_s0 + $0x228] sm:$0xff]  ;;  %v30_v26 = vld [vmem:[%s7895_s0 + $0x50] sm:$0xff] }
   0x9   :  { %3320 = vmatpush3.bf16.msra.mxu0 %v3317_v5  ;;  %v90_v27 = vld [vmem:[%s7895_s0 + $0x230] sm:$0xff]  ;;  %v31_v28 = vld [vmem:[%s7895_s0 + $0x58] sm:$0xff]  ;;  %v32_v30 = vld [vmem:[%s7895_s0 + $0x60] sm:$0xff] }
   0xa   :  { %3322 = vmatprep.subr.bf16.mxu0 %v3321_v9  ;;  %3330 = vmatpush3.bf16.msra.mxu1 %v3317_v5  ;;  %v91_v29 = vld [vmem:[%s7895_s0 + $0x238] sm:$0xff]  ;;  %v92_v31 = vld [vmem:[%s7895_s0 + $0x240] sm:$0xff]  ;;  %v33_v32 = vld [vmem:[%s7895_s0 + $0x68] sm:$0xff] }
   0xb   :  { %3327 = vmatprep.subr.bf16.mxu1 %v3321_v9  ;;  %v93_v33 = vld [vmem:[%s7895_s0 + $0x248] sm:$0xff]  ;;  %v34_v34 = vld [vmem:[%s7895_s0 + $0x70] sm:$0xff]  ;;  %v35_v36 = vld [vmem:[%s7895_s0 + $0x78] sm:$0xff] }
   0xc   :  { %v94_v35 = vld [vmem:[%s7895_s0 + $0x250] sm:$0xff]  ;;  %v95_v37 = vld [vmem:[%s7895_s0 + $0x258] sm:$0xff]  ;;  %v36_v38 = vld [vmem:[%s7895_s0 + $0x80] sm:$0xff] }
   0xd   :  { %3324 = vmatpush3.bf16.msra.mxu0 %v3321_v9  ;;  %v96_v39 = vld [vmem:[%s7895_s0 + $0x260] sm:$0xff]  ;;  %v37_v40 = vld [vmem:[%s7895_s0 + $0x88] sm:$0xff]  ;;  %v38_v42 = vld [vmem:[%s7895_s0 + $0x90] sm:$0xff] }
   0xe   :  { %3119 = vmatprep.subr.msk.mxu0 %vm547_vm1, %v154_v10  ;;  %3331 = vmatpush3.bf16.msra.mxu1 %v3321_v9  ;;  %v97_v41 = vld [vmem:[%s7895_s0 + $0x268] sm:$0xff]  ;;  %v98_v43 = vld [vmem:[%s7895_s0 + $0x270] sm:$0xff]  ;;  %v39_v44 = vld [vmem:[%s7895_s0 + $0x98] sm:$0xff] }
   0xf   :  { %3328 = vmatprep.subr.msk.mxu1 %vm547_vm1, %v154_v10  ;;  %v99_v45 = vld [vmem:[%s7895_s0 + $0x278] sm:$0xff]  ;;  %v40_v46 = vld [vmem:[%s7895_s0 + $0xa0] sm:$0xff]  ;;  %v41_v48 = vld [vmem:[%s7895_s0 + $0xa8] sm:$0xff] }
  0x10   :  { %v100_v47 = vld [vmem:[%s7895_s0 + $0x280] sm:$0xff]  ;;  %v101_v49 = vld [vmem:[%s7895_s0 + $0x288] sm:$0xff]  ;;  %v42_v50 = vld [vmem:[%s7895_s0 + $0xb0] sm:$0xff] }
  0x11   :  { %3120 = vmatpush3.msk.msra.mxu0 %vm547_vm1, %v154_v10  ;;  %v102_v51 = vld [vmem:[%s7895_s0 + $0x290] sm:$0xff]  ;;  %v43_v52 = vld [vmem:[%s7895_s0 + $0xb8] sm:$0xff]  ;;  %v44_v54 = vld [vmem:[%s7895_s0 + $0xc0] sm:$0xff] }
  0x12   :  { %3122 = vmatmul.mubr.msk.f32.vlgmr.msra.gmra.mrb[0].mxu0 %vm162_vm0, %v21_v11  ;;  %3332 = vmatpush3.msk.msra.mxu1 %vm547_vm1, %v154_v10  ;;  %v103_v53 = vld [vmem:[%s7895_s0 + $0x298] sm:$0xff]  ;;  %v104_v55 = vld [vmem:[%s7895_s0 + $0x2a0] sm:$0xff]  ;;  %v45_v56 = vld [vmem:[%s7895_s0 + $0xc8] sm:$0xff] }
  0x13   :  { %3124 = vmatprep.mubr.msk.f32.mxu0 %vm162_vm0, %v22_v12  ;;  %3218 = vmatmul.mubr.msk.f32.vlgmr.msra.gmra.mrb[0].mxu1 %vm162_vm0, %v85_v18  ;;  %v105_v57 = vld [vmem:[%s7895_s0 + $0x2a8] sm:$0xff]  ;;  %v46_v58 = vld [vmem:[%s7895_s0 + $0xd0] sm:$0xff]  ;;  %v47_v60 = vld [vmem:[%s7895_s0 + $0xd8] sm:$0xff] }
  0x14   :  { %3220 = vmatprep.mubr.msk.f32.mxu1 %vm162_vm0, %v86_v19  ;;  %v106_v59 = vld [vmem:[%s7895_s0 + $0x2b0] sm:$0xff]  ;;  %v107_v61 = vld [vmem:[%s7895_s0 + $0x2b8] sm:$0xff]  ;;  %v48_v62 = vld [vmem:[%s7895_s0 + $0xe0] sm:$0xff] }
  0x15   :  { %v108_v63 = vld [vmem:[%s7895_s0 + $0x2c0] sm:$0xff]  ;;  %v49_v0 = vld [vmem:[%s7895_s0 + $0xe8] sm:$0xff]  ;;  %v50_v2 = vld [vmem:[%s7895_s0 + $0xf0] sm:$0xff] }
  0x16   :  { %3125 = vmatmul.mubr.msk.f32.gmra.mrb[2].mxu0 %vm162_vm0, %v23_v13  ;;  %v109_v1 = vld [vmem:[%s7895_s0 + $0x2c8] sm:$0xff]  ;;  %v110_v3 = vld [vmem:[%s7895_s0 + $0x2d0] sm:$0xff]  ;;  %v51_v4 = vld [vmem:[%s7895_s0 + $0xf8] sm:$0xff] }
  0x17   :  { %3127 = vmatprep.mubr.msk.f32.mxu0 %vm162_vm0, %v24_v14  ;;  %3221 = vmatmul.mubr.msk.f32.gmra.mrb[2].mxu1 %vm162_vm0, %v87_v21  ;;  %v111_v5 = vld [vmem:[%s7895_s0 + $0x2d8] sm:$0xff]  ;;  %v52_v6 = vld [vmem:[%s7895_s0 + $0x100] sm:$0xff]  ;;  %v53_v8 = vld [vmem:[%s7895_s0 + $0x108] sm:$0xff] }
  0x18   :  { %3223 = vmatprep.mubr.msk.f32.mxu1 %vm162_vm0, %v88_v23  ;;  %v112_v7 = vld [vmem:[%s7895_s0 + $0x2e0] sm:$0xff]  ;;  %v113_v9 = vld [vmem:[%s7895_s0 + $0x2e8] sm:$0xff]  ;;  %v54_v10 = vld [vmem:[%s7895_s0 + $0x110] sm:$0xff] }
  0x19   :  { %v114_v11 = vld [vmem:[%s7895_s0 + $0x2f0] sm:$0xff]  ;;  %v55_v12 = vld [vmem:[%s7895_s0 + $0x118] sm:$0xff]  ;;  %v56_v14 = vld [vmem:[%s7895_s0 + $0x120] sm:$0xff] }
  0x1a   :  { %3128 = vmatmul.mubr.msk.f32.gmra.mrb[4].mxu0 %vm162_vm0, %v25_v15  ;;  %v115_v13 = vld [vmem:[%s7895_s0 + $0x2f8] sm:$0xff]  ;;  %v116_v15 = vld [vmem:[%s7895_s0 + $0x300] sm:$0xff]  ;;  %v117_v17 = vld [vmem:[%s7895_s0 + $0x308] sm:$0xff] }
  0x1b   :  { %3130 = vmatprep.mubr.msk.f32.mxu0 %vm162_vm0, %v26_v16  ;;  %3224 = vmatmul.mubr.msk.f32.gmra.mrb[4].mxu1 %vm162_vm0, %v89_v25  ;;  %v57_v16 = vld [vmem:[%s7895_s0 + $0x128] sm:$0xff]  ;;  %v58_v18 = vld [vmem:[%s7895_s0 + $0x130] sm:$0xff]  ;;  %v119_v21 = vld [vmem:[%s7895_s0 + $0x318] sm:$0xff] }
  0x1c   :  { %3226 = vmatprep.mubr.msk.f32.mxu1 %vm162_vm0, %v90_v27  ;;  %v118_v19 = vld [vmem:[%s7895_s0 + $0x310] sm:$0xff]  ;;  %v120_v23 = vld [vmem:[%s7895_s0 + $0x320] sm:$0xff]  ;;  %v121_v25 = vld [vmem:[%s7895_s0 + $0x328] sm:$0xff] }
  0x1d   :  { %v122_v27 = vld [vmem:[%s7895_s0 + $0x330] sm:$0xff] }
  0x1e   :  { %3131 = vmatmul.mubr.msk.f32.gmra.mrb[6].mxu0 %vm162_vm0, %v27_v20  ;;  %v59_v20 = vld [vmem:[%s7895_s0 + $0x138] sm:$0xff] }
  0x1f   :  { %3133 = vmatprep.mubr.msk.f32.mxu0 %vm162_vm0, %v28_v22  ;;  %3227 = vmatmul.mubr.msk.f32.gmra.mrb[6].mxu1 %vm162_vm0, %v91_v29  ;;  %v60_v22 = vld [vmem:[%s7895_s0 + $0x140] sm:$0xff]  ;;  %v123_v29 = vld [vmem:[%s7895_s0 + $0x338] sm:$0xff] }
  0x20   :  { %3229 = vmatprep.mubr.msk.f32.mxu1 %vm162_vm0, %v92_v31  ;;  %v124_v31 = vld [vmem:[%s7895_s0 + $0x340] sm:$0xff] }
  0x22   :  { %3134 = vmatmul.mubr.msk.f32.gmra.mrb[8].mxu0 %vm162_vm0, %v29_v24  ;;  %v61_v24 = vld [vmem:[%s7895_s0 + $0x148] sm:$0xff] }
  0x23   :  { %3136 = vmatprep.mubr.msk.f32.mxu0 %vm162_vm0, %v30_v26  ;;  %3230 = vmatmul.mubr.msk.f32.gmra.mrb[8].mxu1 %vm162_vm0, %v93_v33  ;;  %v62_v26 = vld [vmem:[%s7895_s0 + $0x150] sm:$0xff]  ;;  %v125_v33 = vld [vmem:[%s7895_s0 + $0x348] sm:$0xff] }
  0x24   :  { %3232 = vmatprep.mubr.msk.f32.mxu1 %vm162_vm0, %v94_v35  ;;  %v126_v35 = vld [vmem:[%s7895_s0 + $0x350] sm:$0xff] }
  0x26   :  { %3137 = vmatmul.mubr.msk.f32.gmra.mrb[10].mxu0 %vm162_vm0, %v31_v28  ;;  %v63_v28 = vld [vmem:[%s7895_s0 + $0x158] sm:$0xff] }
  0x27   :  { %3139 = vmatprep.mubr.msk.f32.mxu0 %vm162_vm0, %v32_v30  ;;  %3233 = vmatmul.mubr.msk.f32.gmra.mrb[10].mxu1 %vm162_vm0, %v95_v37  ;;  %v64_v30 = vld [vmem:[%s7895_s0 + $0x160] sm:$0xff]  ;;  %v127_v37 = vld [vmem:[%s7895_s0 + $0x358] sm:$0xff] }
  0x28   :  { %3235 = vmatprep.mubr.msk.f32.mxu1 %vm162_vm0, %v96_v39  ;;  %v128_v39 = vld [vmem:[%s7895_s0 + $0x360] sm:$0xff] }
  0x2a   :  { %3140 = vmatmul.mubr.msk.f32.gmra.mrb[12].mxu0 %vm162_vm0, %v33_v32  ;;  %v65_v32 = vld [vmem:[%s7895_s0 + $0x168] sm:$0xff] }
  0x2b   :  { %3142 = vmatprep.mubr.msk.f32.mxu0 %vm162_vm0, %v34_v34  ;;  %3236 = vmatmul.mubr.msk.f32.gmra.mrb[12].mxu1 %vm162_vm0, %v97_v41  ;;  %v66_v34 = vld [vmem:[%s7895_s0 + $0x170] sm:$0xff]  ;;  %v129_v41 = vld [vmem:[%s7895_s0 + $0x368] sm:$0xff] }
  0x2c   :  { %3238 = vmatprep.mubr.msk.f32.mxu1 %vm162_vm0, %v98_v43  ;;  %v130_v43 = vld [vmem:[%s7895_s0 + $0x370] sm:$0xff] }
  0x2e   :  { %3143 = vmatmul.mubr.msk.f32.gmra.mrb[14].mxu0 %vm162_vm0, %v35_v36  ;;  %v67_v36 = vld [vmem:[%s7895_s0 + $0x178] sm:$0xff] }
  0x2f   :  { %3145 = vmatprep.mubr.msk.f32.mxu0 %vm162_vm0, %v36_v38  ;;  %3239 = vmatmul.mubr.msk.f32.gmra.mrb[14].mxu1 %vm162_vm0, %v99_v45  ;;  %v68_v38 = vld [vmem:[%s7895_s0 + $0x180] sm:$0xff]  ;;  %v131_v45 = vld [vmem:[%s7895_s0 + $0x378] sm:$0xff] }
  0x30   :  { %3241 = vmatprep.mubr.msk.f32.mxu1 %vm162_vm0, %v100_v47  ;;  %v132_v47 = vld [vmem:[%s7895_s0 + $0x380] sm:$0xff] }
  0x32   :  { %3146 = vmatmul.mubr.msk.f32.gmra.mrb[16].mxu0 %vm162_vm0, %v37_v40  ;;  %v69_v40 = vld [vmem:[%s7895_s0 + $0x188] sm:$0xff] }
  0x33   :  { %3148 = vmatprep.mubr.msk.f32.mxu0 %vm162_vm0, %v38_v42  ;;  %3242 = vmatmul.mubr.msk.f32.gmra.mrb[16].mxu1 %vm162_vm0, %v101_v49  ;;  %v70_v42 = vld [vmem:[%s7895_s0 + $0x190] sm:$0xff]  ;;  %v133_v49 = vld [vmem:[%s7895_s0 + $0x388] sm:$0xff] }
  0x34   :  { %3244 = vmatprep.mubr.msk.f32.mxu1 %vm162_vm0, %v102_v51  ;;  %v134_v51 = vld [vmem:[%s7895_s0 + $0x390] sm:$0xff] }
  0x36   :  { %3149 = vmatmul.mubr.msk.f32.gmra.mrb[18].mxu0 %vm162_vm0, %v39_v44  ;;  %v71_v44 = vld [vmem:[%s7895_s0 + $0x198] sm:$0xff] }
  0x37   :  { %3151 = vmatprep.mubr.msk.f32.mxu0 %vm162_vm0, %v40_v46  ;;  %3245 = vmatmul.mubr.msk.f32.gmra.mrb[18].mxu1 %vm162_vm0, %v103_v53  ;;  %v72_v46 = vld [vmem:[%s7895_s0 + $0x1a0] sm:$0xff]  ;;  %v135_v53 = vld [vmem:[%s7895_s0 + $0x398] sm:$0xff] }
  0x38   :  { %3247 = vmatprep.mubr.msk.f32.mxu1 %vm162_vm0, %v104_v55  ;;  %v136_v55 = vld [vmem:[%s7895_s0 + $0x3a0] sm:$0xff] }
  0x3a   :  { %3152 = vmatmul.mubr.msk.f32.gmra.mrb[20].mxu0 %vm162_vm0, %v41_v48  ;;  %v73_v48 = vld [vmem:[%s7895_s0 + $0x1a8] sm:$0xff] }
  0x3b   :  { %3154 = vmatprep.mubr.msk.f32.mxu0 %vm162_vm0, %v42_v50  ;;  %3248 = vmatmul.mubr.msk.f32.gmra.mrb[20].mxu1 %vm162_vm0, %v105_v57  ;;  %v74_v50 = vld [vmem:[%s7895_s0 + $0x1b0] sm:$0xff]  ;;  %v137_v57 = vld [vmem:[%s7895_s0 + $0x3a8] sm:$0xff] }
  0x3c   :  { %3250 = vmatprep.mubr.msk.f32.mxu1 %vm162_vm0, %v106_v59  ;;  %v138_v59 = vld [vmem:[%s7895_s0 + $0x3b0] sm:$0xff] }
  0x3e   :  { %3155 = vmatmul.mubr.msk.f32.gmra.mrb[22].mxu0 %vm162_vm0, %v43_v52  ;;  %v75_v52 = vld [vmem:[%s7895_s0 + $0x1b8] sm:$0xff] }
  0x3f   :  { %3157 = vmatprep.mubr.msk.f32.mxu0 %vm162_vm0, %v44_v54  ;;  %3251 = vmatmul.mubr.msk.f32.gmra.mrb[22].mxu1 %vm162_vm0, %v107_v61  ;;  %v76_v54 = vld [vmem:[%s7895_s0 + $0x1c0] sm:$0xff]  ;;  %v139_v61 = vld [vmem:[%s7895_s0 + $0x3b8] sm:$0xff] }
  0x40   :  { %3253 = vmatprep.mubr.msk.f32.mxu1 %vm162_vm0, %v108_v63  ;;  %v140_v63 = vld [vmem:[%s7895_s0 + $0x3c0] sm:$0xff] }
  0x42   :  { %3158 = vmatmul.mubr.msk.f32.gmra.mrb[24].mxu0 %vm162_vm0, %v45_v56  ;;  %v77_v56 = vld [vmem:[%s7895_s0 + $0x1c8] sm:$0xff] }
  0x43   :  { %3160 = vmatprep.mubr.msk.f32.mxu0 %vm162_vm0, %v46_v58  ;;  %3254 = vmatmul.mubr.msk.f32.gmra.mrb[24].mxu1 %vm162_vm0, %v109_v1  ;;  %v78_v58 = vld [vmem:[%s7895_s0 + $0x1d0] sm:$0xff]  ;;  %v141_v1 = vld [vmem:[%s7895_s0 + $0x3c8] sm:$0xff] }
  0x44   :  { %3256 = vmatprep.mubr.msk.f32.mxu1 %vm162_vm0, %v110_v3  ;;  %v142_v3 = vld [vmem:[%s7895_s0 + $0x3d0] sm:$0xff] }
  0x46   :  { %3161 = vmatmul.mubr.msk.f32.gmra.mrb[26].mxu0 %vm162_vm0, %v47_v60  ;;  %v79_v60 = vld [vmem:[%s7895_s0 + $0x1d8] sm:$0xff] }
  0x47   :  { %3163 = vmatprep.mubr.msk.f32.mxu0 %vm162_vm0, %v48_v62  ;;  %3257 = vmatmul.mubr.msk.f32.gmra.mrb[26].mxu1 %vm162_vm0, %v111_v5  ;;  %v80_v62 = vld [vmem:[%s7895_s0 + $0x1e0] sm:$0xff]  ;;  %v143_v5 = vld [vmem:[%s7895_s0 + $0x3d8] sm:$0xff] }
  0x48   :  { %3259 = vmatprep.mubr.msk.f32.mxu1 %vm162_vm0, %v112_v7  ;;  %v145_v7 = vld [vmem:[%s7895_s0 + $0x3e8] sm:$0xff] }
  0x4a   :  { %3164 = vmatmul.mubr.msk.f32.gmra.mrb[28].mxu0 %vm162_vm0, %v49_v0  ;;  %v81_v0 = vld [vmem:[%s7895_s0 + $0x1e8] sm:$0xff] }
  0x4b   :  { %3166 = vmatprep.mubr.msk.f32.mxu0 %vm162_vm0, %v50_v2  ;;  %3260 = vmatmul.mubr.msk.f32.gmra.mrb[28].mxu1 %vm162_vm0, %v113_v9  ;;  %v82_v2 = vld [vmem:[%s7895_s0 + $0x1f0] sm:$0xff]  ;;  %v147_v9 = vld [vmem:[%s7895_s0 + $0x3f8] sm:$0xff] }
  0x4c   :  { %3262 = vmatprep.mubr.msk.f32.mxu1 %vm162_vm0, %v114_v11 }
  0x4e   :  { %3167 = vmatmul.mubr.msk.f32.gmra.mrb[30].mxu0 %vm162_vm0, %v51_v4  ;;  %v83_v4 = vld [vmem:[%s7895_s0 + $0x1f8] sm:$0xff] }
  0x4f   :  { %3169 = vmatprep.mubr.msk.f32.mxu0 %vm162_vm0, %v52_v6  ;;  %3263 = vmatmul.mubr.msk.f32.gmra.mrb[30].mxu1 %vm162_vm0, %v115_v13  ;;  %v144_v6 = vld [vmem:[%s7895_s0 + $0x3e0] sm:$0xff] }
  0x50   :  { %3265 = vmatprep.mubr.msk.f32.mxu1 %vm162_vm0, %v116_v15 }
  0x52   :  { %3170 = vmatmul.mubr.msk.f32.gmra.mrb[32].mxu0 %vm162_vm0, %v53_v8  ;;  %v146_v8 = vld [vmem:[%s7895_s0 + $0x3f0] sm:$0xff] }
  0x53   :  { %3172 = vmatprep.mubr.msk.f32.mxu0 %vm162_vm0, %v54_v10  ;;  %3266 = vmatmul.mubr.msk.f32.gmra.mrb[32].mxu1 %vm162_vm0, %v117_v17  ;;  %v4046_v10 = vld [vmem:[%s7896_s2] ss:$0 sm:$0xff] }
  0x54   :  { %3268 = vmatprep.mubr.msk.f32.mxu1 %vm162_vm0, %v118_v19 }
  0x56   :  { %3173 = vmatmul.mubr.msk.f32.gmra.mrb[34].mxu0 %vm162_vm0, %v55_v12 }
  0x57   :  { %3175 = vmatprep.mubr.msk.f32.mxu0 %vm162_vm0, %v56_v14  ;;  %3269 = vmatmul.mubr.msk.f32.gmra.mrb[34].mxu1 %vm162_vm0, %v119_v21 }
  0x58   :  { %3271 = vmatprep.mubr.msk.f32.mxu1 %vm162_vm0, %v120_v23 }
  0x5a   :  { %3176 = vmatmul.mubr.msk.f32.gmra.mrb[36].mxu0 %vm162_vm0, %v57_v16 }
  0x5b   :  { %3178 = vmatprep.mubr.msk.f32.mxu0 %vm162_vm0, %v58_v18  ;;  %3272 = vmatmul.mubr.msk.f32.gmra.mrb[36].mxu1 %vm162_vm0, %v121_v25 }
  0x5c   :  { %3274 = vmatprep.mubr.msk.f32.mxu1 %vm162_vm0, %v122_v27 }
  0x5e   :  { %3179 = vmatmul.mubr.msk.f32.gmra.mrb[38].mxu0 %vm162_vm0, %v59_v20 }
  0x5f   :  { %3181 = vmatprep.mubr.msk.f32.mxu0 %vm162_vm0, %v60_v22  ;;  %3275 = vmatmul.mubr.msk.f32.gmra.mrb[38].mxu1 %vm162_vm0, %v123_v29 }
  0x60   :  { %3277 = vmatprep.mubr.msk.f32.mxu1 %vm162_vm0, %v124_v31 }
  0x62   :  { %3182 = vmatmul.mubr.msk.f32.gmra.mrb[40].mxu0 %vm162_vm0, %v61_v24 }
  0x63   :  { %3184 = vmatprep.mubr.msk.f32.mxu0 %vm162_vm0, %v62_v26  ;;  %3278 = vmatmul.mubr.msk.f32.gmra.mrb[40].mxu1 %vm162_vm0, %v125_v33 }
  0x64   :  { %3280 = vmatprep.mubr.msk.f32.mxu1 %vm162_vm0, %v126_v35 }
  0x66   :  { %3185 = vmatmul.mubr.msk.f32.gmra.mrb[42].mxu0 %vm162_vm0, %v63_v28 }
  0x67   :  { %3187 = vmatprep.mubr.msk.f32.mxu0 %vm162_vm0, %v64_v30  ;;  %3281 = vmatmul.mubr.msk.f32.gmra.mrb[42].mxu1 %vm162_vm0, %v127_v37 }
  0x68   :  { %3283 = vmatprep.mubr.msk.f32.mxu1 %vm162_vm0, %v128_v39 }
  0x6a   :  { %3188 = vmatmul.mubr.msk.f32.gmra.mrb[44].mxu0 %vm162_vm0, %v65_v32 }
  0x6b   :  { %3190 = vmatprep.mubr.msk.f32.mxu0 %vm162_vm0, %v66_v34  ;;  %3284 = vmatmul.mubr.msk.f32.gmra.mrb[44].mxu1 %vm162_vm0, %v129_v41 }
  0x6c   :  { %3286 = vmatprep.mubr.msk.f32.mxu1 %vm162_vm0, %v130_v43 }
  0x6e   :  { %3191 = vmatmul.mubr.msk.f32.gmra.mrb[46].mxu0 %vm162_vm0, %v67_v36 }
  0x6f   :  { %3193 = vmatprep.mubr.msk.f32.mxu0 %vm162_vm0, %v68_v38  ;;  %3287 = vmatmul.mubr.msk.f32.gmra.mrb[46].mxu1 %vm162_vm0, %v131_v45 }
  0x70   :  { %3289 = vmatprep.mubr.msk.f32.mxu1 %vm162_vm0, %v132_v47 }
  0x72   :  { %3194 = vmatmul.mubr.msk.f32.gmra.mrb[48].mxu0 %vm162_vm0, %v69_v40 }
  0x73   :  { %3196 = vmatprep.mubr.msk.f32.mxu0 %vm162_vm0, %v70_v42  ;;  %3290 = vmatmul.mubr.msk.f32.gmra.mrb[48].mxu1 %vm162_vm0, %v133_v49 }
  0x74   :  { %3292 = vmatprep.mubr.msk.f32.mxu1 %vm162_vm0, %v134_v51 }
  0x76   :  { %3197 = vmatmul.mubr.msk.f32.gmra.mrb[50].mxu0 %vm162_vm0, %v71_v44 }
  0x77   :  { %3199 = vmatprep.mubr.msk.f32.mxu0 %vm162_vm0, %v72_v46  ;;  %3293 = vmatmul.mubr.msk.f32.gmra.mrb[50].mxu1 %vm162_vm0, %v135_v53 }
  0x78   :  { %3295 = vmatprep.mubr.msk.f32.mxu1 %vm162_vm0, %v136_v55 }
  0x7a   :  { %3200 = vmatmul.mubr.msk.f32.gmra.mrb[52].mxu0 %vm162_vm0, %v73_v48 }
  0x7b   :  { %3202 = vmatprep.mubr.msk.f32.mxu0 %vm162_vm0, %v74_v50  ;;  %3296 = vmatmul.mubr.msk.f32.gmra.mrb[52].mxu1 %vm162_vm0, %v137_v57 }
  0x7c   :  { %3298 = vmatprep.mubr.msk.f32.mxu1 %vm162_vm0, %v138_v59 }
  0x7e   :  { %3203 = vmatmul.mubr.msk.f32.gmra.mrb[54].mxu0 %vm162_vm0, %v75_v52 }
  0x7f   :  { %3205 = vmatprep.mubr.msk.f32.mxu0 %vm162_vm0, %v76_v54  ;;  %3299 = vmatmul.mubr.msk.f32.gmra.mrb[54].mxu1 %vm162_vm0, %v139_v61 }
  0x80   :  { %3301 = vmatprep.mubr.msk.f32.mxu1 %vm162_vm0, %v140_v63 }
  0x82   :  { %3206 = vmatmul.mubr.msk.f32.gmra.mrb[56].mxu0 %vm162_vm0, %v77_v56 }
  0x83   :  { %3208 = vmatprep.mubr.msk.f32.mxu0 %vm162_vm0, %v78_v58  ;;  %3302 = vmatmul.mubr.msk.f32.gmra.mrb[56].mxu1 %vm162_vm0, %v141_v1 }
  0x84   :  { %3304 = vmatprep.mubr.msk.f32.mxu1 %vm162_vm0, %v142_v3 }
  0x86   :  { %3209 = vmatmul.mubr.msk.f32.gmra.mrb[58].mxu0 %vm162_vm0, %v79_v60 }
  0x87   :  { %3211 = vmatprep.mubr.msk.f32.mxu0 %vm162_vm0, %v80_v62  ;;  %3305 = vmatmul.mubr.msk.f32.gmra.mrb[58].mxu1 %vm162_vm0, %v143_v5 }
  0x88   :  { %3307 = vmatprep.mubr.msk.f32.mxu1 %vm162_vm0, %v144_v6 }
  0x8a   :  { %3212 = vmatmul.mubr.msk.f32.gmra.mrb[60].mxu0 %vm162_vm0, %v81_v0 }
  0x8b   :  { %3214 = vmatprep.mubr.msk.f32.mxu0 %vm162_vm0, %v82_v2  ;;  %3308 = vmatmul.mubr.msk.f32.gmra.mrb[60].mxu1 %vm162_vm0, %v145_v7 }
  0x8c   :  { %3310 = vmatprep.mubr.msk.f32.mxu1 %vm162_vm0, %v146_v8 }
  0x8e   :  { %3215 = vmatmul.mubr.msk.f32.gmra.mrb[62].mxu0 %vm162_vm0, %v83_v4 }
  0x8f   :  { %3311 = vmatmul.mubr.msk.f32.gmra.mrb[62].mxu1 %vm162_vm0, %v147_v9 }
  0xe5   :  { %v3123_v11 = vpop.f32.mrb[0].mxu0 }
  0xe6   :  { %v623_v12 = vadd.f32 %v3123_v11, %v4046_v10  ;;  %v617_v13 = vpop.f32.mrb[1].mxu0  ;;  %v3219_v20 = vpop.f32.mrb[0].mxu1 }
  0xe7   :  { %v618_v14 = vadd.f32 %v4046_v10, %v617_v13  ;;  %v943_v23 = vadd.f32 %v3219_v20, %v4046_v10  ;;  %v937_v24 = vpop.f32.mrb[1].mxu1 }
  0xe8   :  { %1260 = vst.msk [vmem:[%s7897_s5 + $0x8] sm:$0xff] %vm1258_vm2, %v623_v12  ;;  %v938_v27 = vadd.f32 %v4046_v10, %v937_v24 }
  0xe9   :  { %1259 = vst.msk [vmem:[%s7897_s5] sm:$0xff] %vm1258_vm2, %v618_v14  ;;  %v3126_v15 = vpop.f32.mrb[2].mxu0  ;;  %1324 = vst.msk [vmem:[%s7897_s5 + $0x208] sm:$0xff] %vm1258_vm2, %v943_v23 }
  0xea   :  { %v633_v16 = vadd.f32 %v3126_v15, %v4046_v10  ;;  %v627_v17 = vpop.f32.mrb[3].mxu0  ;;  %1323 = vst.msk [vmem:[%s7897_s5 + $0x200] sm:$0xff] %vm1258_vm2, %v938_v27  ;;  %v3222_v32 = vpop.f32.mrb[2].mxu1 }
  0xeb   :  { %v628_v18 = vadd.f32 %v4046_v10, %v627_v17  ;;  %v953_v35 = vadd.f32 %v3222_v32, %v4046_v10  ;;  %v947_v36 = vpop.f32.mrb[3].mxu1 }
  0xec   :  { %1262 = vst.msk [vmem:[%s7897_s5 + $0x18] sm:$0xff] %vm1258_vm2, %v633_v16  ;;  %v948_v38 = vadd.f32 %v4046_v10, %v947_v36 }
  0xed   :  { %1261 = vst.msk [vmem:[%s7897_s5 + $0x10] sm:$0xff] %vm1258_vm2, %v628_v18  ;;  %v3129_v19 = vpop.f32.mrb[4].mxu0  ;;  %1326 = vst.msk [vmem:[%s7897_s5 + $0x218] sm:$0xff] %vm1258_vm2, %v953_v35 }
  0xee   :  { %v643_v21 = vadd.f32 %v3129_v19, %v4046_v10  ;;  %v637_v22 = vpop.f32.mrb[5].mxu0  ;;  %1325 = vst.msk [vmem:[%s7897_s5 + $0x210] sm:$0xff] %vm1258_vm2, %v948_v38  ;;  %v3225_v44 = vpop.f32.mrb[4].mxu1 }
  0xef   :  { %v1392_v25 = vld [vmem:[%s7897_s5 + $0x8] sm:$0xff]  ;;  %v638_v26 = vadd.f32 %v4046_v10, %v637_v22  ;;  %v963_v48 = vadd.f32 %v3225_v44, %v4046_v10  ;;  %v957_v49 = vpop.f32.mrb[5].mxu1 }
  0xf0   :  { %v1391_v28 = vld [vmem:[%s7897_s5] sm:$0xff]  ;;  %1264 = vst.msk [vmem:[%s7897_s5 + $0x28] sm:$0xff] %vm1258_vm2, %v643_v21  ;;  %v1520_v29 = vsel %vm1258_vm2, %v1392_v25, 0.0  ;;  %v958_v52 = vadd.f32 %v4046_v10, %v957_v49 }
  0xf1   :  { %v1519_v30 = vsel %vm1258_vm2, %v1391_v28, 0.0  ;;  %1263 = vst.msk [vmem:[%s7897_s5 + $0x20] sm:$0xff] %vm1258_vm2, %v638_v26  ;;  %v3132_v31 = vpop.f32.mrb[6].mxu0  ;;  %1328 = vst.msk [vmem:[%s7897_s5 + $0x228] sm:$0xff] %vm1258_vm2, %v963_v48 }
  0xf2   :  { %v653_v33 = vadd.f32 %v3132_v31, %v4046_v10  ;;  %v647_v34 = vpop.f32.mrb[7].mxu0  ;;  %v1521_v39 = vadd.f32 %v1520_v29, %v1519_v30  ;;  %1327 = vst.msk [vmem:[%s7897_s5 + $0x220] sm:$0xff] %vm1258_vm2, %v958_v52  ;;  %v3228_v58 = vpop.f32.mrb[6].mxu1 }
  0xf3   :  { %v648_v37 = vadd.f32 %v4046_v10, %v647_v34  ;;  %v1394_v40 = vld [vmem:[%s7897_s5 + $0x18] sm:$0xff]  ;;  %v973_v62 = vadd.f32 %v3228_v58, %v4046_v10  ;;  %v967_v63 = vpop.f32.mrb[7].mxu1 }
  0xf4   :  { %v1393_v41 = vld [vmem:[%s7897_s5 + $0x10] sm:$0xff]  ;;  %1266 = vst.msk [vmem:[%s7897_s5 + $0x38] sm:$0xff] %vm1258_vm2, %v653_v33  ;;  %v1524_v50 = vsel %vm1258_vm2, %v1394_v40, 0.0  ;;  %v968_v2 = vadd.f32 %v4046_v10, %v967_v63 }
  0xf5   :  { %v1522_v42 = vsel %vm1258_vm2, %v1393_v41, 0.0  ;;  %1265 = vst.msk [vmem:[%s7897_s5 + $0x30] sm:$0xff] %vm1258_vm2, %v648_v37  ;;  %v3135_v43 = vpop.f32.mrb[8].mxu0  ;;  %1330 = vst.msk [vmem:[%s7897_s5 + $0x238] sm:$0xff] %vm1258_vm2, %v973_v62 }
  0xf6   :  { %v1523_v45 = vadd.f32 %v1522_v42, %v1521_v39  ;;  %v663_v46 = vadd.f32 %v3135_v43, %v4046_v10  ;;  %v657_v47 = vpop.f32.mrb[9].mxu0  ;;  %1329 = vst.msk [vmem:[%s7897_s5 + $0x230] sm:$0xff] %vm1258_vm2, %v968_v2  ;;  %v3231_v8 = vpop.f32.mrb[8].mxu1 }
  0xf7   :  { %v658_v51 = vadd.f32 %v4046_v10, %v657_v47  ;;  %v1396_v54 = vld [vmem:[%s7897_s5 + $0x28] sm:$0xff]  ;;  %v983_v13 = vadd.f32 %v3231_v8, %v4046_v10  ;;  %v977_v14 = vpop.f32.mrb[9].mxu1 }
  0xf8   :  { %v1525_v53 = vadd.f32 %v1524_v50, %v1523_v45  ;;  %v1395_v55 = vld [vmem:[%s7897_s5 + $0x20] sm:$0xff]  ;;  %1268 = vst.msk [vmem:[%s7897_s5 + $0x48] sm:$0xff] %vm1258_vm2, %v663_v46  ;;  %v1528_v0 = vsel %vm1258_vm2, %v1396_v54, 0.0  ;;  %v978_v17 = vadd.f32 %v4046_v10, %v977_v14 }
  0xf9   :  { %v1526_v56 = vsel %vm1258_vm2, %v1395_v55, 0.0  ;;  %1267 = vst.msk [vmem:[%s7897_s5 + $0x40] sm:$0xff] %vm1258_vm2, %v658_v51  ;;  %v3138_v57 = vpop.f32.mrb[10].mxu0  ;;  %1332 = vst.msk [vmem:[%s7897_s5 + $0x248] sm:$0xff] %vm1258_vm2, %v983_v13 }
  0xfa   :  { %v1527_v59 = vadd.f32 %v1526_v56, %v1525_v53  ;;  %v673_v60 = vadd.f32 %v3138_v57, %v4046_v10  ;;  %v667_v61 = vpop.f32.mrb[11].mxu0  ;;  %1331 = vst.msk [vmem:[%s7897_s5 + $0x240] sm:$0xff] %vm1258_vm2, %v978_v17  ;;  %v3234_v23 = vpop.f32.mrb[10].mxu1 }
  0xfb   :  { %v668_v1 = vadd.f32 %v4046_v10, %v667_v61  ;;  %v1398_v4 = vld [vmem:[%s7897_s5 + $0x38] sm:$0xff]  ;;  %v993_v27 = vadd.f32 %v3234_v23, %v4046_v10  ;;  %v987_v28 = vpop.f32.mrb[11].mxu1 }
  0xfc   :  { %v1529_v3 = vadd.f32 %v1528_v0, %v1527_v59  ;;  %v1397_v5 = vld [vmem:[%s7897_s5 + $0x30] sm:$0xff]  ;;  %1270 = vst.msk [vmem:[%s7897_s5 + $0x58] sm:$0xff] %vm1258_vm2, %v673_v60  ;;  %v1532_v15 = vsel %vm1258_vm2, %v1398_v4, 0.0  ;;  %v988_v31 = vadd.f32 %v4046_v10, %v987_v28 }
  0xfd   :  { %v1530_v6 = vsel %vm1258_vm2, %v1397_v5, 0.0  ;;  %1269 = vst.msk [vmem:[%s7897_s5 + $0x50] sm:$0xff] %vm1258_vm2, %v668_v1  ;;  %v3141_v7 = vpop.f32.mrb[12].mxu0  ;;  %1334 = vst.msk [vmem:[%s7897_s5 + $0x258] sm:$0xff] %vm1258_vm2, %v993_v27 }
  0xfe   :  { %v1531_v9 = vadd.f32 %v1530_v6, %v1529_v3  ;;  %v683_v11 = vadd.f32 %v3141_v7, %v4046_v10  ;;  %v677_v12 = vpop.f32.mrb[13].mxu0  ;;  %1333 = vst.msk [vmem:[%s7897_s5 + $0x250] sm:$0xff] %vm1258_vm2, %v988_v31  ;;  %v3237_v37 = vpop.f32.mrb[12].mxu1 }
  0xff   :  { %v678_v16 = vadd.f32 %v4046_v10, %v677_v12  ;;  %v1400_v19 = vld [vmem:[%s7897_s5 + $0x48] sm:$0xff]  ;;  %v1003_v41 = vadd.f32 %v3237_v37, %v4046_v10  ;;  %v997_v42 = vpop.f32.mrb[13].mxu1 }
 0x100   :  { %v1533_v18 = vadd.f32 %v1532_v15, %v1531_v9  ;;  %v1399_v20 = vld [vmem:[%s7897_s5 + $0x40] sm:$0xff]  ;;  %1272 = vst.msk [vmem:[%s7897_s5 + $0x68] sm:$0xff] %vm1258_vm2, %v683_v11  ;;  %v1536_v29 = vsel %vm1258_vm2, %v1400_v19, 0.0  ;;  %v998_v45 = vadd.f32 %v4046_v10, %v997_v42 }
 0x101   :  { %v1534_v21 = vsel %vm1258_vm2, %v1399_v20, 0.0  ;;  %1271 = vst.msk [vmem:[%s7897_s5 + $0x60] sm:$0xff] %vm1258_vm2, %v678_v16  ;;  %v3144_v22 = vpop.f32.mrb[14].mxu0  ;;  %1336 = vst.msk [vmem:[%s7897_s5 + $0x268] sm:$0xff] %vm1258_vm2, %v1003_v41 }
 0x102   :  { %v1535_v24 = vadd.f32 %v1534_v21, %v1533_v18  ;;  %v693_v25 = vadd.f32 %v3144_v22, %v4046_v10  ;;  %v687_v26 = vpop.f32.mrb[15].mxu0  ;;  %1335 = vst.msk [vmem:[%s7897_s5 + $0x260] sm:$0xff] %vm1258_vm2, %v998_v45  ;;  %v3240_v51 = vpop.f32.mrb[14].mxu1 }
 0x103   :  { %v688_v30 = vadd.f32 %v4046_v10, %v687_v26  ;;  %v1402_v33 = vld [vmem:[%s7897_s5 + $0x58] sm:$0xff]  ;;  %v1013_v55 = vadd.f32 %v3240_v51, %v4046_v10  ;;  %v1007_v56 = vpop.f32.mrb[15].mxu1 }
 0x104   :  { %v1537_v32 = vadd.f32 %v1536_v29, %v1535_v24  ;;  %v1401_v34 = vld [vmem:[%s7897_s5 + $0x50] sm:$0xff]  ;;  %1274 = vst.msk [vmem:[%s7897_s5 + $0x78] sm:$0xff] %vm1258_vm2, %v693_v25  ;;  %v1540_v43 = vsel %vm1258_vm2, %v1402_v33, 0.0  ;;  %v1008_v59 = vadd.f32 %v4046_v10, %v1007_v56 }
 0x105   :  { %v1538_v35 = vsel %vm1258_vm2, %v1401_v34, 0.0  ;;  %1273 = vst.msk [vmem:[%s7897_s5 + $0x70] sm:$0xff] %vm1258_vm2, %v688_v30  ;;  %v3147_v36 = vpop.f32.mrb[16].mxu0  ;;  %1338 = vst.msk [vmem:[%s7897_s5 + $0x278] sm:$0xff] %vm1258_vm2, %v1013_v55 }
 0x106   :  { %v1539_v38 = vadd.f32 %v1538_v35, %v1537_v32  ;;  %v703_v39 = vadd.f32 %v3147_v36, %v4046_v10  ;;  %v697_v40 = vpop.f32.mrb[17].mxu0  ;;  %1337 = vst.msk [vmem:[%s7897_s5 + $0x270] sm:$0xff] %vm1258_vm2, %v1008_v59  ;;  %v3243_v1 = vpop.f32.mrb[16].mxu1 }
 0x107   :  { %v698_v44 = vadd.f32 %v4046_v10, %v697_v40  ;;  %v1404_v47 = vld [vmem:[%s7897_s5 + $0x68] sm:$0xff]  ;;  %v1023_v5 = vadd.f32 %v3243_v1, %v4046_v10  ;;  %v1017_v6 = vpop.f32.mrb[17].mxu1 }
 0x108   :  { %v1541_v46 = vadd.f32 %v1540_v43, %v1539_v38  ;;  %v1403_v48 = vld [vmem:[%s7897_s5 + $0x60] sm:$0xff]  ;;  %1276 = vst.msk [vmem:[%s7897_s5 + $0x88] sm:$0xff] %vm1258_vm2, %v703_v39  ;;  %v1544_v57 = vsel %vm1258_vm2, %v1404_v47, 0.0  ;;  %v1018_v9 = vadd.f32 %v4046_v10, %v1017_v6 }
 0x109   :  { %v1542_v49 = vsel %vm1258_vm2, %v1403_v48, 0.0  ;;  %1275 = vst.msk [vmem:[%s7897_s5 + $0x80] sm:$0xff] %vm1258_vm2, %v698_v44  ;;  %v3150_v50 = vpop.f32.mrb[18].mxu0  ;;  %1340 = vst.msk [vmem:[%s7897_s5 + $0x288] sm:$0xff] %vm1258_vm2, %v1023_v5 }
 0x10a   :  { %v1543_v52 = vadd.f32 %v1542_v49, %v1541_v46  ;;  %v713_v53 = vadd.f32 %v3150_v50, %v4046_v10  ;;  %v707_v54 = vpop.f32.mrb[19].mxu0  ;;  %1339 = vst.msk [vmem:[%s7897_s5 + $0x280] sm:$0xff] %vm1258_vm2, %v1018_v9  ;;  %v3246_v16 = vpop.f32.mrb[18].mxu1 }
 0x10b   :  { %v708_v58 = vadd.f32 %v4046_v10, %v707_v54  ;;  %v1406_v61 = vld [vmem:[%s7897_s5 + $0x78] sm:$0xff]  ;;  %v1033_v20 = vadd.f32 %v3246_v16, %v4046_v10  ;;  %v1027_v21 = vpop.f32.mrb[19].mxu1 }
 0x10c   :  { %v1545_v60 = vadd.f32 %v1544_v57, %v1543_v52  ;;  %v1405_v62 = vld [vmem:[%s7897_s5 + $0x70] sm:$0xff]  ;;  %1278 = vst.msk [vmem:[%s7897_s5 + $0x98] sm:$0xff] %vm1258_vm2, %v713_v53  ;;  %v1548_v7 = vsel %vm1258_vm2, %v1406_v61, 0.0  ;;  %v1028_v24 = vadd.f32 %v4046_v10, %v1027_v21 }
 0x10d   :  { %v1546_v63 = vsel %vm1258_vm2, %v1405_v62, 0.0  ;;  %1277 = vst.msk [vmem:[%s7897_s5 + $0x90] sm:$0xff] %vm1258_vm2, %v708_v58  ;;  %v3153_v0 = vpop.f32.mrb[20].mxu0  ;;  %1342 = vst.msk [vmem:[%s7897_s5 + $0x298] sm:$0xff] %vm1258_vm2, %v1033_v20 }
 0x10e   :  { %v1547_v2 = vadd.f32 %v1546_v63, %v1545_v60  ;;  %v723_v3 = vadd.f32 %v3153_v0, %v4046_v10  ;;  %v717_v4 = vpop.f32.mrb[21].mxu0  ;;  %1341 = vst.msk [vmem:[%s7897_s5 + $0x290] sm:$0xff] %vm1258_vm2, %v1028_v24  ;;  %v3249_v30 = vpop.f32.mrb[20].mxu1 }
 0x10f   :  { %v718_v8 = vadd.f32 %v4046_v10, %v717_v4  ;;  %v1408_v12 = vld [vmem:[%s7897_s5 + $0x88] sm:$0xff]  ;;  %v1043_v34 = vadd.f32 %v3249_v30, %v4046_v10  ;;  %v1037_v35 = vpop.f32.mrb[21].mxu1 }
 0x110   :  { %v1549_v11 = vadd.f32 %v1548_v7, %v1547_v2  ;;  %v1407_v13 = vld [vmem:[%s7897_s5 + $0x80] sm:$0xff]  ;;  %1280 = vst.msk [vmem:[%s7897_s5 + $0xa8] sm:$0xff] %vm1258_vm2, %v723_v3  ;;  %v1552_v22 = vsel %vm1258_vm2, %v1408_v12, 0.0  ;;  %v1038_v38 = vadd.f32 %v4046_v10, %v1037_v35 }
 0x111   :  { %v1550_v14 = vsel %vm1258_vm2, %v1407_v13, 0.0  ;;  %1279 = vst.msk [vmem:[%s7897_s5 + $0xa0] sm:$0xff] %vm1258_vm2, %v718_v8  ;;  %v3156_v15 = vpop.f32.mrb[22].mxu0  ;;  %1344 = vst.msk [vmem:[%s7897_s5 + $0x2a8] sm:$0xff] %vm1258_vm2, %v1043_v34 }
 0x112   :  { %v1551_v17 = vadd.f32 %v1550_v14, %v1549_v11  ;;  %v733_v18 = vadd.f32 %v3156_v15, %v4046_v10  ;;  %v727_v19 = vpop.f32.mrb[23].mxu0  ;;  %1343 = vst.msk [vmem:[%s7897_s5 + $0x2a0] sm:$0xff] %vm1258_vm2, %v1038_v38  ;;  %v3252_v44 = vpop.f32.mrb[22].mxu1 }
 0x113   :  { %v728_v23 = vadd.f32 %v4046_v10, %v727_v19  ;;  %v1410_v26 = vld [vmem:[%s7897_s5 + $0x98] sm:$0xff]  ;;  %v1053_v48 = vadd.f32 %v3252_v44, %v4046_v10  ;;  %v1047_v49 = vpop.f32.mrb[23].mxu1 }
 0x114   :  { %v1553_v25 = vadd.f32 %v1552_v22, %v1551_v17  ;;  %v1409_v27 = vld [vmem:[%s7897_s5 + $0x90] sm:$0xff]  ;;  %1282 = vst.msk [vmem:[%s7897_s5 + $0xb8] sm:$0xff] %vm1258_vm2, %v733_v18  ;;  %v1556_v36 = vsel %vm1258_vm2, %v1410_v26, 0.0  ;;  %v1048_v52 = vadd.f32 %v4046_v10, %v1047_v49 }
 0x115   :  { %v1554_v28 = vsel %vm1258_vm2, %v1409_v27, 0.0  ;;  %1281 = vst.msk [vmem:[%s7897_s5 + $0xb0] sm:$0xff] %vm1258_vm2, %v728_v23  ;;  %v3159_v29 = vpop.f32.mrb[24].mxu0  ;;  %1346 = vst.msk [vmem:[%s7897_s5 + $0x2b8] sm:$0xff] %vm1258_vm2, %v1053_v48 }
 0x116   :  { %v1555_v31 = vadd.f32 %v1554_v28, %v1553_v25  ;;  %v743_v32 = vadd.f32 %v3159_v29, %v4046_v10  ;;  %v737_v33 = vpop.f32.mrb[25].mxu0  ;;  %1345 = vst.msk [vmem:[%s7897_s5 + $0x2b0] sm:$0xff] %vm1258_vm2, %v1048_v52  ;;  %v3255_v58 = vpop.f32.mrb[24].mxu1 }
 0x117   :  { %v738_v37 = vadd.f32 %v4046_v10, %v737_v33  ;;  %v1412_v40 = vld [vmem:[%s7897_s5 + $0xa8] sm:$0xff]  ;;  %v1063_v62 = vadd.f32 %v3255_v58, %v4046_v10  ;;  %v1057_v63 = vpop.f32.mrb[25].mxu1 }
 0x118   :  { %v1557_v39 = vadd.f32 %v1556_v36, %v1555_v31  ;;  %v1411_v41 = vld [vmem:[%s7897_s5 + $0xa0] sm:$0xff]  ;;  %1284 = vst.msk [vmem:[%s7897_s5 + $0xc8] sm:$0xff] %vm1258_vm2, %v743_v32  ;;  %v1560_v50 = vsel %vm1258_vm2, %v1412_v40, 0.0  ;;  %v1058_v2 = vadd.f32 %v4046_v10, %v1057_v63 }
 0x119   :  { %v1558_v42 = vsel %vm1258_vm2, %v1411_v41, 0.0  ;;  %1283 = vst.msk [vmem:[%s7897_s5 + $0xc0] sm:$0xff] %vm1258_vm2, %v738_v37  ;;  %v3162_v43 = vpop.f32.mrb[26].mxu0  ;;  %1348 = vst.msk [vmem:[%s7897_s5 + $0x2c8] sm:$0xff] %vm1258_vm2, %v1063_v62 }
 0x11a   :  { %v1559_v45 = vadd.f32 %v1558_v42, %v1557_v39  ;;  %v753_v46 = vadd.f32 %v3162_v43, %v4046_v10  ;;  %v747_v47 = vpop.f32.mrb[27].mxu0  ;;  %1347 = vst.msk [vmem:[%s7897_s5 + $0x2c0] sm:$0xff] %vm1258_vm2, %v1058_v2  ;;  %v3258_v8 = vpop.f32.mrb[26].mxu1 }
 0x11b   :  { %v748_v51 = vadd.f32 %v4046_v10, %v747_v47  ;;  %v1414_v54 = vld [vmem:[%s7897_s5 + $0xb8] sm:$0xff]  ;;  %v1073_v13 = vadd.f32 %v3258_v8, %v4046_v10  ;;  %v1067_v14 = vpop.f32.mrb[27].mxu1 }
 0x11c   :  { %v1561_v53 = vadd.f32 %v1560_v50, %v1559_v45  ;;  %v1413_v55 = vld [vmem:[%s7897_s5 + $0xb0] sm:$0xff]  ;;  %1286 = vst.msk [vmem:[%s7897_s5 + $0xd8] sm:$0xff] %vm1258_vm2, %v753_v46  ;;  %v1564_v0 = vsel %vm1258_vm2, %v1414_v54, 0.0  ;;  %v1068_v17 = vadd.f32 %v4046_v10, %v1067_v14 }
 0x11d   :  { %v1562_v56 = vsel %vm1258_vm2, %v1413_v55, 0.0  ;;  %1285 = vst.msk [vmem:[%s7897_s5 + $0xd0] sm:$0xff] %vm1258_vm2, %v748_v51  ;;  %v3165_v57 = vpop.f32.mrb[28].mxu0  ;;  %1350 = vst.msk [vmem:[%s7897_s5 + $0x2d8] sm:$0xff] %vm1258_vm2, %v1073_v13 }
 0x11e   :  { %v1563_v59 = vadd.f32 %v1562_v56, %v1561_v53  ;;  %v763_v60 = vadd.f32 %v3165_v57, %v4046_v10  ;;  %v757_v61 = vpop.f32.mrb[29].mxu0  ;;  %1349 = vst.msk [vmem:[%s7897_s5 + $0x2d0] sm:$0xff] %vm1258_vm2, %v1068_v17  ;;  %v3261_v23 = vpop.f32.mrb[28].mxu1 }
 0x11f   :  { %v758_v1 = vadd.f32 %v4046_v10, %v757_v61  ;;  %v1416_v4 = vld [vmem:[%s7897_s5 + $0xc8] sm:$0xff]  ;;  %v1083_v27 = vadd.f32 %v3261_v23, %v4046_v10  ;;  %v1077_v28 = vpop.f32.mrb[29].mxu1 }
 0x120   :  { %v1565_v3 = vadd.f32 %v1564_v0, %v1563_v59  ;;  %v1415_v5 = vld [vmem:[%s7897_s5 + $0xc0] sm:$0xff]  ;;  %1288 = vst.msk [vmem:[%s7897_s5 + $0xe8] sm:$0xff] %vm1258_vm2, %v763_v60  ;;  %v1568_v15 = vsel %vm1258_vm2, %v1416_v4, 0.0  ;;  %v1078_v31 = vadd.f32 %v4046_v10, %v1077_v28 }
 0x121   :  { %v1566_v6 = vsel %vm1258_vm2, %v1415_v5, 0.0  ;;  %1287 = vst.msk [vmem:[%s7897_s5 + $0xe0] sm:$0xff] %vm1258_vm2, %v758_v1  ;;  %v3168_v7 = vpop.f32.mrb[30].mxu0  ;;  %1352 = vst.msk [vmem:[%s7897_s5 + $0x2e8] sm:$0xff] %vm1258_vm2, %v1083_v27 }
 0x122   :  { %v1567_v9 = vadd.f32 %v1566_v6, %v1565_v3  ;;  %v773_v11 = vadd.f32 %v3168_v7, %v4046_v10  ;;  %v767_v12 = vpop.f32.mrb[31].mxu0  ;;  %1351 = vst.msk [vmem:[%s7897_s5 + $0x2e0] sm:$0xff] %vm1258_vm2, %v1078_v31  ;;  %v3264_v37 = vpop.f32.mrb[30].mxu1 }
 0x123   :  { %v768_v16 = vadd.f32 %v4046_v10, %v767_v12  ;;  %v1418_v19 = vld [vmem:[%s7897_s5 + $0xd8] sm:$0xff]  ;;  %v1093_v41 = vadd.f32 %v3264_v37, %v4046_v10  ;;  %v1087_v42 = vpop.f32.mrb[31].mxu1 }
 0x124   :  { %v1569_v18 = vadd.f32 %v1568_v15, %v1567_v9  ;;  %v1417_v20 = vld [vmem:[%s7897_s5 + $0xd0] sm:$0xff]  ;;  %1290 = vst.msk [vmem:[%s7897_s5 + $0xf8] sm:$0xff] %vm1258_vm2, %v773_v11  ;;  %v1572_v29 = vsel %vm1258_vm2, %v1418_v19, 0.0  ;;  %v1088_v45 = vadd.f32 %v4046_v10, %v1087_v42 }
 0x125   :  { %v1570_v21 = vsel %vm1258_vm2, %v1417_v20, 0.0  ;;  %1289 = vst.msk [vmem:[%s7897_s5 + $0xf0] sm:$0xff] %vm1258_vm2, %v768_v16  ;;  %v3171_v22 = vpop.f32.mrb[32].mxu0  ;;  %1354 = vst.msk [vmem:[%s7897_s5 + $0x2f8] sm:$0xff] %vm1258_vm2, %v1093_v41 }
 0x126   :  { %v1571_v24 = vadd.f32 %v1570_v21, %v1569_v18  ;;  %v783_v25 = vadd.f32 %v3171_v22, %v4046_v10  ;;  %v777_v26 = vpop.f32.mrb[33].mxu0  ;;  %1353 = vst.msk [vmem:[%s7897_s5 + $0x2f0] sm:$0xff] %vm1258_vm2, %v1088_v45  ;;  %v3267_v51 = vpop.f32.mrb[32].mxu1 }
 0x127   :  { %v778_v30 = vadd.f32 %v4046_v10, %v777_v26  ;;  %v1420_v33 = vld [vmem:[%s7897_s5 + $0xe8] sm:$0xff]  ;;  %v1103_v55 = vadd.f32 %v3267_v51, %v4046_v10  ;;  %v1097_v56 = vpop.f32.mrb[33].mxu1 }
 0x128   :  { %v1573_v32 = vadd.f32 %v1572_v29, %v1571_v24  ;;  %v1419_v34 = vld [vmem:[%s7897_s5 + $0xe0] sm:$0xff]  ;;  %1292 = vst.msk [vmem:[%s7897_s5 + $0x108] sm:$0xff] %vm1258_vm2, %v783_v25  ;;  %v1576_v43 = vsel %vm1258_vm2, %v1420_v33, 0.0  ;;  %v1098_v59 = vadd.f32 %v4046_v10, %v1097_v56 }
 0x129   :  { %v1574_v35 = vsel %vm1258_vm2, %v1419_v34, 0.0  ;;  %1291 = vst.msk [vmem:[%s7897_s5 + $0x100] sm:$0xff] %vm1258_vm2, %v778_v30  ;;  %v3174_v36 = vpop.f32.mrb[34].mxu0  ;;  %1356 = vst.msk [vmem:[%s7897_s5 + $0x308] sm:$0xff] %vm1258_vm2, %v1103_v55 }
 0x12a   :  { %v1575_v38 = vadd.f32 %v1574_v35, %v1573_v32  ;;  %v793_v39 = vadd.f32 %v3174_v36, %v4046_v10  ;;  %v787_v40 = vpop.f32.mrb[35].mxu0  ;;  %1355 = vst.msk [vmem:[%s7897_s5 + $0x300] sm:$0xff] %vm1258_vm2, %v1098_v59  ;;  %v3270_v1 = vpop.f32.mrb[34].mxu1 }
 0x12b   :  { %v788_v44 = vadd.f32 %v4046_v10, %v787_v40  ;;  %v1422_v47 = vld [vmem:[%s7897_s5 + $0xf8] sm:$0xff]  ;;  %v1113_v5 = vadd.f32 %v3270_v1, %v4046_v10  ;;  %v1107_v6 = vpop.f32.mrb[35].mxu1 }
 0x12c   :  { %v1577_v46 = vadd.f32 %v1576_v43, %v1575_v38  ;;  %v1421_v48 = vld [vmem:[%s7897_s5 + $0xf0] sm:$0xff]  ;;  %1294 = vst.msk [vmem:[%s7897_s5 + $0x118] sm:$0xff] %vm1258_vm2, %v793_v39  ;;  %v1580_v57 = vsel %vm1258_vm2, %v1422_v47, 0.0  ;;  %v1108_v9 = vadd.f32 %v4046_v10, %v1107_v6 }
 0x12d   :  { %v1578_v49 = vsel %vm1258_vm2, %v1421_v48, 0.0  ;;  %1293 = vst.msk [vmem:[%s7897_s5 + $0x110] sm:$0xff] %vm1258_vm2, %v788_v44  ;;  %v3177_v50 = vpop.f32.mrb[36].mxu0  ;;  %1358 = vst.msk [vmem:[%s7897_s5 + $0x318] sm:$0xff] %vm1258_vm2, %v1113_v5 }
 0x12e   :  { %v1579_v52 = vadd.f32 %v1578_v49, %v1577_v46  ;;  %v803_v53 = vadd.f32 %v3177_v50, %v4046_v10  ;;  %v797_v54 = vpop.f32.mrb[37].mxu0  ;;  %1357 = vst.msk [vmem:[%s7897_s5 + $0x310] sm:$0xff] %vm1258_vm2, %v1108_v9  ;;  %v3273_v16 = vpop.f32.mrb[36].mxu1 }
 0x12f   :  { %v798_v58 = vadd.f32 %v4046_v10, %v797_v54  ;;  %v1424_v61 = vld [vmem:[%s7897_s5 + $0x108] sm:$0xff]  ;;  %v1123_v20 = vadd.f32 %v3273_v16, %v4046_v10  ;;  %v1117_v21 = vpop.f32.mrb[37].mxu1 }
 0x130   :  { %v1581_v60 = vadd.f32 %v1580_v57, %v1579_v52  ;;  %v1423_v62 = vld [vmem:[%s7897_s5 + $0x100] sm:$0xff]  ;;  %1296 = vst.msk [vmem:[%s7897_s5 + $0x128] sm:$0xff] %vm1258_vm2, %v803_v53  ;;  %v1584_v7 = vsel %vm1258_vm2, %v1424_v61, 0.0  ;;  %v1118_v24 = vadd.f32 %v4046_v10, %v1117_v21 }
 0x131   :  { %v1582_v63 = vsel %vm1258_vm2, %v1423_v62, 0.0  ;;  %1295 = vst.msk [vmem:[%s7897_s5 + $0x120] sm:$0xff] %vm1258_vm2, %v798_v58  ;;  %v3180_v0 = vpop.f32.mrb[38].mxu0  ;;  %1360 = vst.msk [vmem:[%s7897_s5 + $0x328] sm:$0xff] %vm1258_vm2, %v1123_v20 }
 0x132   :  { %v1583_v2 = vadd.f32 %v1582_v63, %v1581_v60  ;;  %v813_v3 = vadd.f32 %v3180_v0, %v4046_v10  ;;  %v807_v4 = vpop.f32.mrb[39].mxu0  ;;  %1359 = vst.msk [vmem:[%s7897_s5 + $0x320] sm:$0xff] %vm1258_vm2, %v1118_v24  ;;  %v3276_v30 = vpop.f32.mrb[38].mxu1 }
 0x133   :  { %v808_v8 = vadd.f32 %v4046_v10, %v807_v4  ;;  %v1426_v12 = vld [vmem:[%s7897_s5 + $0x118] sm:$0xff]  ;;  %v1133_v34 = vadd.f32 %v3276_v30, %v4046_v10  ;;  %v1127_v35 = vpop.f32.mrb[39].mxu1 }
 0x134   :  { %v1585_v11 = vadd.f32 %v1584_v7, %v1583_v2  ;;  %v1425_v13 = vld [vmem:[%s7897_s5 + $0x110] sm:$0xff]  ;;  %1298 = vst.msk [vmem:[%s7897_s5 + $0x138] sm:$0xff] %vm1258_vm2, %v813_v3  ;;  %v1588_v22 = vsel %vm1258_vm2, %v1426_v12, 0.0  ;;  %v1128_v38 = vadd.f32 %v4046_v10, %v1127_v35 }
 0x135   :  { %v1586_v14 = vsel %vm1258_vm2, %v1425_v13, 0.0  ;;  %1297 = vst.msk [vmem:[%s7897_s5 + $0x130] sm:$0xff] %vm1258_vm2, %v808_v8  ;;  %v3183_v15 = vpop.f32.mrb[40].mxu0  ;;  %1362 = vst.msk [vmem:[%s7897_s5 + $0x338] sm:$0xff] %vm1258_vm2, %v1133_v34 }
 0x136   :  { %v1587_v17 = vadd.f32 %v1586_v14, %v1585_v11  ;;  %v823_v18 = vadd.f32 %v3183_v15, %v4046_v10  ;;  %v817_v19 = vpop.f32.mrb[41].mxu0  ;;  %1361 = vst.msk [vmem:[%s7897_s5 + $0x330] sm:$0xff] %vm1258_vm2, %v1128_v38  ;;  %v3279_v44 = vpop.f32.mrb[40].mxu1 }
 0x137   :  { %v818_v23 = vadd.f32 %v4046_v10, %v817_v19  ;;  %v1428_v26 = vld [vmem:[%s7897_s5 + $0x128] sm:$0xff]  ;;  %v1143_v48 = vadd.f32 %v3279_v44, %v4046_v10  ;;  %v1137_v49 = vpop.f32.mrb[41].mxu1 }
 0x138   :  { %v1589_v25 = vadd.f32 %v1588_v22, %v1587_v17  ;;  %v1427_v27 = vld [vmem:[%s7897_s5 + $0x120] sm:$0xff]  ;;  %1300 = vst.msk [vmem:[%s7897_s5 + $0x148] sm:$0xff] %vm1258_vm2, %v823_v18  ;;  %v1592_v36 = vsel %vm1258_vm2, %v1428_v26, 0.0  ;;  %v1138_v52 = vadd.f32 %v4046_v10, %v1137_v49 }
 0x139   :  { %v1590_v28 = vsel %vm1258_vm2, %v1427_v27, 0.0  ;;  %1299 = vst.msk [vmem:[%s7897_s5 + $0x140] sm:$0xff] %vm1258_vm2, %v818_v23  ;;  %v3186_v29 = vpop.f32.mrb[42].mxu0  ;;  %1364 = vst.msk [vmem:[%s7897_s5 + $0x348] sm:$0xff] %vm1258_vm2, %v1143_v48 }
 0x13a   :  { %v1591_v31 = vadd.f32 %v1590_v28, %v1589_v25  ;;  %v833_v32 = vadd.f32 %v3186_v29, %v4046_v10  ;;  %v827_v33 = vpop.f32.mrb[43].mxu0  ;;  %1363 = vst.msk [vmem:[%s7897_s5 + $0x340] sm:$0xff] %vm1258_vm2, %v1138_v52  ;;  %v3282_v58 = vpop.f32.mrb[42].mxu1 }
 0x13b   :  { %v828_v37 = vadd.f32 %v4046_v10, %v827_v33  ;;  %v1430_v40 = vld [vmem:[%s7897_s5 + $0x138] sm:$0xff]  ;;  %v1153_v62 = vadd.f32 %v3282_v58, %v4046_v10  ;;  %v1147_v63 = vpop.f32.mrb[43].mxu1 }
 0x13c   :  { %v1593_v39 = vadd.f32 %v1592_v36, %v1591_v31  ;;  %v1429_v41 = vld [vmem:[%s7897_s5 + $0x130] sm:$0xff]  ;;  %1302 = vst.msk [vmem:[%s7897_s5 + $0x158] sm:$0xff] %vm1258_vm2, %v833_v32  ;;  %v1596_v50 = vsel %vm1258_vm2, %v1430_v40, 0.0  ;;  %v1148_v2 = vadd.f32 %v4046_v10, %v1147_v63 }
 0x13d   :  { %v1594_v42 = vsel %vm1258_vm2, %v1429_v41, 0.0  ;;  %1301 = vst.msk [vmem:[%s7897_s5 + $0x150] sm:$0xff] %vm1258_vm2, %v828_v37  ;;  %v3189_v43 = vpop.f32.mrb[44].mxu0  ;;  %1366 = vst.msk [vmem:[%s7897_s5 + $0x358] sm:$0xff] %vm1258_vm2, %v1153_v62 }
 0x13e   :  { %v1595_v45 = vadd.f32 %v1594_v42, %v1593_v39  ;;  %v843_v46 = vadd.f32 %v3189_v43, %v4046_v10  ;;  %v837_v47 = vpop.f32.mrb[45].mxu0  ;;  %1365 = vst.msk [vmem:[%s7897_s5 + $0x350] sm:$0xff] %vm1258_vm2, %v1148_v2  ;;  %v3285_v8 = vpop.f32.mrb[44].mxu1 }
 0x13f   :  { %v838_v51 = vadd.f32 %v4046_v10, %v837_v47  ;;  %v1432_v54 = vld [vmem:[%s7897_s5 + $0x148] sm:$0xff]  ;;  %v1163_v13 = vadd.f32 %v3285_v8, %v4046_v10  ;;  %v1157_v14 = vpop.f32.mrb[45].mxu1 }
 0x140   :  { %v1597_v53 = vadd.f32 %v1596_v50, %v1595_v45  ;;  %v1431_v55 = vld [vmem:[%s7897_s5 + $0x140] sm:$0xff]  ;;  %1304 = vst.msk [vmem:[%s7897_s5 + $0x168] sm:$0xff] %vm1258_vm2, %v843_v46  ;;  %v1600_v0 = vsel %vm1258_vm2, %v1432_v54, 0.0  ;;  %v1158_v17 = vadd.f32 %v4046_v10, %v1157_v14 }
 0x141   :  { %v1598_v56 = vsel %vm1258_vm2, %v1431_v55, 0.0  ;;  %1303 = vst.msk [vmem:[%s7897_s5 + $0x160] sm:$0xff] %vm1258_vm2, %v838_v51  ;;  %v3192_v57 = vpop.f32.mrb[46].mxu0  ;;  %1368 = vst.msk [vmem:[%s7897_s5 + $0x368] sm:$0xff] %vm1258_vm2, %v1163_v13 }
 0x142   :  { %v1599_v59 = vadd.f32 %v1598_v56, %v1597_v53  ;;  %v853_v60 = vadd.f32 %v3192_v57, %v4046_v10  ;;  %v847_v61 = vpop.f32.mrb[47].mxu0  ;;  %1367 = vst.msk [vmem:[%s7897_s5 + $0x360] sm:$0xff] %vm1258_vm2, %v1158_v17  ;;  %v3288_v23 = vpop.f32.mrb[46].mxu1 }
 0x143   :  { %v848_v1 = vadd.f32 %v4046_v10, %v847_v61  ;;  %v1434_v4 = vld [vmem:[%s7897_s5 + $0x158] sm:$0xff]  ;;  %v1173_v27 = vadd.f32 %v3288_v23, %v4046_v10  ;;  %v1167_v28 = vpop.f32.mrb[47].mxu1 }
 0x144   :  { %v1601_v3 = vadd.f32 %v1600_v0, %v1599_v59  ;;  %v1433_v5 = vld [vmem:[%s7897_s5 + $0x150] sm:$0xff]  ;;  %1306 = vst.msk [vmem:[%s7897_s5 + $0x178] sm:$0xff] %vm1258_vm2, %v853_v60  ;;  %v1604_v15 = vsel %vm1258_vm2, %v1434_v4, 0.0  ;;  %v1168_v31 = vadd.f32 %v4046_v10, %v1167_v28 }
 0x145   :  { %v1602_v6 = vsel %vm1258_vm2, %v1433_v5, 0.0  ;;  %1305 = vst.msk [vmem:[%s7897_s5 + $0x170] sm:$0xff] %vm1258_vm2, %v848_v1  ;;  %v3195_v7 = vpop.f32.mrb[48].mxu0  ;;  %1370 = vst.msk [vmem:[%s7897_s5 + $0x378] sm:$0xff] %vm1258_vm2, %v1173_v27 }
 0x146   :  { %v1603_v9 = vadd.f32 %v1602_v6, %v1601_v3  ;;  %v863_v11 = vadd.f32 %v3195_v7, %v4046_v10  ;;  %v857_v12 = vpop.f32.mrb[49].mxu0  ;;  %1369 = vst.msk [vmem:[%s7897_s5 + $0x370] sm:$0xff] %vm1258_vm2, %v1168_v31  ;;  %v3291_v37 = vpop.f32.mrb[48].mxu1  ;;  %v3337_v31 = vld [vmem:[%s7896_s2] ss:$0 sm:$0xff] }
 0x147   :  { %v858_v16 = vadd.f32 %v4046_v10, %v857_v12  ;;  %v1436_v19 = vld [vmem:[%s7897_s5 + $0x168] sm:$0xff]  ;;  %v1183_v41 = vadd.f32 %v3291_v37, %v4046_v10  ;;  %v1177_v42 = vpop.f32.mrb[49].mxu1 }
 0x148   :  { %v1605_v18 = vadd.f32 %v1604_v15, %v1603_v9  ;;  %v1435_v20 = vld [vmem:[%s7897_s5 + $0x160] sm:$0xff]  ;;  %1308 = vst.msk [vmem:[%s7897_s5 + $0x188] sm:$0xff] %vm1258_vm2, %v863_v11  ;;  %v1608_v29 = vsel %vm1258_vm2, %v1436_v19, 0.0  ;;  %v1178_v45 = vadd.f32 %v4046_v10, %v1177_v42 }
 0x149   :  { %v1606_v21 = vsel %vm1258_vm2, %v1435_v20, 0.0  ;;  %1307 = vst.msk [vmem:[%s7897_s5 + $0x180] sm:$0xff] %vm1258_vm2, %v858_v16  ;;  %v3198_v22 = vpop.f32.mrb[50].mxu0  ;;  %1372 = vst.msk [vmem:[%s7897_s5 + $0x388] sm:$0xff] %vm1258_vm2, %v1183_v41 }
 0x14a   :  { %v1607_v24 = vadd.f32 %v1606_v21, %v1605_v18  ;;  %v873_v25 = vadd.f32 %v3198_v22, %v4046_v10  ;;  %v867_v26 = vpop.f32.mrb[51].mxu0  ;;  %1371 = vst.msk [vmem:[%s7897_s5 + $0x380] sm:$0xff] %vm1258_vm2, %v1178_v45  ;;  %v3294_v51 = vpop.f32.mrb[50].mxu1 }
 0x14b   :  { %v868_v30 = vadd.f32 %v4046_v10, %v867_v26  ;;  %v1438_v33 = vld [vmem:[%s7897_s5 + $0x178] sm:$0xff]  ;;  %v1193_v55 = vadd.f32 %v3294_v51, %v4046_v10  ;;  %v1187_v56 = vpop.f32.mrb[51].mxu1 }
 0x14c   :  { %v1609_v32 = vadd.f32 %v1608_v29, %v1607_v24  ;;  %v1437_v34 = vld [vmem:[%s7897_s5 + $0x170] sm:$0xff]  ;;  %1310 = vst.msk [vmem:[%s7897_s5 + $0x198] sm:$0xff] %vm1258_vm2, %v873_v25  ;;  %v1612_v43 = vsel %vm1258_vm2, %v1438_v33, 0.0  ;;  %v1188_v59 = vadd.f32 %v4046_v10, %v1187_v56 }
 0x14d   :  { %v1610_v35 = vsel %vm1258_vm2, %v1437_v34, 0.0  ;;  %1309 = vst.msk [vmem:[%s7897_s5 + $0x190] sm:$0xff] %vm1258_vm2, %v868_v30  ;;  %v3201_v36 = vpop.f32.mrb[52].mxu0  ;;  %1374 = vst.msk [vmem:[%s7897_s5 + $0x398] sm:$0xff] %vm1258_vm2, %v1193_v55 }
 0x14e   :  { %v1611_v38 = vadd.f32 %v1610_v35, %v1609_v32  ;;  %v883_v39 = vadd.f32 %v3201_v36, %v4046_v10  ;;  %v877_v40 = vpop.f32.mrb[53].mxu0  ;;  %1373 = vst.msk [vmem:[%s7897_s5 + $0x390] sm:$0xff] %vm1258_vm2, %v1188_v59  ;;  %v3297_v1 = vpop.f32.mrb[52].mxu1 }
 0x14f   :  { %v878_v44 = vadd.f32 %v4046_v10, %v877_v40  ;;  %v4747_v47 = vld [vmem:[%s7897_s5 + $0x188] sm:$0xff]  ;;  %v1203_v5 = vadd.f32 %v3297_v1, %v4046_v10  ;;  %v1197_v6 = vpop.f32.mrb[53].mxu1 }
 0x150   :  { %v1613_v46 = vadd.f32 %v1612_v43, %v1611_v38  ;;  %v4752_v48 = vld [vmem:[%s7897_s5 + $0x180] sm:$0xff]  ;;  %1312 = vst.msk [vmem:[%s7897_s5 + $0x1a8] sm:$0xff] %vm1258_vm2, %v883_v39  ;;  %v1616_v57 = vsel %vm1258_vm2, %v4747_v47, 0.0  ;;  %v1198_v9 = vadd.f32 %v4046_v10, %v1197_v6 }
 0x151   :  { %v1614_v49 = vsel %vm1258_vm2, %v4752_v48, 0.0  ;;  %1311 = vst.msk [vmem:[%s7897_s5 + $0x1a0] sm:$0xff] %vm1258_vm2, %v878_v44  ;;  %v3204_v50 = vpop.f32.mrb[54].mxu0  ;;  %1376 = vst.msk [vmem:[%s7897_s5 + $0x3a8] sm:$0xff] %vm1258_vm2, %v1203_v5 }
 0x152   :  { %v1615_v52 = vadd.f32 %v1614_v49, %v1613_v46  ;;  %v893_v53 = vadd.f32 %v3204_v50, %v4046_v10  ;;  %v887_v54 = vpop.f32.mrb[55].mxu0  ;;  %1375 = vst.msk [vmem:[%s7897_s5 + $0x3a0] sm:$0xff] %vm1258_vm2, %v1198_v9  ;;  %v3300_v16 = vpop.f32.mrb[54].mxu1 }
 0x153   :  { %v888_v58 = vadd.f32 %v4046_v10, %v887_v54  ;;  %v4781_v61 = vld [vmem:[%s7897_s5 + $0x198] sm:$0xff]  ;;  %v1213_v20 = vadd.f32 %v3300_v16, %v4046_v10  ;;  %v1207_v21 = vpop.f32.mrb[55].mxu1 }
 0x154   :  { %v1617_v60 = vadd.f32 %v1616_v57, %v1615_v52  ;;  %v4786_v62 = vld [vmem:[%s7897_s5 + $0x190] sm:$0xff]  ;;  %1314 = vst.msk [vmem:[%s7897_s5 + $0x1b8] sm:$0xff] %vm1258_vm2, %v893_v53  ;;  %v1620_v7 = vsel %vm1258_vm2, %v4781_v61, 0.0  ;;  %v1208_v24 = vadd.f32 %v4046_v10, %v1207_v21 }
 0x155   :  { %v1618_v63 = vsel %vm1258_vm2, %v4786_v62, 0.0  ;;  %1313 = vst.msk [vmem:[%s7897_s5 + $0x1b0] sm:$0xff] %vm1258_vm2, %v888_v58  ;;  %v3207_v0 = vpop.f32.mrb[56].mxu0  ;;  %1378 = vst.msk [vmem:[%s7897_s5 + $0x3b8] sm:$0xff] %vm1258_vm2, %v1213_v20 }
 0x156   :  { %v1619_v2 = vadd.f32 %v1618_v63, %v1617_v60  ;;  %v903_v3 = vadd.f32 %v3207_v0, %v4046_v10  ;;  %v897_v4 = vpop.f32.mrb[57].mxu0  ;;  %1377 = vst.msk [vmem:[%s7897_s5 + $0x3b0] sm:$0xff] %vm1258_vm2, %v1208_v24  ;;  %v3303_v29 = vpop.f32.mrb[56].mxu1  ;;  %v4993_v24 = vld [vmem:[%s7897_s5 + $0x208] sm:$0xff] }
 0x157   :  { %v898_v8 = vadd.f32 %v4046_v10, %v897_v4  ;;  %v4815_v12 = vld [vmem:[%s7897_s5 + $0x1a8] sm:$0xff]  ;;  %v1223_v34 = vadd.f32 %v3337_v31, %v3303_v29  ;;  %v1217_v35 = vpop.f32.mrb[57].mxu1  ;;  %v1648_v29 = vsel %vm1258_vm2, %v4993_v24, 0.0 }
 0x158   :  { %v1621_v11 = vadd.f32 %v1620_v7, %v1619_v2  ;;  %v4820_v13 = vld [vmem:[%s7897_s5 + $0x1a0] sm:$0xff]  ;;  %1316 = vst.msk [vmem:[%s7897_s5 + $0x1c8] sm:$0xff] %vm1258_vm2, %v903_v3  ;;  %v1624_v22 = vsel %vm1258_vm2, %v4815_v12, 0.0  ;;  %v1218_v38 = vadd.f32 %v3337_v31, %v1217_v35 }
 0x159   :  { %v1622_v14 = vsel %vm1258_vm2, %v4820_v13, 0.0  ;;  %1315 = vst.msk [vmem:[%s7897_s5 + $0x1c0] sm:$0xff] %vm1258_vm2, %v898_v8  ;;  %v3210_v15 = vpop.f32.mrb[58].mxu0  ;;  %1380 = vst.msk [vmem:[%s7897_s5 + $0x3c8] sm:$0xff] %vm1258_vm2, %v1223_v34 }
 0x15a   :  { %v1623_v17 = vadd.f32 %v1622_v14, %v1621_v11  ;;  %v913_v18 = vadd.f32 %v3210_v15, %v4046_v10  ;;  %v907_v19 = vpop.f32.mrb[59].mxu0  ;;  %1379 = vst.msk [vmem:[%s7897_s5 + $0x3c0] sm:$0xff] %vm1258_vm2, %v1218_v38  ;;  %v3306_v44 = vpop.f32.mrb[58].mxu1 }
 0x15b   :  { %v908_v23 = vadd.f32 %v4046_v10, %v907_v19  ;;  %v4849_v26 = vld [vmem:[%s7897_s5 + $0x1b8] sm:$0xff]  ;;  %v1233_v50 = vadd.f32 %v3337_v31, %v3306_v44  ;;  %v1227_v51 = vpop.f32.mrb[59].mxu1  ;;  %v4974_v19 = vld [vmem:[%s7897_s5 + $0x200] sm:$0xff] }
 0x15c   :  { %v1625_v25 = vadd.f32 %v1624_v22, %v1623_v17  ;;  %v4854_v27 = vld [vmem:[%s7897_s5 + $0x1b0] sm:$0xff]  ;;  %1318 = vst.msk [vmem:[%s7897_s5 + $0x1d8] sm:$0xff] %vm1258_vm2, %v913_v18  ;;  %v1628_v36 = vsel %vm1258_vm2, %v4849_v26, 0.0  ;;  %v1228_v54 = vadd.f32 %v3337_v31, %v1227_v51 }
 0x15d   :  { %v1626_v10 = vsel %vm1258_vm2, %v4854_v27, 0.0  ;;  %1317 = vst.msk [vmem:[%s7897_s5 + $0x1d0] sm:$0xff] %vm1258_vm2, %v908_v23  ;;  %v3213_v28 = vpop.f32.mrb[60].mxu0  ;;  %1382 = vst.msk [vmem:[%s7897_s5 + $0x3d8] sm:$0xff] %vm1258_vm2, %v1233_v50  ;;  %v1646_v23 = vsel %vm1258_vm2, %v4974_v19, 0.0 }
 0x15e   :  { %v1627_v30 = vadd.f32 %v1626_v10, %v1625_v25  ;;  %v923_v32 = vadd.f32 %v3337_v31, %v3213_v28  ;;  %v917_v33 = vpop.f32.mrb[61].mxu0  ;;  %1381 = vst.msk [vmem:[%s7897_s5 + $0x3d0] sm:$0xff] %vm1258_vm2, %v1228_v54  ;;  %v3309_v59 = vpop.f32.mrb[60].mxu1  ;;  %v4998_v10 = vld [vmem:[%s7897_s5 + $0x210] sm:$0xff] }
 0x15f   :  { %v918_v37 = vadd.f32 %v3337_v31, %v917_v33  ;;  %v4882_v40 = vld [vmem:[%s7897_s5 + $0x1c8] sm:$0xff]  ;;  %v1243_v63 = vadd.f32 %v3337_v31, %v3309_v59  ;;  %v1237_v0 = vpop.f32.mrb[61].mxu1  ;;  %v5012_v33 = vld [vmem:[%s7897_s5 + $0x220] sm:$0xff] }
 0x160   :  { %v1629_v39 = vadd.f32 %v1628_v36, %v1627_v30  ;;  %v4887_v41 = vld [vmem:[%s7897_s5 + $0x1c0] sm:$0xff]  ;;  %1320 = vst.msk [vmem:[%s7897_s5 + $0x1e8] sm:$0xff] %vm1258_vm2, %v923_v32  ;;  %v1632_v52 = vsel %vm1258_vm2, %v4882_v40, 0.0  ;;  %v1238_v2 = vadd.f32 %v3337_v31, %v1237_v0  ;;  %v1650_v30 = vsel %vm1258_vm2, %v4998_v10, 0.0 }
 0x161   :  { %v1630_v42 = vsel %vm1258_vm2, %v4887_v41, 0.0  ;;  %1319 = vst.msk [vmem:[%s7897_s5 + $0x1e0] sm:$0xff] %vm1258_vm2, %v918_v37  ;;  %v3216_v43 = vpop.f32.mrb[62].mxu0  ;;  %1384 = vst.msk [vmem:[%s7897_s5 + $0x3e8] sm:$0xff] %vm1258_vm2, %v1243_v63  ;;  %v1654_v36 = vsel %vm1258_vm2, %v5012_v33, 0.0  ;;  %v5021_v37 = vld [vmem:[%s7897_s5 + $0x228] sm:$0xff] }
 0x162   :  { %v1631_v45 = vadd.f32 %v1630_v42, %v1629_v39  ;;  %v933_v46 = vadd.f32 %v3337_v31, %v3216_v43  ;;  %v927_v49 = vpop.f32.mrb[63].mxu0  ;;  %1383 = vst.msk [vmem:[%s7897_s5 + $0x3e0] sm:$0xff] %vm1258_vm2, %v1238_v2  ;;  %v3312_v7 = vpop.f32.mrb[62].mxu1  ;;  %v5026_v39 = vld [vmem:[%s7897_s5 + $0x230] sm:$0xff]  ;;  %v1656_v43 = vsel %vm1258_vm2, %v5021_v37, 0.0  ;;  %v5063_v63 = vld [vmem:[%s7897_s5 + $0x258] sm:$0xff] }
 0x163   :  { %v928_v53 = vadd.f32 %v3337_v31, %v927_v49  ;;  %v4912_v56 = vld [vmem:[%s7897_s5 + $0x1d8] sm:$0xff]  ;;  %v1253_v9 = vadd.f32 %v3337_v31, %v3312_v7  ;;  %v1247_v11 = vpop.f32.mrb[63].mxu1  ;;  %v1658_v44 = vsel %vm1258_vm2, %v5026_v39, 0.0  ;;  %v5040_v49 = vld [vmem:[%s7897_s5 + $0x240] sm:$0xff]  ;;  %v5077_v7 = vld [vmem:[%s7897_s5 + $0x268] sm:$0xff] }
 0x164   :  { %v1633_v55 = vadd.f32 %v1632_v52, %v1631_v45  ;;  %v4917_v57 = vld [vmem:[%s7897_s5 + $0x1d0] sm:$0xff]  ;;  %1322 = vst.msk [vmem:[%s7897_s5 + $0x1f8] sm:$0xff] %vm1258_vm2, %v933_v46  ;;  %v1636_v1 = vsel %vm1258_vm2, %v4912_v56, 0.0  ;;  %v1248_v15 = vadd.f32 %v3337_v31, %v1247_v11  ;;  %v5007_v31 = vld [vmem:[%s7897_s5 + $0x218] sm:$0xff]  ;;  %v1662_v52 = vsel %vm1258_vm2, %v5040_v49, 0.0 }
 0x165   :  { %v1634_v58 = vsel %vm1258_vm2, %v4917_v57, 0.0  ;;  %1321 = vst.msk [vmem:[%s7897_s5 + $0x1f0] sm:$0xff] %vm1258_vm2, %v928_v53  ;;  %1386 = vst.msk [vmem:[%s7897_s5 + $0x3f8] sm:$0xff] %vm1258_vm2, %v1253_v9  ;;  %v1652_v35 = vsel %vm1258_vm2, %v5007_v31, 0.0  ;;  %v5035_v45 = vld [vmem:[%s7897_s5 + $0x238] sm:$0xff]  ;;  %v5049_v53 = vld [vmem:[%s7897_s5 + $0x248] sm:$0xff] }
 0x166   :  { %v1635_v60 = vadd.f32 %v1634_v58, %v1633_v55  ;;  %1385 = vst.msk [vmem:[%s7897_s5 + $0x3f0] sm:$0xff] %vm1258_vm2, %v1248_v15  ;;  %v1660_v51 = vsel %vm1258_vm2, %v5035_v45, 0.0  ;;  %v5054_v55 = vld [vmem:[%s7897_s5 + $0x250] sm:$0xff]  ;;  %v1664_v59 = vsel %vm1258_vm2, %v5049_v53, 0.0 }
 0x167   :  { %v4942_v4 = vld [vmem:[%s7897_s5 + $0x1e8] sm:$0xff]  ;;  %v5082_v9 = vld [vmem:[%s7897_s5 + $0x270] sm:$0xff] }
 0x168   :  { %v1637_v3 = vadd.f32 %v1636_v1, %v1635_v60  ;;  %v4947_v5 = vld [vmem:[%s7897_s5 + $0x1e0] sm:$0xff]  ;;  %v1640_v14 = vsel %vm1258_vm2, %v4942_v4, 0.0  ;;  %v1666_v60 = vsel %vm1258_vm2, %v5054_v55, 0.0  ;;  %v1674_v15 = vsel %vm1258_vm2, %v5082_v9, 0.0 }
 0x169   :  { %v1638_v6 = vsel %vm1258_vm2, %v4947_v5, 0.0  ;;  %v5068_v1 = vld [vmem:[%s7897_s5 + $0x260] sm:$0xff] }
 0x16a   :  { %v1639_v8 = vadd.f32 %v1638_v6, %v1637_v3  ;;  %v1668_v3 = vsel %vm1258_vm2, %v5063_v63, 0.0  ;;  %v1670_v6 = vsel %vm1258_vm2, %v5068_v1, 0.0 }
 0x16b   :  { %v4964_v16 = vld [vmem:[%s7897_s5 + $0x1f8] sm:$0xff] }
 0x16c   :  { %v4969_v17 = vld [vmem:[%s7897_s5 + $0x1f0] sm:$0xff]  ;;  %v1641_v18 = vadd.f32 %v1640_v14, %v1639_v8  ;;  %v1644_v22 = vsel %vm1258_vm2, %v4964_v16, 0.0  ;;  %v1672_v14 = vsel %vm1258_vm2, %v5077_v7, 0.0 }
 0x16d   :  { %v1642_v20 = vsel %vm1258_vm2, %v4969_v17, 0.0 }
 0x16e   :  { %v1643_v21 = vadd.f32 %v1642_v20, %v1641_v18  ;;  %v5091_v18 = vld [vmem:[%s7897_s5 + $0x278] sm:$0xff] }
 0x170   :  { %v1645_v25 = vadd.f32 %v1644_v22, %v1643_v21  ;;  %v5096_v21 = vld [vmem:[%s7897_s5 + $0x280] sm:$0xff] }
 0x172   :  { %v1647_v28 = vadd.f32 %v1646_v23, %v1645_v25  ;;  %v1676_v23 = vsel %vm1258_vm2, %v5091_v18, 0.0  ;;  %v1678_v25 = vsel %vm1258_vm2, %v5096_v21, 0.0 }
 0x174   :  { %v1649_v32 = vadd.f32 %v1648_v29, %v1647_v28  ;;  %v5105_v28 = vld [vmem:[%s7897_s5 + $0x288] sm:$0xff] }
 0x176   :  { %v1651_v34 = vadd.f32 %v1650_v30, %v1649_v32  ;;  %v5110_v30 = vld [vmem:[%s7897_s5 + $0x290] sm:$0xff] }
 0x178   :  { %v1653_v38 = vadd.f32 %v1652_v35, %v1651_v34  ;;  %v1680_v34 = vsel %vm1258_vm2, %v5105_v28, 0.0  ;;  %v1682_v35 = vsel %vm1258_vm2, %v5110_v30, 0.0 }
 0x17a   :  { %v1655_v42 = vadd.f32 %v1654_v36, %v1653_v38  ;;  %v5119_v36 = vld [vmem:[%s7897_s5 + $0x298] sm:$0xff] }
 0x17c   :  { %v1657_v46 = vadd.f32 %v1656_v43, %v1655_v42  ;;  %v5124_v42 = vld [vmem:[%s7897_s5 + $0x2a0] sm:$0xff] }
 0x17e   :  { %v1659_v50 = vadd.f32 %v1658_v44, %v1657_v46  ;;  %v1684_v44 = vsel %vm1258_vm2, %v5119_v36, 0.0  ;;  %v1686_v46 = vsel %vm1258_vm2, %v5124_v42, 0.0 }
 0x180   :  { %v1661_v54 = vadd.f32 %v1660_v51, %v1659_v50  ;;  %v5133_v50 = vld [vmem:[%s7897_s5 + $0x2a8] sm:$0xff] }
 0x182   :  { %v1663_v58 = vadd.f32 %v1662_v52, %v1661_v54  ;;  %v5138_v52 = vld [vmem:[%s7897_s5 + $0x2b0] sm:$0xff] }
 0x184   :  { %v1665_v0 = vadd.f32 %v1664_v59, %v1663_v58  ;;  %v1688_v58 = vsel %vm1258_vm2, %v5133_v50, 0.0  ;;  %v1690_v59 = vsel %vm1258_vm2, %v5138_v52, 0.0 }
 0x186   :  { %v1667_v2 = vadd.f32 %v1666_v60, %v1665_v0  ;;  %v5147_v60 = vld [vmem:[%s7897_s5 + $0x2b8] sm:$0xff] }
 0x188   :  { %v1669_v8 = vadd.f32 %v1668_v3, %v1667_v2  ;;  %v5152_v2 = vld [vmem:[%s7897_s5 + $0x2c0] sm:$0xff] }
 0x18a   :  { %v1671_v11 = vadd.f32 %v1670_v6, %v1669_v8  ;;  %v1692_v6 = vsel %vm1258_vm2, %v5147_v60, 0.0  ;;  %v1694_v8 = vsel %vm1258_vm2, %v5152_v2, 0.0 }
 0x18c   :  { %v1673_v20 = vadd.f32 %v1672_v14, %v1671_v11  ;;  %v5161_v11 = vld [vmem:[%s7897_s5 + $0x2c8] sm:$0xff] }
 0x18e   :  { %v1675_v22 = vadd.f32 %v1674_v15, %v1673_v20  ;;  %v5166_v15 = vld [vmem:[%s7897_s5 + $0x2d0] sm:$0xff] }
 0x190   :  { %v1677_v29 = vadd.f32 %v1676_v23, %v1675_v22  ;;  %v1696_v22 = vsel %vm1258_vm2, %v5161_v11, 0.0  ;;  %v1698_v23 = vsel %vm1258_vm2, %v5166_v15, 0.0 }
 0x192   :  { %v1679_v32 = vadd.f32 %v1678_v25, %v1677_v29  ;;  %v5175_v25 = vld [vmem:[%s7897_s5 + $0x2d8] sm:$0xff] }
 0x194   :  { %v1681_v38 = vadd.f32 %v1680_v34, %v1679_v32  ;;  %v5180_v32 = vld [vmem:[%s7897_s5 + $0x2e0] sm:$0xff] }
 0x196   :  { %v1683_v43 = vadd.f32 %v1682_v35, %v1681_v38  ;;  %v1700_v35 = vsel %vm1258_vm2, %v5175_v25, 0.0  ;;  %v1702_v38 = vsel %vm1258_vm2, %v5180_v32, 0.0 }
 0x198   :  { %v1685_v51 = vadd.f32 %v1684_v44, %v1683_v43  ;;  %v5189_v43 = vld [vmem:[%s7897_s5 + $0x2e8] sm:$0xff] }
 0x199   :  { %7970 = vst [vmem:[#allocation2_spill] sm:$0xff] %v5189_v43 }
 0x19a   :  { %v1687_v54 = vadd.f32 %v1686_v46, %v1685_v51  ;;  %v5194_v46 = vld [vmem:[%s7897_s5 + $0x2f0] sm:$0xff] }
 0x19b   :  { %7971 = vst [vmem:[#allocation3_spill] sm:$0xff] %v5194_v46 }
 0x19c   :  { %v1689_v0 = vadd.f32 %v1688_v58, %v1687_v54  ;;  %v1704_v54 = vsel %vm1258_vm2, %v5189_v43, 0.0  ;;  %v1706_v58 = vsel %vm1258_vm2, %v5194_v46, 0.0 }
 0x19e   :  { %v1691_v3 = vadd.f32 %v1690_v59, %v1689_v0  ;;  %v5203_v59 = vld [vmem:[%s7897_s5 + $0x2f8] sm:$0xff] }
 0x19f   :  { %7972 = vst [vmem:[#allocation4_spill] sm:$0xff] %v5203_v59 }
 0x1a0   :  { %v1693_v14 = vadd.f32 %v1692_v6, %v1691_v3  ;;  %v5208_v3 = vld [vmem:[%s7897_s5 + $0x300] sm:$0xff] }
 0x1a1   :  { %7973 = vst [vmem:[#allocation5_spill] sm:$0xff] %v5208_v3 }
 0x1a2   :  { %v1695_v20 = vadd.f32 %v1694_v8, %v1693_v14  ;;  %v1708_v8 = vsel %vm1258_vm2, %v5203_v59, 0.0  ;;  %v1710_v14 = vsel %vm1258_vm2, %v5208_v3, 0.0 }
 0x1a4   :  { %v1697_v29 = vadd.f32 %v1696_v22, %v1695_v20  ;;  %v5217_v20 = vld [vmem:[%s7897_s5 + $0x308] sm:$0xff] }
 0x1a5   :  { %7974 = vst [vmem:[#allocation6_spill] sm:$0xff] %v5217_v20 }
 0x1a6   :  { %v1699_v34 = vadd.f32 %v1698_v23, %v1697_v29  ;;  %v5222_v23 = vld [vmem:[%s7897_s5 + $0x310] sm:$0xff] }
 0x1a7   :  { %7975 = vst [vmem:[#allocation7_spill] sm:$0xff] %v5222_v23 }
 0x1a8   :  { %v1701_v44 = vadd.f32 %v1700_v35, %v1699_v34  ;;  %v1712_v34 = vsel %vm1258_vm2, %v5217_v20, 0.0  ;;  %v1714_v35 = vsel %vm1258_vm2, %v5222_v23, 0.0 }
 0x1aa   :  { %v1703_v51 = vadd.f32 %v1702_v38, %v1701_v44  ;;  %v5231_v38 = vld [vmem:[%s7897_s5 + $0x318] sm:$0xff] }
 0x1ab   :  { %7976 = vst [vmem:[#allocation8_spill] sm:$0xff] %v5231_v38 }
 0x1ac   :  { %v1705_v0 = vadd.f32 %v1704_v54, %v1703_v51  ;;  %v5236_v51 = vld [vmem:[%s7897_s5 + $0x320] sm:$0xff] }
 0x1ad   :  { %7977 = vst [vmem:[#allocation9_spill] sm:$0xff] %v5236_v51 }
 0x1ae   :  { %v1707_v6 = vadd.f32 %v1706_v58, %v1705_v0  ;;  %v1716_v58 = vsel %vm1258_vm2, %v5231_v38, 0.0  ;;  %v1718_v0 = vsel %vm1258_vm2, %v5236_v51, 0.0 }
 0x1b0   :  { %v1709_v22 = vadd.f32 %v1708_v8, %v1707_v6  ;;  %v5245_v6 = vld [vmem:[%s7897_s5 + $0x328] sm:$0xff] }
 0x1b1   :  { %7978 = vst [vmem:[#allocation10_spill] sm:$0xff] %v5245_v6 }
 0x1b2   :  { %v1711_v29 = vadd.f32 %v1710_v14, %v1709_v22  ;;  %v5250_v14 = vld [vmem:[%s7897_s5 + $0x330] sm:$0xff] }
 0x1b3   :  { %7979 = vst [vmem:[#allocation11_spill] sm:$0xff] %v5250_v14 }
 0x1b4   :  { %v1713_v44 = vadd.f32 %v1712_v34, %v1711_v29  ;;  %v1720_v29 = vsel %vm1258_vm2, %v5245_v6, 0.0  ;;  %v1722_v34 = vsel %vm1258_vm2, %v5250_v14, 0.0  ;;  %v5273_v14 = vld [vmem:[%s7897_s5 + $0x348] sm:$0xff] }
 0x1b5   :  { %7982 = vst [vmem:[#allocation14_spill] sm:$0xff] %v5273_v14 }
 0x1b6   :  { %v1715_v54 = vadd.f32 %v1714_v35, %v1713_v44  ;;  %v5259_v35 = vld [vmem:[%s7897_s5 + $0x338] sm:$0xff] }
 0x1b7   :  { %7980 = vst [vmem:[#allocation12_spill] sm:$0xff] %v5259_v35 }
 0x1b8   :  { %v1717_v8 = vadd.f32 %v1716_v58, %v1715_v54  ;;  %v5264_v54 = vld [vmem:[%s7897_s5 + $0x340] sm:$0xff] }
 0x1b9   :  { %7981 = vst [vmem:[#allocation13_spill] sm:$0xff] %v5264_v54 }
 0x1ba   :  { %v1719_v22 = vadd.f32 %v1718_v0, %v1717_v8  ;;  %v1724_v0 = vsel %vm1258_vm2, %v5259_v35, 0.0  ;;  %v1726_v8 = vsel %vm1258_vm2, %v5264_v54, 0.0  ;;  %v5287_v54 = vld [vmem:[%s7897_s5 + $0x358] sm:$0xff] }
 0x1bb   :  { %7984 = vst [vmem:[#allocation16_spill] sm:$0xff] %v5287_v54 }
 0x1bc   :  { %v1721_v44 = vadd.f32 %v1720_v29, %v1719_v22  ;;  %v5278_v22 = vld [vmem:[%s7897_s5 + $0x350] sm:$0xff] }
 0x1bd   :  { %7983 = vst [vmem:[#allocation15_spill] sm:$0xff] %v5278_v22 }
 0x1be   :  { %v1723_v58 = vadd.f32 %v1722_v34, %v1721_v44  ;;  %v1728_v34 = vsel %vm1258_vm2, %v5273_v14, 0.0  ;;  %v1730_v44 = vsel %vm1258_vm2, %v5278_v22, 0.0  ;;  %v5301_v22 = vld [vmem:[%s7897_s5 + $0x368] sm:$0xff] }
 0x1bf   :  { %7986 = vst [vmem:[#allocation18_spill] sm:$0xff] %v5301_v22 }
 0x1c0   :  { %v1725_v6 = vadd.f32 %v1724_v0, %v1723_v58  ;;  %v5292_v58 = vld [vmem:[%s7897_s5 + $0x360] sm:$0xff] }
 0x1c1   :  { %7985 = vst [vmem:[#allocation17_spill] sm:$0xff] %v5292_v58 }
 0x1c2   :  { %v1727_v29 = vadd.f32 %v1726_v8, %v1725_v6  ;;  %v1732_v6 = vsel %vm1258_vm2, %v5287_v54, 0.0  ;;  %v1734_v8 = vsel %vm1258_vm2, %v5292_v58, 0.0 }
 0x1c4   :  { %v1729_v35 = vadd.f32 %v1728_v34, %v1727_v29  ;;  %v1736_v29 = vsel %vm1258_vm2, %v5301_v22, 0.0 }
 0x1c6   :  { %v1731_v51 = vadd.f32 %v1730_v44, %v1729_v35  ;;  %v5306_v35 = vld [vmem:[%s7897_s5 + $0x370] sm:$0xff]  ;;  %v5315_v44 = vld [vmem:[%s7897_s5 + $0x378] sm:$0xff] }
 0x1c7   :  { %7987 = vst [vmem:[#allocation19_spill] sm:$0xff] %v5306_v35  ;;  %7988 = vst [vmem:[#allocation20_spill] sm:$0xff] %v5315_v44 }
 0x1c8   :  { %v1733_v0 = vadd.f32 %v1732_v6, %v1731_v51  ;;  %v1738_v51 = vsel %vm1258_vm2, %v5306_v35, 0.0 }
 0x1ca   :  { %v1735_v14 = vadd.f32 %v1734_v8, %v1733_v0  ;;  %v5320_v0 = vld [vmem:[%s7897_s5 + $0x380] sm:$0xff]  ;;  %v1740_v8 = vsel %vm1258_vm2, %v5315_v44, 0.0 }
 0x1cb   :  { %7989 = vst [vmem:[#allocation21_spill] sm:$0xff] %v5320_v0 }
 0x1cc   :  { %v1737_v34 = vadd.f32 %v1736_v29, %v1735_v14  ;;  %v1742_v14 = vsel %vm1258_vm2, %v5320_v0, 0.0  ;;  %v5329_v29 = vld [vmem:[%s7897_s5 + $0x388] sm:$0xff] }
 0x1cd   :  { %7990 = vst [vmem:[#allocation22_spill] sm:$0xff] %v5329_v29 }
 0x1ce   :  { %v1739_v6 = vadd.f32 %v1738_v51, %v1737_v34  ;;  %v5334_v34 = vld [vmem:[%s7897_s5 + $0x390] sm:$0xff]  ;;  %v1744_v51 = vsel %vm1258_vm2, %v5329_v29, 0.0 }
 0x1cf   :  { %7991 = vst [vmem:[#allocation23_spill] sm:$0xff] %v5334_v34 }
 0x1d0   :  { %v1741_v58 = vadd.f32 %v1740_v8, %v1739_v6  ;;  %v1746_v6 = vsel %vm1258_vm2, %v5334_v34, 0.0  ;;  %v5343_v8 = vld [vmem:[%s7897_s5 + $0x398] sm:$0xff] }
 0x1d1   :  { %7992 = vst [vmem:[#allocation24_spill] sm:$0xff] %v5343_v8 }
 0x1d2   :  { %v1743_v35 = vadd.f32 %v1742_v14, %v1741_v58  ;;  %v5348_v58 = vld [vmem:[%s7897_s5 + $0x3a0] sm:$0xff]  ;;  %v1748_v14 = vsel %vm1258_vm2, %v5343_v8, 0.0 }
 0x1d3   :  { %7993 = vst [vmem:[#allocation25_spill] sm:$0xff] %v5348_v58 }
 0x1d4   :  { %v1745_v22 = vadd.f32 %v1744_v51, %v1743_v35  ;;  %v1750_v35 = vsel %vm1258_vm2, %v5348_v58, 0.0  ;;  %v5357_v51 = vld [vmem:[%s7897_s5 + $0x3a8] sm:$0xff] }
 0x1d5   :  { %7994 = vst [vmem:[#allocation26_spill] sm:$0xff] %v5357_v51 }
 0x1d6   :  { %v1747_v0 = vadd.f32 %v1746_v6, %v1745_v22  ;;  %v5362_v22 = vld [vmem:[%s7897_s5 + $0x3b0] sm:$0xff]  ;;  %v1752_v6 = vsel %vm1258_vm2, %v5357_v51, 0.0 }
 0x1d7   :  { %7995 = vst [vmem:[#allocation27_spill] sm:$0xff] %v5362_v22 }
 0x1d8   :  { %v1749_v44 = vadd.f32 %v1748_v14, %v1747_v0  ;;  %v1754_v0 = vsel %vm1258_vm2, %v5362_v22, 0.0  ;;  %v5371_v14 = vld [vmem:[%s7897_s5 + $0x3b8] sm:$0xff] }
 0x1d9   :  { %7996 = vst [vmem:[#allocation28_spill] sm:$0xff] %v5371_v14 }
 0x1da   :  { %v1751_v34 = vadd.f32 %v1750_v35, %v1749_v44  ;;  %v5376_v44 = vld [vmem:[%s7897_s5 + $0x3c0] sm:$0xff]  ;;  %v1756_v35 = vsel %vm1258_vm2, %v5371_v14, 0.0 }
 0x1db   :  { %7997 = vst [vmem:[#allocation29_spill] sm:$0xff] %v5376_v44 }
 0x1dc   :  { %v1753_v29 = vadd.f32 %v1752_v6, %v1751_v34  ;;  %v1758_v34 = vsel %vm1258_vm2, %v5376_v44, 0.0  ;;  %v5385_v6 = vld [vmem:[%s7897_s5 + $0x3c8] sm:$0xff] }
 0x1dd   :  { %7998 = vst [vmem:[#allocation30_spill] sm:$0xff] %v5385_v6 }
 0x1de   :  { %v1755_v58 = vadd.f32 %v1754_v0, %v1753_v29  ;;  %v5390_v29 = vld [vmem:[%s7897_s5 + $0x3d0] sm:$0xff]  ;;  %v1760_v0 = vsel %vm1258_vm2, %v5385_v6, 0.0 }
 0x1df   :  { %7999 = vst [vmem:[#allocation31_spill] sm:$0xff] %v5390_v29 }
 0x1e0   :  { %v1757_v8 = vadd.f32 %v1756_v35, %v1755_v58  ;;  %v1762_v58 = vsel %vm1258_vm2, %v5390_v29, 0.0  ;;  %v5399_v35 = vld [vmem:[%s7897_s5 + $0x3d8] sm:$0xff] }
 0x1e1   :  { %8000 = vst [vmem:[#allocation32_spill] sm:$0xff] %v5399_v35 }
 0x1e2   :  { %v1759_v22 = vadd.f32 %v1758_v34, %v1757_v8  ;;  %v5404_v8 = vld [vmem:[%s7897_s5 + $0x3e0] sm:$0xff]  ;;  %v1764_v34 = vsel %vm1258_vm2, %v5399_v35, 0.0 }
 0x1e3   :  { %8001 = vst [vmem:[#allocation33_spill] sm:$0xff] %v5404_v8 }
 0x1e4   :  { %v1761_v51 = vadd.f32 %v1760_v0, %v1759_v22  ;;  %v1766_v22 = vsel %vm1258_vm2, %v5404_v8, 0.0  ;;  %v5413_v0 = vld [vmem:[%s7897_s5 + $0x3e8] sm:$0xff] }
 0x1e5   :  { %8002 = vst [vmem:[#allocation34_spill] sm:$0xff] %v5413_v0 }
 0x1e6   :  { %v1763_v44 = vadd.f32 %v1762_v58, %v1761_v51  ;;  %v5418_v51 = vld [vmem:[%s7897_s5 + $0x3f0] sm:$0xff]  ;;  %v1768_v58 = vsel %vm1258_vm2, %v5413_v0, 0.0 }
 0x1e7   :  { %8003 = vst [vmem:[#allocation35_spill] sm:$0xff] %v5418_v51 }
 0x1e8   :  { %v1765_v14 = vadd.f32 %v1764_v34, %v1763_v44  ;;  %v1770_v44 = vsel %vm1258_vm2, %v5418_v51, 0.0  ;;  %v5427_v34 = vld [vmem:[%s7897_s5 + $0x3f8] sm:$0xff] }
 0x1e9   :  { %8004 = vst [vmem:[#allocation36_spill] sm:$0xff] %v5427_v34 }
 0x1ea   :  { %v1767_v29 = vadd.f32 %v1766_v22, %v1765_v14  ;;  %v1772_v14 = vsel %vm1258_vm2, %v5427_v34, 0.0 }
 0x1ec   :  { %v1769_v6 = vadd.f32 %v1768_v58, %v1767_v29  ;;  %v3338_v58 = vld [vmem:[%s7897_s5] sm:$0xff] }
 0x1ee   :  { %v1771_v8 = vadd.f32 %v1770_v44, %v1769_v6  ;;  %v3339_v6 = vld [vmem:[%s7897_s5 + $0x8] sm:$0xff]  ;;  %v3342_v44 = vld [vmem:[%s7897_s5 + $0x20] sm:$0xff] }
 0x1f0   :  { %v1773_v22 = vadd.f32 %v1772_v14, %v1771_v8 }
 0x1f2   :  { %v1774_v35 = vrot.slane %v1773_v22, 4 }
 0x1f4   :  { %v1775_v54 = vadd.f32 %v1774_v35, %v1773_v22 }
 0x1f6   :  { %v1776_v38 = vrot.slane %v1775_v54, 2 }
 0x1f8   :  { %v1777_v23 = vadd.f32 %v1776_v38, %v1775_v54  ;;  %v3340_v38 = vld [vmem:[%s7897_s5 + $0x10] sm:$0xff] }
 0x1fa   :  { %v1778_v20 = vrot.slane %v1777_v23, 1 }
 0x1fc   :  { %v1779_v0 = vadd.f32 %v1778_v20, %v1777_v23  ;;  %v3341_v23 = vld [vmem:[%s7897_s5 + $0x18] sm:$0xff] }
 0x1fe   :  { %v5431_v29 = vmul.f32 0.0009765625, %v1779_v0 }
 0x200   :  { %v1782_v51 = vsub.f32 %v3338_v58, %v5431_v29  ;;  %v1783_v8 = vsub.f32 %v3339_v6, %v5431_v29  ;;  %v1784_v20 = vsub.f32 %v3340_v38, %v5431_v29  ;;  %v1785_v54 = vsub.f32 %v3341_v23, %v5431_v29  ;;  %v3343_v58 = vld [vmem:[%s7897_s5 + $0x28] sm:$0xff] }
 0x201   :  { %v1786_v14 = vsub.f32 %v3342_v44, %v5431_v29  ;;  %v1787_v6 = vsub.f32 %v3343_v58, %v5431_v29  ;;  %v3345_v58 = vld [vmem:[%s7897_s5 + $0x38] sm:$0xff] }
 0x202   :  { %v1910_v35 = vmul.f32 %v1782_v51, %v1782_v51  ;;  %v1911_v0 = vmul.f32 %v1783_v8, %v1783_v8  ;;  %v1912_v22 = vmul.f32 %v1784_v20, %v1784_v20  ;;  %v1913_v38 = vmul.f32 %v1785_v54, %v1785_v54  ;;  %v3344_v8 = vld [vmem:[%s7897_s5 + $0x30] sm:$0xff] }
 0x203   :  { %v1788_v3 = vsub.f32 %v3344_v8, %v5431_v29  ;;  %v1914_v44 = vmul.f32 %v1786_v14, %v1786_v14  ;;  %v1789_v54 = vsub.f32 %v3345_v58, %v5431_v29 }
 0x204   :  { %v2038_v34 = vsel %vm1258_vm2, %v1910_v35, 0.0  ;;  %v2039_v23 = vsel %vm1258_vm2, %v1911_v0, 0.0  ;;  %v2041_v20 = vsel %vm1258_vm2, %v1912_v22, 0.0  ;;  %v1915_v35 = vmul.f32 %v1787_v6, %v1787_v6 }
 0x205   :  { %v2040_v51 = vadd.f32 %v2039_v23, %v2038_v34  ;;  %v2043_v0 = vsel %vm1258_vm2, %v1913_v38, 0.0  ;;  %v3346_v23 = vld [vmem:[%s7897_s5 + $0x40] sm:$0xff]  ;;  %v1916_v14 = vmul.f32 %v1788_v3, %v1788_v3  ;;  %v2045_v22 = vsel %vm1258_vm2, %v1914_v44, 0.0 }
 0x206   :  { %v1790_v8 = vsub.f32 %v3346_v23, %v5431_v29  ;;  %v1917_v6 = vmul.f32 %v1789_v54, %v1789_v54  ;;  %v2047_v38 = vsel %vm1258_vm2, %v1915_v35, 0.0 }
 0x207   :  { %v2042_v59 = vadd.f32 %v2041_v20, %v2040_v51  ;;  %v3347_v20 = vld [vmem:[%s7897_s5 + $0x48] sm:$0xff]  ;;  %v2049_v44 = vsel %vm1258_vm2, %v1916_v14, 0.0 }
 0x208   :  { %v1791_v58 = vsub.f32 %v3347_v20, %v5431_v29  ;;  %v1918_v3 = vmul.f32 %v1790_v8, %v1790_v8  ;;  %v2051_v35 = vsel %vm1258_vm2, %v1917_v6, 0.0 }
 0x209   :  { %v2044_v34 = vadd.f32 %v2043_v0, %v2042_v59  ;;  %v3348_v0 = vld [vmem:[%s7897_s5 + $0x50] sm:$0xff] }
 0x20a   :  { %v1792_v23 = vsub.f32 %v3348_v0, %v5431_v29  ;;  %v1919_v54 = vmul.f32 %v1791_v58, %v1791_v58  ;;  %v2053_v14 = vsel %vm1258_vm2, %v1918_v3, 0.0 }
 0x20b   :  { %v2046_v51 = vadd.f32 %v2045_v22, %v2044_v34  ;;  %v3349_v22 = vld [vmem:[%s7897_s5 + $0x58] sm:$0xff] }
 0x20c   :  { %v1793_v20 = vsub.f32 %v3349_v22, %v5431_v29  ;;  %v1920_v8 = vmul.f32 %v1792_v23, %v1792_v23  ;;  %v2055_v6 = vsel %vm1258_vm2, %v1919_v54, 0.0 }
 0x20d   :  { %v2048_v59 = vadd.f32 %v2047_v38, %v2046_v51  ;;  %v3350_v38 = vld [vmem:[%s7897_s5 + $0x60] sm:$0xff] }
 0x20e   :  { %v1794_v0 = vsub.f32 %v3350_v38, %v5431_v29  ;;  %v1921_v58 = vmul.f32 %v1793_v20, %v1793_v20 }
 0x20f   :  { %v2050_v34 = vadd.f32 %v2049_v44, %v2048_v59  ;;  %v3351_v44 = vld [vmem:[%s7897_s5 + $0x68] sm:$0xff] }
 0x210   :  { %v1795_v22 = vsub.f32 %v3351_v44, %v5431_v29  ;;  %v1922_v3 = vmul.f32 %v1794_v0, %v1794_v0 }
 0x211   :  { %v2052_v51 = vadd.f32 %v2051_v35, %v2050_v34  ;;  %v5502_v35 = vld [vmem:[%s7897_s5 + $0x70] sm:$0xff] }
 0x212   :  { %8005 = vst [vmem:[#allocation37_spill] sm:$0xff] %v5502_v35  ;;  %v1796_v23 = vsub.f32 %v5502_v35, %v5431_v29  ;;  %v1923_v54 = vmul.f32 %v1795_v22, %v1795_v22  ;;  %v1830_v35 = vsub.f32 %v4752_v48, %v5431_v29  ;;  %v1833_v48 = vsub.f32 %v4781_v61, %v5431_v29 }
 0x213   :  { %v2054_v59 = vadd.f32 %v2053_v14, %v2052_v51  ;;  %v2057_v51 = vsel %vm1258_vm2, %v1920_v8, 0.0  ;;  %v5510_v14 = vld [vmem:[%s7897_s5 + $0x78] sm:$0xff]  ;;  %v1836_v61 = vsub.f32 %v4854_v27, %v5431_v29  ;;  %v1839_v27 = vsub.f32 %v4882_v40, %v5431_v29 }
 0x214   :  { %8006 = vst [vmem:[#allocation38_spill] sm:$0xff] %v5510_v14  ;;  %v1797_v20 = vsub.f32 %v5510_v14, %v5431_v29  ;;  %v1924_v8 = vmul.f32 %v1796_v23, %v1796_v23  ;;  %v5526_v14 = vld [vmem:[%s7897_s5 + $0x88] sm:$0xff]  ;;  %v1842_v40 = vsub.f32 %v4947_v5, %v5431_v29  ;;  %v1845_v5 = vsub.f32 %v4964_v16, %v5431_v29 }
 0x215   :  { %v2056_v34 = vadd.f32 %v2055_v6, %v2054_v59  ;;  %v2059_v59 = vsel %vm1258_vm2, %v1921_v58, 0.0  ;;  %v5518_v6 = vld [vmem:[%s7897_s5 + $0x80] sm:$0xff]  ;;  %8008 = vst [vmem:[#allocation40_spill] sm:$0xff] %v5526_v14  ;;  %v1799_v22 = vsub.f32 %v5526_v14, %v5431_v29  ;;  %v5542_v14 = vld [vmem:[%s7897_s5 + $0x98] sm:$0xff]  ;;  %v1848_v16 = vsub.f32 %v4998_v10, %v5431_v29 }
 0x216   :  { %8007 = vst [vmem:[#allocation39_spill] sm:$0xff] %v5518_v6  ;;  %v1798_v0 = vsub.f32 %v5518_v6, %v5431_v29  ;;  %v1925_v58 = vmul.f32 %v1797_v20, %v1797_v20  ;;  %v5534_v6 = vld [vmem:[%s7897_s5 + $0x90] sm:$0xff]  ;;  %8010 = vst [vmem:[#allocation42_spill] sm:$0xff] %v5542_v14  ;;  %v1801_v20 = vsub.f32 %v5542_v14, %v5431_v29  ;;  %v5558_v14 = vld [vmem:[%s7897_s5 + $0xa8] sm:$0xff] }
 0x217   :  { %v2058_v38 = vadd.f32 %v2057_v51, %v2056_v34  ;;  %v2061_v34 = vsel %vm1258_vm2, %v1922_v3, 0.0  ;;  %8009 = vst [vmem:[#allocation41_spill] sm:$0xff] %v5534_v6  ;;  %v1800_v23 = vsub.f32 %v5534_v6, %v5431_v29  ;;  %v5550_v6 = vld [vmem:[%s7897_s5 + $0xa0] sm:$0xff]  ;;  %8012 = vst [vmem:[#allocation44_spill] sm:$0xff] %v5558_v14  ;;  %v1851_v10 = vsub.f32 %v5021_v37, %v5431_v29 }
 0x218   :  { %v1926_v3 = vmul.f32 %v1798_v0, %v1798_v0  ;;  %8011 = vst [vmem:[#allocation43_spill] sm:$0xff] %v5550_v6  ;;  %v1802_v0 = vsub.f32 %v5550_v6, %v5431_v29  ;;  %v5566_v6 = vld [vmem:[%s7897_s5 + $0xb0] sm:$0xff]  ;;  %v1854_v37 = vsub.f32 %v5040_v49, %v5431_v29  ;;  %v1857_v49 = vsub.f32 %v5063_v63, %v5431_v29 }
 0x219   :  { %v2060_v44 = vadd.f32 %v2059_v59, %v2058_v38  ;;  %v2063_v38 = vsel %vm1258_vm2, %v1923_v54, 0.0  ;;  %v1927_v54 = vmul.f32 %v1799_v22, %v1799_v22  ;;  %v1803_v22 = vsub.f32 %v5558_v14, %v5431_v29  ;;  %8013 = vst [vmem:[#allocation45_spill] sm:$0xff] %v5566_v6  ;;  %v5574_v14 = vld [vmem:[%s7897_s5 + $0xb8] sm:$0xff] }
 0x21a   :  { %8014 = vst [vmem:[#allocation46_spill] sm:$0xff] %v5574_v14  ;;  %v1860_v63 = vsub.f32 %v5082_v9, %v5431_v29  ;;  %v1863_v9 = vsub.f32 %v5105_v28, %v5431_v29  ;;  %v1866_v28 = vsub.f32 %v5124_v42, %v5431_v29  ;;  %v1869_v42 = vsub.f32 %v5147_v60, %v5431_v29 }
 0x21b   :  { %v2062_v51 = vadd.f32 %v2061_v34, %v2060_v44  ;;  %v2065_v44 = vsel %vm1258_vm2, %v1924_v8, 0.0  ;;  %v1928_v8 = vmul.f32 %v1800_v23, %v1800_v23  ;;  %v1804_v23 = vsub.f32 %v5566_v6, %v5431_v29  ;;  %v5582_v6 = vld [vmem:[%s7897_s5 + $0xc0] sm:$0xff] }
 0x21c   :  { %8015 = vst [vmem:[#allocation47_spill] sm:$0xff] %v5582_v6  ;;  %v1872_v60 = vsub.f32 %v5166_v15, %v5431_v29  ;;  %v8039_v15 = vld [vmem:[#allocation2_spill] sm:$0xff] }
 0x21d   :  { %v2064_v59 = vadd.f32 %v2063_v38, %v2062_v51  ;;  %v2067_v51 = vsel %vm1258_vm2, %v1925_v58, 0.0  ;;  %v1929_v58 = vmul.f32 %v1801_v20, %v1801_v20  ;;  %v1805_v20 = vsub.f32 %v5574_v14, %v5431_v29  ;;  %v5590_v14 = vld [vmem:[%s7897_s5 + $0xc8] sm:$0xff] }
 0x21e   :  { %8016 = vst [vmem:[#allocation48_spill] sm:$0xff] %v5590_v14 }
 0x21f   :  { %v2066_v34 = vadd.f32 %v2065_v44, %v2064_v59  ;;  %v2069_v59 = vsel %vm1258_vm2, %v1926_v3, 0.0  ;;  %v1930_v3 = vmul.f32 %v1802_v0, %v1802_v0  ;;  %v1806_v0 = vsub.f32 %v5582_v6, %v5431_v29  ;;  %v5598_v6 = vld [vmem:[%s7897_s5 + $0xd0] sm:$0xff] }
 0x220   :  { %8017 = vst [vmem:[#allocation49_spill] sm:$0xff] %v5598_v6 }
 0x221   :  { %v2068_v38 = vadd.f32 %v2067_v51, %v2066_v34  ;;  %v2071_v34 = vsel %vm1258_vm2, %v1927_v54, 0.0  ;;  %v1931_v54 = vmul.f32 %v1803_v22, %v1803_v22  ;;  %v1807_v22 = vsub.f32 %v5590_v14, %v5431_v29  ;;  %v5606_v14 = vld [vmem:[%s7897_s5 + $0xd8] sm:$0xff] }
 0x222   :  { %8018 = vst [vmem:[#allocation50_spill] sm:$0xff] %v5606_v14 }
 0x223   :  { %v2070_v44 = vadd.f32 %v2069_v59, %v2068_v38  ;;  %v2073_v38 = vsel %vm1258_vm2, %v1928_v8, 0.0  ;;  %v1932_v8 = vmul.f32 %v1804_v23, %v1804_v23  ;;  %v1808_v23 = vsub.f32 %v5598_v6, %v5431_v29  ;;  %v5614_v6 = vld [vmem:[%s7897_s5 + $0xe0] sm:$0xff] }
 0x224   :  { %8019 = vst [vmem:[#allocation51_spill] sm:$0xff] %v5614_v6 }
 0x225   :  { %v2072_v51 = vadd.f32 %v2071_v34, %v2070_v44  ;;  %v2075_v44 = vsel %vm1258_vm2, %v1929_v58, 0.0  ;;  %v1933_v58 = vmul.f32 %v1805_v20, %v1805_v20  ;;  %v1809_v20 = vsub.f32 %v5606_v14, %v5431_v29  ;;  %v5622_v14 = vld [vmem:[%s7897_s5 + $0xe8] sm:$0xff] }
 0x226   :  { %8020 = vst [vmem:[#allocation52_spill] sm:$0xff] %v5622_v14 }
 0x227   :  { %v2074_v59 = vadd.f32 %v2073_v38, %v2072_v51  ;;  %v2077_v51 = vsel %vm1258_vm2, %v1930_v3, 0.0  ;;  %v1934_v3 = vmul.f32 %v1806_v0, %v1806_v0  ;;  %v1810_v0 = vsub.f32 %v5614_v6, %v5431_v29  ;;  %v5630_v6 = vld [vmem:[%s7897_s5 + $0xf0] sm:$0xff] }
 0x228   :  { %8021 = vst [vmem:[#allocation53_spill] sm:$0xff] %v5630_v6 }
 0x229   :  { %v2076_v34 = vadd.f32 %v2075_v44, %v2074_v59  ;;  %v2079_v59 = vsel %vm1258_vm2, %v1931_v54, 0.0  ;;  %v1935_v54 = vmul.f32 %v1807_v22, %v1807_v22  ;;  %v1811_v22 = vsub.f32 %v5622_v14, %v5431_v29  ;;  %v5638_v14 = vld [vmem:[%s7897_s5 + $0xf8] sm:$0xff] }
 0x22a   :  { %8022 = vst [vmem:[#allocation54_spill] sm:$0xff] %v5638_v14 }
 0x22b   :  { %v2078_v38 = vadd.f32 %v2077_v51, %v2076_v34  ;;  %v2081_v34 = vsel %vm1258_vm2, %v1932_v8, 0.0  ;;  %v1936_v8 = vmul.f32 %v1808_v23, %v1808_v23  ;;  %v1812_v23 = vsub.f32 %v5630_v6, %v5431_v29  ;;  %v5646_v6 = vld [vmem:[%s7897_s5 + $0x100] sm:$0xff] }
 0x22c   :  { %8023 = vst [vmem:[#allocation55_spill] sm:$0xff] %v5646_v6 }
 0x22d   :  { %v2080_v44 = vadd.f32 %v2079_v59, %v2078_v38  ;;  %v2083_v38 = vsel %vm1258_vm2, %v1933_v58, 0.0  ;;  %v1937_v58 = vmul.f32 %v1809_v20, %v1809_v20  ;;  %v1813_v20 = vsub.f32 %v5638_v14, %v5431_v29  ;;  %v5654_v14 = vld [vmem:[%s7897_s5 + $0x108] sm:$0xff] }
 0x22e   :  { %8024 = vst [vmem:[#allocation56_spill] sm:$0xff] %v5654_v14 }
 0x22f   :  { %v2082_v51 = vadd.f32 %v2081_v34, %v2080_v44  ;;  %v2085_v44 = vsel %vm1258_vm2, %v1934_v3, 0.0  ;;  %v1938_v3 = vmul.f32 %v1810_v0, %v1810_v0  ;;  %v1814_v0 = vsub.f32 %v5646_v6, %v5431_v29  ;;  %v5662_v6 = vld [vmem:[%s7897_s5 + $0x110] sm:$0xff] }
 0x230   :  { %8025 = vst [vmem:[#allocation57_spill] sm:$0xff] %v5662_v6 }
 0x231   :  { %v2084_v59 = vadd.f32 %v2083_v38, %v2082_v51  ;;  %v2087_v51 = vsel %vm1258_vm2, %v1935_v54, 0.0  ;;  %v1939_v54 = vmul.f32 %v1811_v22, %v1811_v22  ;;  %v1815_v22 = vsub.f32 %v5654_v14, %v5431_v29  ;;  %v5670_v14 = vld [vmem:[%s7897_s5 + $0x118] sm:$0xff] }
 0x232   :  { %8026 = vst [vmem:[#allocation58_spill] sm:$0xff] %v5670_v14 }
 0x233   :  { %v2086_v34 = vadd.f32 %v2085_v44, %v2084_v59  ;;  %v2089_v59 = vsel %vm1258_vm2, %v1936_v8, 0.0  ;;  %v1940_v8 = vmul.f32 %v1812_v23, %v1812_v23  ;;  %v1816_v23 = vsub.f32 %v5662_v6, %v5431_v29  ;;  %v5678_v6 = vld [vmem:[%s7897_s5 + $0x120] sm:$0xff] }
 0x234   :  { %8027 = vst [vmem:[#allocation59_spill] sm:$0xff] %v5678_v6 }
 0x235   :  { %v2088_v38 = vadd.f32 %v2087_v51, %v2086_v34  ;;  %v2091_v34 = vsel %vm1258_vm2, %v1937_v58, 0.0  ;;  %v1941_v58 = vmul.f32 %v1813_v20, %v1813_v20  ;;  %v1817_v20 = vsub.f32 %v5670_v14, %v5431_v29  ;;  %v5686_v14 = vld [vmem:[%s7897_s5 + $0x128] sm:$0xff] }
 0x236   :  { %8028 = vst [vmem:[#allocation60_spill] sm:$0xff] %v5686_v14 }
 0x237   :  { %v2090_v44 = vadd.f32 %v2089_v59, %v2088_v38  ;;  %v2093_v38 = vsel %vm1258_vm2, %v1938_v3, 0.0  ;;  %v1942_v3 = vmul.f32 %v1814_v0, %v1814_v0  ;;  %v1818_v0 = vsub.f32 %v5678_v6, %v5431_v29  ;;  %v5694_v6 = vld [vmem:[%s7897_s5 + $0x130] sm:$0xff] }
 0x238   :  { %8029 = vst [vmem:[#allocation61_spill] sm:$0xff] %v5694_v6 }
 0x239   :  { %v2092_v51 = vadd.f32 %v2091_v34, %v2090_v44  ;;  %v2095_v44 = vsel %vm1258_vm2, %v1939_v54, 0.0  ;;  %v1943_v54 = vmul.f32 %v1815_v22, %v1815_v22  ;;  %v1819_v22 = vsub.f32 %v5686_v14, %v5431_v29  ;;  %v5702_v14 = vld [vmem:[%s7897_s5 + $0x138] sm:$0xff] }
 0x23a   :  { %8030 = vst [vmem:[#allocation62_spill] sm:$0xff] %v5702_v14 }
 0x23b   :  { %v2094_v59 = vadd.f32 %v2093_v38, %v2092_v51  ;;  %v2097_v51 = vsel %vm1258_vm2, %v1940_v8, 0.0  ;;  %v1944_v8 = vmul.f32 %v1816_v23, %v1816_v23  ;;  %v1820_v23 = vsub.f32 %v5694_v6, %v5431_v29  ;;  %v5710_v6 = vld [vmem:[%s7897_s5 + $0x140] sm:$0xff] }
 0x23c   :  { %8031 = vst [vmem:[#allocation63_spill] sm:$0xff] %v5710_v6 }
 0x23d   :  { %v2096_v34 = vadd.f32 %v2095_v44, %v2094_v59  ;;  %v2099_v59 = vsel %vm1258_vm2, %v1941_v58, 0.0  ;;  %v1945_v58 = vmul.f32 %v1817_v20, %v1817_v20  ;;  %v1821_v20 = vsub.f32 %v5702_v14, %v5431_v29  ;;  %v5718_v14 = vld [vmem:[%s7897_s5 + $0x148] sm:$0xff] }
 0x23e   :  { %8032 = vst [vmem:[#allocation64_spill] sm:$0xff] %v5718_v14 }
 0x23f   :  { %v2098_v38 = vadd.f32 %v2097_v51, %v2096_v34  ;;  %v2101_v34 = vsel %vm1258_vm2, %v1942_v3, 0.0  ;;  %v1946_v3 = vmul.f32 %v1818_v0, %v1818_v0  ;;  %v1822_v0 = vsub.f32 %v5710_v6, %v5431_v29  ;;  %v5726_v6 = vld [vmem:[%s7897_s5 + $0x150] sm:$0xff] }
 0x240   :  { %8033 = vst [vmem:[#allocation65_spill] sm:$0xff] %v5726_v6 }
 0x241   :  { %v2100_v44 = vadd.f32 %v2099_v59, %v2098_v38  ;;  %v2103_v38 = vsel %vm1258_vm2, %v1943_v54, 0.0  ;;  %v1947_v54 = vmul.f32 %v1819_v22, %v1819_v22  ;;  %v1823_v22 = vsub.f32 %v5718_v14, %v5431_v29  ;;  %v5734_v14 = vld [vmem:[%s7897_s5 + $0x158] sm:$0xff] }
 0x242   :  { %8034 = vst [vmem:[#allocation66_spill] sm:$0xff] %v5734_v14 }
 0x243   :  { %v2102_v51 = vadd.f32 %v2101_v34, %v2100_v44  ;;  %v2105_v44 = vsel %vm1258_vm2, %v1944_v8, 0.0  ;;  %v1948_v8 = vmul.f32 %v1820_v23, %v1820_v23  ;;  %v1824_v23 = vsub.f32 %v5726_v6, %v5431_v29  ;;  %v5742_v6 = vld [vmem:[%s7897_s5 + $0x160] sm:$0xff] }
 0x244   :  { %8035 = vst [vmem:[#allocation67_spill] sm:$0xff] %v5742_v6 }
 0x245   :  { %v2104_v59 = vadd.f32 %v2103_v38, %v2102_v51  ;;  %v2107_v51 = vsel %vm1258_vm2, %v1945_v58, 0.0  ;;  %v1949_v58 = vmul.f32 %v1821_v20, %v1821_v20  ;;  %v1825_v20 = vsub.f32 %v5734_v14, %v5431_v29  ;;  %v5750_v14 = vld [vmem:[%s7897_s5 + $0x168] sm:$0xff] }
 0x246   :  { %8036 = vst [vmem:[#allocation68_spill] sm:$0xff] %v5750_v14 }
 0x247   :  { %v2106_v34 = vadd.f32 %v2105_v44, %v2104_v59  ;;  %v2109_v59 = vsel %vm1258_vm2, %v1946_v3, 0.0  ;;  %v1950_v3 = vmul.f32 %v1822_v0, %v1822_v0  ;;  %v1826_v0 = vsub.f32 %v5742_v6, %v5431_v29  ;;  %v5758_v6 = vld [vmem:[%s7897_s5 + $0x170] sm:$0xff] }
 0x248   :  { %8037 = vst [vmem:[#allocation69_spill] sm:$0xff] %v5758_v6 }
 0x249   :  { %v2108_v38 = vadd.f32 %v2107_v51, %v2106_v34  ;;  %v2111_v34 = vsel %vm1258_vm2, %v1947_v54, 0.0  ;;  %v1951_v54 = vmul.f32 %v1823_v22, %v1823_v22  ;;  %v1827_v22 = vsub.f32 %v5750_v14, %v5431_v29  ;;  %v5766_v14 = vld [vmem:[%s7897_s5 + $0x178] sm:$0xff] }
 0x24a   :  { %8038 = vst [vmem:[#allocation70_spill] sm:$0xff] %v5766_v14 }
 0x24b   :  { %v2110_v44 = vadd.f32 %v2109_v59, %v2108_v38  ;;  %v2113_v38 = vsel %vm1258_vm2, %v1948_v8, 0.0  ;;  %v1952_v8 = vmul.f32 %v1824_v23, %v1824_v23  ;;  %v1828_v23 = vsub.f32 %v5758_v6, %v5431_v29 }
 0x24d   :  { %v2112_v51 = vadd.f32 %v2111_v34, %v2110_v44  ;;  %v2115_v44 = vsel %vm1258_vm2, %v1949_v58, 0.0  ;;  %v1953_v58 = vmul.f32 %v1825_v20, %v1825_v20  ;;  %v1829_v20 = vsub.f32 %v5766_v14, %v5431_v29 }
 0x24e   :  { %v1956_v6 = vmul.f32 %v1828_v23, %v1828_v23  ;;  %v1958_v14 = vmul.f32 %v1830_v35, %v1830_v35  ;;  %v1961_v35 = vmul.f32 %v1833_v48, %v1833_v48 }
 0x24f   :  { %v2114_v59 = vadd.f32 %v2113_v38, %v2112_v51  ;;  %v2117_v51 = vsel %vm1258_vm2, %v1950_v3, 0.0  ;;  %v1954_v3 = vmul.f32 %v1826_v0, %v1826_v0 }
 0x251   :  { %v2116_v34 = vadd.f32 %v2115_v44, %v2114_v59  ;;  %v2119_v59 = vsel %vm1258_vm2, %v1951_v54, 0.0  ;;  %v1955_v54 = vmul.f32 %v1827_v22, %v1827_v22  ;;  %v2125_v0 = vsel %vm1258_vm2, %v1954_v3, 0.0 }
 0x252   :  { %v1832_v22 = vsub.f32 %v4786_v62, %v5431_v29  ;;  %v1835_v62 = vsub.f32 %v4815_v12, %v5431_v29  ;;  %v1838_v12 = vsub.f32 %v4887_v41, %v5431_v29  ;;  %v1841_v41 = vsub.f32 %v4912_v56, %v5431_v29 }
 0x253   :  { %v2118_v38 = vadd.f32 %v2117_v51, %v2116_v34  ;;  %v2121_v34 = vsel %vm1258_vm2, %v1952_v8, 0.0  ;;  %v2127_v46 = vsel %vm1258_vm2, %v1955_v54, 0.0  ;;  %v1844_v56 = vsub.f32 %v4969_v17, %v5431_v29 }
 0x254   :  { %v1847_v17 = vsub.f32 %v4993_v24, %v5431_v29  ;;  %v1850_v24 = vsub.f32 %v5012_v33, %v5431_v29  ;;  %v1853_v33 = vsub.f32 %v5035_v45, %v5431_v29  ;;  %v1856_v45 = vsub.f32 %v5054_v55, %v5431_v29 }
 0x255   :  { %v2120_v44 = vadd.f32 %v2119_v59, %v2118_v38  ;;  %v2123_v38 = vsel %vm1258_vm2, %v1953_v58, 0.0  ;;  %v2129_v58 = vsel %vm1258_vm2, %v1956_v6, 0.0  ;;  %v1859_v55 = vsub.f32 %v5077_v7, %v5431_v29 }
 0x256   :  { %v1862_v7 = vsub.f32 %v5096_v21, %v5431_v29  ;;  %v1865_v21 = vsub.f32 %v5119_v36, %v5431_v29  ;;  %v1868_v36 = vsub.f32 %v5138_v52, %v5431_v29  ;;  %v1871_v52 = vsub.f32 %v5161_v11, %v5431_v29 }
 0x257   :  { %v2122_v51 = vadd.f32 %v2121_v34, %v2120_v44  ;;  %v1831_v44 = vsub.f32 %v4747_v47, %v5431_v29  ;;  %v1957_v34 = vmul.f32 %v1829_v20, %v1829_v20  ;;  %v1834_v47 = vsub.f32 %v4820_v13, %v5431_v29 }
 0x258   :  { %v1960_v20 = vmul.f32 %v1832_v22, %v1832_v22  ;;  %v1837_v13 = vsub.f32 %v4849_v26, %v5431_v29  ;;  %v1964_v22 = vmul.f32 %v1836_v61, %v1836_v61  ;;  %v1840_v26 = vsub.f32 %v4917_v57, %v5431_v29 }
 0x259   :  { %v2124_v59 = vadd.f32 %v2123_v38, %v2122_v51  ;;  %v1959_v23 = vmul.f32 %v1831_v44, %v1831_v44  ;;  %v2131_v3 = vsel %vm1258_vm2, %v1957_v34, 0.0  ;;  %v1963_v44 = vmul.f32 %v1835_v62, %v1835_v62 }
 0x25a   :  { %v1965_v48 = vmul.f32 %v1837_v13, %v1837_v13  ;;  %v1843_v57 = vsub.f32 %v4942_v4, %v5431_v29  ;;  %v1969_v61 = vmul.f32 %v1841_v41, %v1841_v41  ;;  %v1846_v4 = vsub.f32 %v4974_v19, %v5431_v29 }
 0x25b   :  { %v2126_v8 = vadd.f32 %v2125_v0, %v2124_v59  ;;  %v1962_v59 = vmul.f32 %v1834_v47, %v1834_v47  ;;  %v2137_v0 = vsel %vm1258_vm2, %v1960_v20, 0.0  ;;  %v2145_v47 = vsel %vm1258_vm2, %v1964_v22, 0.0 }
 0x25c   :  { %v1972_v22 = vmul.f32 %v1844_v56, %v1844_v56  ;;  %v1849_v19 = vsub.f32 %v5007_v31, %v5431_v29  ;;  %v1852_v31 = vsub.f32 %v5026_v39, %v5431_v29  ;;  %v1855_v39 = vsub.f32 %v5049_v53, %v5431_v29 }
 0x25d   :  { %v2128_v43 = vadd.f32 %v2127_v46, %v2126_v8  ;;  %v2133_v46 = vsel %vm1258_vm2, %v1958_v14, 0.0  ;;  %v2139_v14 = vsel %vm1258_vm2, %v1961_v35, 0.0  ;;  %v1968_v35 = vmul.f32 %v1840_v26, %v1840_v26 }
 0x25e   :  { %v2161_v26 = vsel %vm1258_vm2, %v1972_v22, 0.0  ;;  %v1858_v53 = vsub.f32 %v5068_v1, %v5431_v29  ;;  %v1861_v1 = vsub.f32 %v5091_v18, %v5431_v29  ;;  %v1864_v18 = vsub.f32 %v5110_v30, %v5431_v29 }
 0x25f   :  { %v2130_v51 = vadd.f32 %v2129_v58, %v2128_v43  ;;  %v2135_v43 = vsel %vm1258_vm2, %v1959_v23, 0.0  ;;  %v2141_v58 = vsel %vm1258_vm2, %v1962_v59, 0.0  ;;  %v2143_v23 = vsel %vm1258_vm2, %v1963_v44, 0.0 }
 0x260   :  { %v2153_v13 = vsel %vm1258_vm2, %v1968_v35, 0.0  ;;  %v1867_v30 = vsub.f32 %v5133_v50, %v5431_v29  ;;  %v1870_v50 = vsub.f32 %v5152_v2, %v5431_v29  ;;  %v1873_v2 = vsub.f32 %v5175_v25, %v5431_v29  ;;  %v8040_v25 = vld [vmem:[#allocation3_spill] sm:$0xff] }
 0x261   :  { %v2132_v38 = vadd.f32 %v2131_v3, %v2130_v51  ;;  %v1874_v11 = vsub.f32 %v5180_v32, %v5431_v29  ;;  %v8041_v32 = vld [vmem:[#allocation4_spill] sm:$0xff] }
 0x263   :  { %v2134_v54 = vadd.f32 %v2133_v46, %v2132_v38  ;;  %v1966_v38 = vmul.f32 %v1838_v12, %v1838_v12  ;;  %v1967_v46 = vmul.f32 %v1839_v27, %v1839_v27  ;;  %v1973_v27 = vmul.f32 %v1845_v5, %v1845_v5 }
 0x264   :  { %v1981_v5 = vmul.f32 %v1853_v33, %v1853_v33 }
 0x265   :  { %v2136_v6 = vadd.f32 %v2135_v43, %v2134_v54  ;;  %v2147_v54 = vsel %vm1258_vm2, %v1965_v48, 0.0  ;;  %v2149_v43 = vsel %vm1258_vm2, %v1966_v38, 0.0  ;;  %v2151_v59 = vsel %vm1258_vm2, %v1967_v46, 0.0 }
 0x266   :  { %v1976_v46 = vmul.f32 %v1848_v16, %v1848_v16  ;;  %v1985_v16 = vmul.f32 %v1857_v49, %v1857_v49  ;;  %v1997_v49 = vmul.f32 %v1869_v42, %v1869_v42 }
 0x267   :  { %v2138_v8 = vadd.f32 %v2137_v0, %v2136_v6 }
 0x269   :  { %v2140_v34 = vadd.f32 %v2139_v14, %v2138_v8  ;;  %v1970_v8 = vmul.f32 %v1842_v40, %v1842_v40  ;;  %v1971_v14 = vmul.f32 %v1843_v57, %v1843_v57  ;;  %v1977_v40 = vmul.f32 %v1849_v19, %v1849_v19 }
 0x26a   :  { %v2169_v57 = vsel %vm1258_vm2, %v1976_v46, 0.0  ;;  %v1988_v46 = vmul.f32 %v1860_v63, %v1860_v63  ;;  %v1875_v63 = vsub.f32 %v8039_v15, %v5431_v29 }
 0x26b   :  { %v2142_v51 = vadd.f32 %v2141_v58, %v2140_v34  ;;  %v2155_v34 = vsel %vm1258_vm2, %v1969_v61, 0.0  ;;  %v2157_v58 = vsel %vm1258_vm2, %v1970_v8, 0.0  ;;  %v2159_v48 = vsel %vm1258_vm2, %v1971_v14, 0.0 }
 0x26c   :  { %v1980_v8 = vmul.f32 %v1852_v31, %v1852_v31  ;;  %v2193_v31 = vsel %vm1258_vm2, %v1988_v46, 0.0  ;;  %v2003_v46 = vmul.f32 %v1875_v63, %v1875_v63 }
 0x26d   :  { %v2144_v3 = vadd.f32 %v2143_v23, %v2142_v51 }
 0x26f   :  { %v2146_v20 = vadd.f32 %v2145_v47, %v2144_v3  ;;  %v1974_v3 = vmul.f32 %v1846_v4, %v1846_v4  ;;  %v1975_v47 = vmul.f32 %v1847_v17, %v1847_v17  ;;  %v2177_v4 = vsel %vm1258_vm2, %v1980_v8, 0.0 }
 0x271   :  { %v2148_v62 = vadd.f32 %v2147_v54, %v2146_v20  ;;  %v2163_v20 = vsel %vm1258_vm2, %v1973_v27, 0.0  ;;  %v2165_v54 = vsel %vm1258_vm2, %v1974_v3, 0.0  ;;  %v2167_v35 = vsel %vm1258_vm2, %v1975_v47, 0.0 }
 0x272   :  { %v1984_v27 = vmul.f32 %v1856_v45, %v1856_v45 }
 0x273   :  { %v2150_v6 = vadd.f32 %v2149_v43, %v2148_v62 }
 0x274   :  { %v2185_v19 = vsel %vm1258_vm2, %v1984_v27, 0.0 }
 0x275   :  { %v2152_v0 = vadd.f32 %v2151_v59, %v2150_v6  ;;  %v1978_v6 = vmul.f32 %v1850_v24, %v1850_v24  ;;  %v1979_v59 = vmul.f32 %v1851_v10, %v1851_v10  ;;  %v1989_v10 = vmul.f32 %v1861_v1, %v1861_v1 }
 0x276   :  { %v1876_v1 = vsub.f32 %v8040_v25, %v5431_v29 }
 0x277   :  { %v2154_v44 = vadd.f32 %v2153_v13, %v2152_v0  ;;  %v2171_v0 = vsel %vm1258_vm2, %v1977_v40, 0.0  ;;  %v2173_v13 = vsel %vm1258_vm2, %v1978_v6, 0.0  ;;  %v2175_v14 = vsel %vm1258_vm2, %v1979_v59, 0.0 }
 0x278   :  { %v1992_v59 = vmul.f32 %v1864_v18, %v1864_v18 }
 0x279   :  { %v2156_v12 = vadd.f32 %v2155_v34, %v2154_v44 }
 0x27b   :  { %v2158_v51 = vadd.f32 %v2157_v58, %v2156_v12  ;;  %v1982_v12 = vmul.f32 %v1854_v37, %v1854_v37  ;;  %v1983_v58 = vmul.f32 %v1855_v39, %v1855_v39  ;;  %v1993_v37 = vmul.f32 %v1865_v21, %v1865_v21 }
 0x27c   :  { %v2201_v39 = vsel %vm1258_vm2, %v1992_v59, 0.0  ;;  %v2223_v21 = vsel %vm1258_vm2, %v2003_v46, 0.0  ;;  %v8054_v46 = vld [vmem:[#allocation17_spill] sm:$0xff] }
 0x27d   :  { %v2160_v23 = vadd.f32 %v2159_v48, %v2158_v51  ;;  %v2179_v51 = vsel %vm1258_vm2, %v1981_v5, 0.0  ;;  %v2181_v48 = vsel %vm1258_vm2, %v1982_v12, 0.0  ;;  %v2183_v3 = vsel %vm1258_vm2, %v1983_v58, 0.0 }
 0x27e   :  { %v1996_v12 = vmul.f32 %v1868_v36, %v1868_v36  ;;  %v8046_v36 = vld [vmem:[#allocation9_spill] sm:$0xff] }
 0x27f   :  { %v2162_v38 = vadd.f32 %v2161_v26, %v2160_v23 }
 0x281   :  { %v2164_v41 = vadd.f32 %v2163_v20, %v2162_v38  ;;  %v1986_v38 = vmul.f32 %v1858_v53, %v1858_v53  ;;  %v1987_v20 = vmul.f32 %v1859_v55, %v1859_v55  ;;  %v2209_v53 = vsel %vm1258_vm2, %v1996_v12, 0.0 }
 0x283   :  { %v2166_v62 = vadd.f32 %v2165_v54, %v2164_v41  ;;  %v2187_v41 = vsel %vm1258_vm2, %v1985_v16, 0.0  ;;  %v2189_v54 = vsel %vm1258_vm2, %v1986_v38, 0.0  ;;  %v2191_v40 = vsel %vm1258_vm2, %v1987_v20, 0.0 }
 0x284   :  { %v2000_v16 = vmul.f32 %v1872_v60, %v1872_v60  ;;  %v2001_v38 = vmul.f32 %v1873_v2, %v1873_v2  ;;  %v2002_v20 = vmul.f32 %v1874_v11, %v1874_v11  ;;  %v8050_v2 = vld [vmem:[#allocation13_spill] sm:$0xff] }
 0x285   :  { %v2168_v43 = vadd.f32 %v2167_v35, %v2166_v62 }
 0x287   :  { %v2170_v61 = vadd.f32 %v2169_v57, %v2168_v43  ;;  %v1990_v43 = vmul.f32 %v1862_v7, %v1862_v7  ;;  %v1991_v57 = vmul.f32 %v1863_v9, %v1863_v9  ;;  %v1877_v7 = vsub.f32 %v8041_v32, %v5431_v29  ;;  %v8042_v9 = vld [vmem:[#allocation5_spill] sm:$0xff] }
 0x289   :  { %v2172_v56 = vadd.f32 %v2171_v0, %v2170_v61  ;;  %v2195_v61 = vsel %vm1258_vm2, %v1989_v10, 0.0  ;;  %v2197_v0 = vsel %vm1258_vm2, %v1990_v43, 0.0  ;;  %v2199_v8 = vsel %vm1258_vm2, %v1991_v57, 0.0  ;;  %v8043_v43 = vld [vmem:[#allocation6_spill] sm:$0xff] }
 0x28a   :  { %v1878_v10 = vsub.f32 %v8042_v9, %v5431_v29 }
 0x28b   :  { %v2174_v44 = vadd.f32 %v2173_v13, %v2172_v56 }
 0x28d   :  { %v2176_v34 = vadd.f32 %v2175_v14, %v2174_v44  ;;  %v1994_v44 = vmul.f32 %v1866_v28, %v1866_v28  ;;  %v1995_v14 = vmul.f32 %v1867_v30, %v1867_v30  ;;  %v2006_v28 = vmul.f32 %v1878_v10, %v1878_v10 }
 0x28f   :  { %v2178_v22 = vadd.f32 %v2177_v4, %v2176_v34  ;;  %v2203_v34 = vsel %vm1258_vm2, %v1993_v37, 0.0  ;;  %v2205_v4 = vsel %vm1258_vm2, %v1994_v44, 0.0  ;;  %v2207_v58 = vsel %vm1258_vm2, %v1995_v14, 0.0  ;;  %v8047_v14 = vld [vmem:[#allocation10_spill] sm:$0xff] }
 0x290   :  { %v1882_v44 = vsub.f32 %v8046_v36, %v5431_v29 }
 0x291   :  { %v2180_v17 = vadd.f32 %v2179_v51, %v2178_v22 }
 0x293   :  { %v2182_v23 = vadd.f32 %v2181_v48, %v2180_v17  ;;  %v1998_v17 = vmul.f32 %v1870_v50, %v1870_v50  ;;  %v1999_v48 = vmul.f32 %v1871_v52, %v1871_v52  ;;  %v2010_v52 = vmul.f32 %v1882_v44, %v1882_v44 }
 0x295   :  { %v2184_v26 = vadd.f32 %v2183_v3, %v2182_v23  ;;  %v2211_v23 = vsel %vm1258_vm2, %v1997_v49, 0.0  ;;  %v2213_v3 = vsel %vm1258_vm2, %v1998_v17, 0.0 }
 0x297   :  { %v2186_v47 = vadd.f32 %v2185_v19, %v2184_v26  ;;  %v2215_v19 = vsel %vm1258_vm2, %v1999_v48, 0.0  ;;  %v1886_v48 = vsub.f32 %v8050_v2, %v5431_v29 }
 0x299   :  { %v2188_v24 = vadd.f32 %v2187_v41, %v2186_v47  ;;  %v2217_v41 = vsel %vm1258_vm2, %v2000_v16, 0.0  ;;  %v8051_v16 = vld [vmem:[#allocation14_spill] sm:$0xff] }
 0x29b   :  { %v2190_v62 = vadd.f32 %v2189_v54, %v2188_v24  ;;  %v2219_v54 = vsel %vm1258_vm2, %v2001_v38, 0.0  ;;  %v8052_v38 = vld [vmem:[#allocation15_spill] sm:$0xff] }
 0x29d   :  { %v2192_v35 = vadd.f32 %v2191_v40, %v2190_v62  ;;  %v2004_v40 = vmul.f32 %v1876_v1, %v1876_v1 }
 0x29f   :  { %v2194_v6 = vadd.f32 %v2193_v31, %v2192_v35  ;;  %v2221_v35 = vsel %vm1258_vm2, %v2002_v20, 0.0  ;;  %v1879_v31 = vsub.f32 %v8043_v43, %v5431_v29  ;;  %v2225_v59 = vsel %vm1258_vm2, %v2004_v40, 0.0  ;;  %v8053_v20 = vld [vmem:[#allocation16_spill] sm:$0xff]  ;;  %v8055_v40 = vld [vmem:[#allocation18_spill] sm:$0xff] }
 0x2a1   :  { %v2196_v33 = vadd.f32 %v2195_v61, %v2194_v6  ;;  %v2005_v6 = vmul.f32 %v1877_v7, %v1877_v7  ;;  %v8044_v61 = vld [vmem:[#allocation7_spill] sm:$0xff]  ;;  %v2007_v37 = vmul.f32 %v1879_v31, %v1879_v31 }
 0x2a3   :  { %v2198_v56 = vadd.f32 %v2197_v0, %v2196_v33  ;;  %v1880_v33 = vsub.f32 %v8044_v61, %v5431_v29  ;;  %v2231_v50 = vsel %vm1258_vm2, %v2007_v37, 0.0  ;;  %v8058_v37 = vld [vmem:[#allocation21_spill] sm:$0xff] }
 0x2a5   :  { %v2200_v13 = vadd.f32 %v2199_v8, %v2198_v56  ;;  %v8045_v56 = vld [vmem:[#allocation8_spill] sm:$0xff]  ;;  %v2227_v8 = vsel %vm1258_vm2, %v2005_v6, 0.0  ;;  %v8056_v6 = vld [vmem:[#allocation19_spill] sm:$0xff] }
 0x2a6   :  { %v1881_v30 = vsub.f32 %v8045_v56, %v5431_v29 }
 0x2a7   :  { %v2202_v5 = vadd.f32 %v2201_v39, %v2200_v13  ;;  %v2008_v39 = vmul.f32 %v1880_v33, %v1880_v33 }
 0x2a9   :  { %v2204_v45 = vadd.f32 %v2203_v34, %v2202_v5  ;;  %v2229_v5 = vsel %vm1258_vm2, %v2006_v28, 0.0  ;;  %v1883_v34 = vsub.f32 %v8047_v14, %v5431_v29  ;;  %v2233_v49 = vsel %vm1258_vm2, %v2008_v39, 0.0  ;;  %v8057_v28 = vld [vmem:[#allocation20_spill] sm:$0xff]  ;;  %v8059_v39 = vld [vmem:[#allocation22_spill] sm:$0xff] }
 0x2ab   :  { %v2206_v22 = vadd.f32 %v2205_v4, %v2204_v45  ;;  %v2009_v45 = vmul.f32 %v1881_v30, %v1881_v30  ;;  %v8048_v4 = vld [vmem:[#allocation11_spill] sm:$0xff]  ;;  %v2011_v17 = vmul.f32 %v1883_v34, %v1883_v34 }
 0x2ad   :  { %v2208_v51 = vadd.f32 %v2207_v58, %v2206_v22  ;;  %v1884_v22 = vsub.f32 %v8048_v4, %v5431_v29  ;;  %v2239_v15 = vsel %vm1258_vm2, %v2011_v17, 0.0  ;;  %v8062_v17 = vld [vmem:[#allocation25_spill] sm:$0xff] }
 0x2af   :  { %v2210_v27 = vadd.f32 %v2209_v53, %v2208_v51  ;;  %v8049_v51 = vld [vmem:[#allocation12_spill] sm:$0xff]  ;;  %v2235_v53 = vsel %vm1258_vm2, %v2009_v45, 0.0  ;;  %v8060_v45 = vld [vmem:[#allocation23_spill] sm:$0xff] }
 0x2b0   :  { %v1885_v60 = vsub.f32 %v8049_v51, %v5431_v29 }
 0x2b1   :  { %v2212_v55 = vadd.f32 %v2211_v23, %v2210_v27  ;;  %v2012_v23 = vmul.f32 %v1884_v22, %v1884_v22 }
 0x2b3   :  { %v2214_v26 = vadd.f32 %v2213_v3, %v2212_v55  ;;  %v2237_v55 = vsel %vm1258_vm2, %v2010_v52, 0.0  ;;  %v1887_v3 = vsub.f32 %v8051_v16, %v5431_v29  ;;  %v2241_v25 = vsel %vm1258_vm2, %v2012_v23, 0.0  ;;  %v8061_v52 = vld [vmem:[#allocation24_spill] sm:$0xff]  ;;  %v8063_v23 = vld [vmem:[#allocation26_spill] sm:$0xff] }
 0x2b5   :  { %v2216_v47 = vadd.f32 %v2215_v19, %v2214_v26  ;;  %v2013_v26 = vmul.f32 %v1885_v60, %v1885_v60  ;;  %v1888_v19 = vsub.f32 %v8052_v38, %v5431_v29 }
 0x2b7   :  { %v2218_v24 = vadd.f32 %v2217_v41, %v2216_v47  ;;  %v2014_v47 = vmul.f32 %v1886_v48, %v1886_v48  ;;  %v1889_v41 = vsub.f32 %v8053_v20, %v5431_v29  ;;  %v2243_v32 = vsel %vm1258_vm2, %v2013_v26, 0.0  ;;  %v8064_v26 = vld [vmem:[#allocation27_spill] sm:$0xff] }
 0x2b9   :  { %v2220_v62 = vadd.f32 %v2219_v54, %v2218_v24  ;;  %v2015_v24 = vmul.f32 %v1887_v3, %v1887_v3  ;;  %v1890_v54 = vsub.f32 %v8054_v46, %v5431_v29  ;;  %v2245_v9 = vsel %vm1258_vm2, %v2014_v47, 0.0  ;;  %v8065_v47 = vld [vmem:[#allocation28_spill] sm:$0xff] }
 0x2bb   :  { %v2222_v18 = vadd.f32 %v2221_v35, %v2220_v62  ;;  %v2016_v62 = vmul.f32 %v1888_v19, %v1888_v19  ;;  %v1891_v35 = vsub.f32 %v8055_v40, %v5431_v29  ;;  %v2247_v43 = vsel %vm1258_vm2, %v2015_v24, 0.0  ;;  %v8066_v24 = vld [vmem:[#allocation29_spill] sm:$0xff] }
 0x2bd   :  { %v2224_v57 = vadd.f32 %v2223_v21, %v2222_v18  ;;  %v2017_v18 = vmul.f32 %v1889_v41, %v1889_v41  ;;  %v1892_v21 = vsub.f32 %v8056_v6, %v5431_v29  ;;  %v2249_v61 = vsel %vm1258_vm2, %v2016_v62, 0.0  ;;  %v8067_v62 = vld [vmem:[#allocation30_spill] sm:$0xff] }
 0x2bf   :  { %v2226_v0 = vadd.f32 %v2225_v59, %v2224_v57  ;;  %v2018_v57 = vmul.f32 %v1890_v54, %v1890_v54  ;;  %v1893_v59 = vsub.f32 %v8057_v28, %v5431_v29  ;;  %v2251_v56 = vsel %vm1258_vm2, %v2017_v18, 0.0  ;;  %v8068_v18 = vld [vmem:[#allocation31_spill] sm:$0xff] }
 0x2c1   :  { %v2228_v13 = vadd.f32 %v2227_v8, %v2226_v0  ;;  %v2019_v0 = vmul.f32 %v1891_v35, %v1891_v35  ;;  %v1894_v8 = vsub.f32 %v8058_v37, %v5431_v29  ;;  %v2253_v36 = vsel %vm1258_vm2, %v2018_v57, 0.0  ;;  %v8069_v57 = vld [vmem:[#allocation32_spill] sm:$0xff] }
 0x2c3   :  { %v2230_v42 = vadd.f32 %v2229_v5, %v2228_v13  ;;  %v2020_v13 = vmul.f32 %v1892_v21, %v1892_v21  ;;  %v1895_v5 = vsub.f32 %v8059_v39, %v5431_v29  ;;  %v2255_v14 = vsel %vm1258_vm2, %v2019_v0, 0.0  ;;  %v8070_v0 = vld [vmem:[#allocation33_spill] sm:$0xff] }
 0x2c5   :  { %v2232_v12 = vadd.f32 %v2231_v50, %v2230_v42  ;;  %v2021_v42 = vmul.f32 %v1893_v59, %v1893_v59  ;;  %v1896_v50 = vsub.f32 %v8060_v45, %v5431_v29  ;;  %v2257_v4 = vsel %vm1258_vm2, %v2020_v13, 0.0  ;;  %v8071_v13 = vld [vmem:[#allocation34_spill] sm:$0xff] }
 0x2c7   :  { %v2234_v58 = vadd.f32 %v2233_v49, %v2232_v12  ;;  %v2022_v12 = vmul.f32 %v1894_v8, %v1894_v8  ;;  %v1897_v49 = vsub.f32 %v8061_v52, %v5431_v29  ;;  %v2259_v51 = vsel %vm1258_vm2, %v2021_v42, 0.0  ;;  %v8072_v42 = vld [vmem:[#allocation35_spill] sm:$0xff] }
 0x2c9   :  { %v2236_v27 = vadd.f32 %v2235_v53, %v2234_v58  ;;  %v2023_v58 = vmul.f32 %v1895_v5, %v1895_v5  ;;  %v1898_v53 = vsub.f32 %v8062_v17, %v5431_v29  ;;  %v2261_v2 = vsel %vm1258_vm2, %v2022_v12, 0.0  ;;  %v8073_v12 = vld [vmem:[#allocation36_spill] sm:$0xff] }
 0x2cb   :  { %v2238_v11 = vadd.f32 %v2237_v55, %v2236_v27  ;;  %v2024_v27 = vmul.f32 %v1896_v50, %v1896_v50  ;;  %v1899_v55 = vsub.f32 %v8063_v23, %v5431_v29  ;;  %v2263_v16 = vsel %vm1258_vm2, %v2023_v58, 0.0 }
 0x2cd   :  { %v2240_v63 = vadd.f32 %v2239_v15, %v2238_v11  ;;  %v2025_v11 = vmul.f32 %v1897_v49, %v1897_v49  ;;  %v1900_v15 = vsub.f32 %v8064_v26, %v5431_v29  ;;  %v2265_v38 = vsel %vm1258_vm2, %v2024_v27, 0.0 }
 0x2cf   :  { %v2242_v1 = vadd.f32 %v2241_v25, %v2240_v63  ;;  %v2026_v63 = vmul.f32 %v1898_v53, %v1898_v53  ;;  %v1901_v25 = vsub.f32 %v8065_v47, %v5431_v29  ;;  %v2267_v20 = vsel %vm1258_vm2, %v2025_v11, 0.0 }
 0x2d1   :  { %v2244_v7 = vadd.f32 %v2243_v32, %v2242_v1  ;;  %v2027_v1 = vmul.f32 %v1899_v55, %v1899_v55  ;;  %v1902_v32 = vsub.f32 %v8066_v24, %v5431_v29  ;;  %v2269_v46 = vsel %vm1258_vm2, %v2026_v63, 0.0 }
 0x2d2   :  { %v2315_v24 = vlaneseq }
 0x2d3   :  { %v2246_v10 = vadd.f32 %v2245_v9, %v2244_v7  ;;  %v2028_v7 = vmul.f32 %v1900_v15, %v1900_v15  ;;  %v1903_v9 = vsub.f32 %v8067_v62, %v5431_v29  ;;  %v2271_v40 = vsel %vm1258_vm2, %v2027_v1, 0.0 }
 0x2d5   :  { %v2248_v31 = vadd.f32 %v2247_v43, %v2246_v10  ;;  %v2029_v10 = vmul.f32 %v1901_v25, %v1901_v25  ;;  %v1904_v43 = vsub.f32 %v8068_v18, %v5431_v29  ;;  %v2273_v6 = vsel %vm1258_vm2, %v2028_v7, 0.0  ;;  %v2300_v7 = vld [vmem:[%s7898_s3] sm:$0x1] }
 0x2d6   :  { %v3386_v18 = vld [vmem:[%s7897_s5] sm:$0xff] }
 0x2d7   :  { %v2250_v33 = vadd.f32 %v2249_v61, %v2248_v31  ;;  %v2030_v31 = vmul.f32 %v1902_v32, %v1902_v32  ;;  %v1905_v61 = vsub.f32 %v8069_v57, %v5431_v29  ;;  %v2275_v28 = vsel %vm1258_vm2, %v2029_v10, 0.0  ;;  %v3389_v57 = vld [vmem:[%s7897_s5 + $0x18] sm:$0xff] }
 0x2d8   :  { %v6015_v32 = vshrl.u32 %v2315_v24, 7  ;;  %v8087_v24 = vld [vmem:[#allocation50_spill] sm:$0xff] }
 0x2d9   :  { %v2252_v30 = vadd.f32 %v2251_v56, %v2250_v33  ;;  %v2031_v33 = vmul.f32 %v1903_v9, %v1903_v9  ;;  %v1906_v56 = vsub.f32 %v8070_v0, %v5431_v29  ;;  %v2277_v37 = vsel %vm1258_vm2, %v2030_v31, 0.0  ;;  %v6024_v9 = vld [vmem:[%s7899_s4] sm:$0x1]  ;;  %v3387_v31 = vld [vmem:[%s7897_s5 + $0x8] sm:$0xff] }
 0x2db   :  { %v2254_v44 = vadd.f32 %v2253_v36, %v2252_v30  ;;  %v2032_v30 = vmul.f32 %v1904_v43, %v1904_v43  ;;  %v1907_v36 = vsub.f32 %v8071_v13, %v5431_v29  ;;  %v2279_v39 = vsel %vm1258_vm2, %v2031_v33, 0.0  ;;  %v3390_v33 = vld [vmem:[%s7897_s5 + $0x20] sm:$0xff] }
 0x2dc   :  { %v3394_v13 = vld [vmem:[%s7897_s5 + $0x40] sm:$0xff] }
 0x2dd   :  { %v2256_v34 = vadd.f32 %v2255_v14, %v2254_v44  ;;  %v2033_v44 = vmul.f32 %v1905_v61, %v1905_v61  ;;  %v1908_v14 = vsub.f32 %v8072_v42, %v5431_v29  ;;  %v2281_v45 = vsel %vm1258_vm2, %v2032_v30, 0.0 }
 0x2df   :  { %v2258_v22 = vadd.f32 %v2257_v4, %v2256_v34  ;;  %v2034_v34 = vmul.f32 %v1906_v56, %v1906_v56  ;;  %v1909_v4 = vsub.f32 %v8073_v12, %v5431_v29  ;;  %v2283_v52 = vsel %vm1258_vm2, %v2033_v44, 0.0  ;;  %v3392_v56 = vld [vmem:[%s7897_s5 + $0x30] sm:$0xff]  ;;  %v3395_v44 = vld [vmem:[%s7897_s5 + $0x48] sm:$0xff] }
 0x2e0   :  { %v2036_v58 = vmul.f32 %v1908_v14, %v1908_v14  ;;  %v3397_v14 = vld [vmem:[%s7897_s5 + $0x58] sm:$0xff]  ;;  %v3399_v12 = vld [vmem:[%s7897_s5 + $0x68] sm:$0xff] }
 0x2e1   :  { %v2260_v60 = vadd.f32 %v2259_v51, %v2258_v22  ;;  %v2035_v22 = vmul.f32 %v1907_v36, %v1907_v36  ;;  %v2285_v51 = vsel %vm1258_vm2, %v2034_v34, 0.0  ;;  %v2037_v17 = vmul.f32 %v1909_v4, %v1909_v4 }
 0x2e3   :  { %v2262_v48 = vadd.f32 %v2261_v2, %v2260_v60  ;;  %v2287_v53 = vsel %vm1258_vm2, %v2035_v22, 0.0  ;;  %v2289_v2 = vsel %vm1258_vm2, %v2036_v58, 0.0  ;;  %v2291_v23 = vsel %vm1258_vm2, %v2037_v17, 0.0  ;;  %v8074_v22 = vld [vmem:[#allocation37_spill] sm:$0xff]  ;;  %v8077_v17 = vld [vmem:[#allocation40_spill] sm:$0xff] }
 0x2e5   :  { %v2264_v3 = vadd.f32 %v2263_v16, %v2262_v48 }
 0x2e7   :  { %v2266_v19 = vadd.f32 %v2265_v38, %v2264_v3 }
 0x2e9   :  { %v2268_v41 = vadd.f32 %v2267_v20, %v2266_v19 }
 0x2eb   :  { %v2270_v54 = vadd.f32 %v2269_v46, %v2268_v41  ;;  %v7969_v46 = vsub.s32 0, %v6015_v32 }
 0x2ed   :  { %v2272_v35 = vadd.f32 %v2271_v40, %v2270_v54 }
 0x2ef   :  { %v2274_v21 = vadd.f32 %v2273_v6, %v2272_v35  ;;  %v3388_v6 = vld [vmem:[%s7897_s5 + $0x10] sm:$0xff]  ;;  %v3407_v35 = vld [vmem:[%s7897_s5 + $0x1b8] sm:$0xff] }
 0x2f1   :  { %v2276_v59 = vadd.f32 %v2275_v28, %v2274_v21 }
 0x2f3   :  { %v2278_v8 = vadd.f32 %v2277_v37, %v2276_v59  ;;  %v3391_v59 = vld [vmem:[%s7897_s5 + $0x28] sm:$0xff]  ;;  %v3393_v37 = vld [vmem:[%s7897_s5 + $0x38] sm:$0xff] }
 0x2f5   :  { %v2280_v5 = vadd.f32 %v2279_v39, %v2278_v8 }
 0x2f7   :  { %v2282_v50 = vadd.f32 %v2281_v45, %v2280_v5  ;;  %v3396_v5 = vld [vmem:[%s7897_s5 + $0x50] sm:$0xff]  ;;  %v3398_v45 = vld [vmem:[%s7897_s5 + $0x60] sm:$0xff] }
 0x2f9   :  { %v2284_v49 = vadd.f32 %v2283_v52, %v2282_v50 }
 0x2fb   :  { %v2286_v60 = vadd.f32 %v2285_v51, %v2284_v49  ;;  %v8075_v49 = vld [vmem:[#allocation38_spill] sm:$0xff]  ;;  %v8076_v51 = vld [vmem:[#allocation39_spill] sm:$0xff] }
 0x2fd   :  { %v2288_v27 = vadd.f32 %v2287_v53, %v2286_v60 }
 0x2ff   :  { %v2290_v48 = vadd.f32 %v2289_v2, %v2288_v27  ;;  %v8078_v27 = vld [vmem:[#allocation41_spill] sm:$0xff] }
 0x301   :  { %v2292_v55 = vadd.f32 %v2291_v23, %v2290_v48  ;;  %v8079_v48 = vld [vmem:[#allocation42_spill] sm:$0xff] }
 0x303   :  { %v2293_v11 = vrot.slane %v2292_v55, 4 }
 0x305   :  { %v2294_v16 = vadd.f32 %v2293_v11, %v2292_v55  ;;  %v8080_v55 = vld [vmem:[#allocation43_spill] sm:$0xff] }
 0x307   :  { %v2295_v3 = vrot.slane %v2294_v16, 2 }
 0x309   :  { %v2296_v26 = vadd.f32 %v2295_v3, %v2294_v16  ;;  %v8081_v16 = vld [vmem:[#allocation44_spill] sm:$0xff] }
 0x30b   :  { %v2297_v15 = vrot.slane %v2296_v26, 1 }
 0x30d   :  { %v2298_v63 = vadd.f32 %v2297_v15, %v2296_v26  ;;  %v8082_v26 = vld [vmem:[#allocation45_spill] sm:$0xff] }
 0x30f   :  { %v2299_v38 = vmul.f32 0.0009765625, %v2298_v63  ;;  %v8083_v63 = vld [vmem:[#allocation46_spill] sm:$0xff] }
 0x311   :  { %v2301_v19 = vadd.f32 1e-05, %v2299_v38 }
 0x313   :  { %3333 = vrsqrt.f32 %v2301_v19  ;;  %vm2304_vm3 = vcmp.eq.f32.partialorder %v2301_v19, inf  ;;  %v2307_v1 = vand.u32 2147483648, %v2301_v19  ;;  %vm2306_vm4 = vcmp.eq.f32.partialorder %v2301_v19, 0.0 }
 0x31d   :  { %v3334_v47 = vpop.eup %3333 }
 0x31e   :  { %v2303_v25 = vmul.f32 %v3334_v47, %v2301_v19 }
 0x320   :  { %v2305_v20 = vsel %vm2304_vm3, %v2301_v19, %v2303_v25  ;;  %v8084_v19 = vld [vmem:[#allocation47_spill] sm:$0xff]  ;;  %v8085_v25 = vld [vmem:[#allocation48_spill] sm:$0xff] }
 0x321   :  { %v2308_v41 = vsel %vm2306_vm4, %v2307_v1, %v2305_v20  ;;  %v8086_v20 = vld [vmem:[#allocation49_spill] sm:$0xff] }
 0x322   :  { %3335 = vrcp.f32 %v2308_v41 }
 0x32c   :  { %v3336_v54 = vpop.eup %3335 }
 0x32d   :  { %v2310_v62 = vmul.f32 %v3336_v54, %v2300_v7  ;;  %v8088_v54 = vld [vmem:[#allocation51_spill] sm:$0xff] }
 0x32f   :  { %v6027_v10 = vmul.f32 %v2310_v62, %v5431_v29  ;;  %v6031_v40 = vrot.slane %v2310_v62, %v7969_v46  ;;  %v3408_v46 = vld [vmem:[%s7897_s5 + $0x1c0] sm:$0xff] }
 0x331   :  { %v6039_v43 = vmul.f32 %v3386_v18, %v6031_v40  ;;  %v6045_v29 = vmul.f32 %v3387_v31, %v6031_v40  ;;  %v6051_v21 = vmul.f32 %v3388_v6, %v6031_v40  ;;  %v6057_v61 = vmul.f32 %v3389_v57, %v6031_v40  ;;  %v8089_v18 = vld [vmem:[#allocation52_spill] sm:$0xff]  ;;  %v8090_v6 = vld [vmem:[#allocation53_spill] sm:$0xff] }
 0x332   :  { %v6063_v28 = vmul.f32 %v3390_v33, %v6031_v40  ;;  %v6069_v0 = vmul.f32 %v3391_v59, %v6031_v40  ;;  %v6075_v30 = vmul.f32 %v3392_v56, %v6031_v40  ;;  %v6081_v8 = vmul.f32 %v3393_v37, %v6031_v40  ;;  %v8091_v33 = vld [vmem:[#allocation54_spill] sm:$0xff]  ;;  %v8092_v56 = vld [vmem:[#allocation55_spill] sm:$0xff] }
 0x333   :  { %v6087_v36 = vmul.f32 %v3394_v13, %v6031_v40  ;;  %v6093_v39 = vmul.f32 %v3395_v44, %v6031_v40  ;;  %v6099_v42 = vmul.f32 %v3396_v5, %v6031_v40  ;;  %v6105_v34 = vmul.f32 %v3397_v14, %v6031_v40  ;;  %v8093_v13 = vld [vmem:[#allocation56_spill] sm:$0xff]  ;;  %v8094_v5 = vld [vmem:[#allocation57_spill] sm:$0xff] }
 0x334   :  { %v6111_v50 = vmul.f32 %v3398_v45, %v6031_v40  ;;  %v6117_v4 = vmul.f32 %v3399_v12, %v6031_v40  ;;  %v6121_v52 = vmul.f32 %v8074_v22, %v6031_v40  ;;  %v6125_v58 = vmul.f32 %v8075_v49, %v6031_v40  ;;  %v8095_v45 = vld [vmem:[#allocation58_spill] sm:$0xff]  ;;  %v8096_v22 = vld [vmem:[#allocation59_spill] sm:$0xff] }
 0x335   :  { %v6129_v60 = vmul.f32 %v8076_v51, %v6031_v40  ;;  %v6133_v53 = vmul.f32 %v8077_v17, %v6031_v40  ;;  %v6137_v2 = vmul.f32 %v8078_v27, %v6031_v40  ;;  %v6141_v23 = vmul.f32 %v8079_v48, %v6031_v40  ;;  %v8097_v51 = vld [vmem:[#allocation60_spill] sm:$0xff]  ;;  %v8098_v27 = vld [vmem:[#allocation61_spill] sm:$0xff] }
 0x336   :  { %v6145_v11 = vmul.f32 %v8080_v55, %v6031_v40  ;;  %v6149_v3 = vmul.f32 %v8081_v16, %v6031_v40  ;;  %v6153_v15 = vmul.f32 %v8082_v26, %v6031_v40  ;;  %v6157_v38 = vmul.f32 %v8083_v63, %v6031_v40  ;;  %v8099_v55 = vld [vmem:[#allocation62_spill] sm:$0xff]  ;;  %v8100_v26 = vld [vmem:[#allocation63_spill] sm:$0xff] }
 0x337   :  { %v6161_v47 = vmul.f32 %v8084_v19, %v6031_v40  ;;  %v6165_v1 = vmul.f32 %v8085_v25, %v6031_v40  ;;  %v6169_v41 = vmul.f32 %v8086_v20, %v6031_v40  ;;  %v6173_v7 = vmul.f32 %v8087_v24, %v6031_v40  ;;  %v8101_v19 = vld [vmem:[#allocation64_spill] sm:$0xff]  ;;  %v8102_v20 = vld [vmem:[#allocation65_spill] sm:$0xff] }
 0x338   :  { %v6177_v62 = vmul.f32 %v8088_v54, %v6031_v40  ;;  %v6181_v31 = vmul.f32 %v8089_v18, %v6031_v40  ;;  %v6185_v57 = vmul.f32 %v8090_v6, %v6031_v40  ;;  %v6189_v59 = vmul.f32 %v8091_v33, %v6031_v40  ;;  %v8103_v54 = vld [vmem:[#allocation66_spill] sm:$0xff]  ;;  %v8104_v6 = vld [vmem:[#allocation67_spill] sm:$0xff] }
 0x339   :  { %v6193_v37 = vmul.f32 %v8092_v56, %v6031_v40  ;;  %v6197_v44 = vmul.f32 %v8093_v13, %v6031_v40  ;;  %v6201_v14 = vmul.f32 %v8094_v5, %v6031_v40  ;;  %v6205_v12 = vmul.f32 %v8095_v45, %v6031_v40  ;;  %v8105_v56 = vld [vmem:[#allocation68_spill] sm:$0xff]  ;;  %v8106_v5 = vld [vmem:[#allocation69_spill] sm:$0xff] }
 0x33a   :  { %v6209_v49 = vmul.f32 %v8096_v22, %v6031_v40  ;;  %v6213_v17 = vmul.f32 %v8097_v51, %v6031_v40  ;;  %v6217_v48 = vmul.f32 %v8098_v27, %v6031_v40  ;;  %v6221_v16 = vmul.f32 %v8099_v55, %v6031_v40  ;;  %v8107_v22 = vld [vmem:[#allocation70_spill] sm:$0xff] }
 0x33b   :  { %v6225_v63 = vmul.f32 %v8100_v26, %v6031_v40  ;;  %v6229_v25 = vmul.f32 %v8101_v19, %v6031_v40  ;;  %v6233_v24 = vmul.f32 %v8102_v20, %v6031_v40  ;;  %v6237_v18 = vmul.f32 %v8103_v54, %v6031_v40  ;;  %v3400_v27 = vld [vmem:[%s7897_s5 + $0x180] sm:$0xff]  ;;  %v3401_v26 = vld [vmem:[%s7897_s5 + $0x188] sm:$0xff]  ;;  %v3402_v20 = vld [vmem:[%s7897_s5 + $0x190] sm:$0xff] }
 0x33c   :  { %v6241_v33 = vmul.f32 %v8104_v6, %v6031_v40  ;;  %v6245_v13 = vmul.f32 %v8105_v56, %v6031_v40  ;;  %v6249_v45 = vmul.f32 %v8106_v5, %v6031_v40  ;;  %v6253_v51 = vmul.f32 %v8107_v22, %v6031_v40  ;;  %v3403_v6 = vld [vmem:[%s7897_s5 + $0x198] sm:$0xff]  ;;  %v3404_v5 = vld [vmem:[%s7897_s5 + $0x1a0] sm:$0xff] }
 0x33d   :  { %v6259_v55 = vmul.f32 %v3400_v27, %v6031_v40  ;;  %v6265_v19 = vmul.f32 %v3401_v26, %v6031_v40  ;;  %v6271_v54 = vmul.f32 %v3402_v20, %v6031_v40  ;;  %v6277_v56 = vmul.f32 %v3403_v6, %v6031_v40  ;;  %v3405_v27 = vld [vmem:[%s7897_s5 + $0x1a8] sm:$0xff]  ;;  %v3406_v20 = vld [vmem:[%s7897_s5 + $0x1b0] sm:$0xff] }
 0x33e   :  { %v6283_v22 = vmul.f32 %v3404_v5, %v6031_v40  ;;  %v6289_v26 = vmul.f32 %v3405_v27, %v6031_v40  ;;  %v6295_v6 = vmul.f32 %v3406_v20, %v6031_v40  ;;  %v6301_v5 = vmul.f32 %v3407_v35, %v6031_v40 }
 0x33f   :  { %v6307_v27 = vmul.f32 %v3408_v46, %v6031_v40 }
 0x340   :  { %8108 = vst [vmem:[#allocation2_spill] sm:$0xff] %v6283_v22  ;;  %8109 = vst [vmem:[#allocation3_spill] sm:$0xff] %v6289_v26  ;;  %v3409_v26 = vld [vmem:[%s7897_s5 + $0x1c8] sm:$0xff]  ;;  %v3476_v22 = vld [vmem:[%s7897_s5 + $0x3e0] sm:$0xff] }
 0x341   :  { %8110 = vst [vmem:[#allocation4_spill] sm:$0xff] %v6295_v6  ;;  %8111 = vst [vmem:[#allocation5_spill] sm:$0xff] %v6301_v5  ;;  %v6313_v20 = vmul.f32 %v3409_v26, %v6031_v40  ;;  %v3410_v6 = vld [vmem:[%s7897_s5 + $0x1d0] sm:$0xff]  ;;  %v3411_v5 = vld [vmem:[%s7897_s5 + $0x1d8] sm:$0xff] }
 0x342   :  { %8112 = vst [vmem:[#allocation6_spill] sm:$0xff] %v6307_v27  ;;  %v6319_v35 = vmul.f32 %v3410_v6, %v6031_v40  ;;  %v6325_v46 = vmul.f32 %v3411_v5, %v6031_v40  ;;  %v3412_v27 = vld [vmem:[%s7897_s5 + $0x1e0] sm:$0xff] }
 0x343   :  { %8113 = vst [vmem:[#allocation7_spill] sm:$0xff] %v6313_v20  ;;  %v6331_v26 = vmul.f32 %v3412_v27, %v6031_v40  ;;  %v3413_v20 = vld [vmem:[%s7897_s5 + $0x1e8] sm:$0xff] }
 0x344   :  { %8114 = vst [vmem:[#allocation8_spill] sm:$0xff] %v6319_v35  ;;  %8115 = vst [vmem:[#allocation9_spill] sm:$0xff] %v6325_v46  ;;  %v6337_v6 = vmul.f32 %v3413_v20, %v6031_v40  ;;  %v3414_v35 = vld [vmem:[%s7897_s5 + $0x1f0] sm:$0xff]  ;;  %v3415_v46 = vld [vmem:[%s7897_s5 + $0x1f8] sm:$0xff] }
 0x345   :  { %8116 = vst [vmem:[#allocation10_spill] sm:$0xff] %v6331_v26  ;;  %v6343_v5 = vmul.f32 %v3414_v35, %v6031_v40  ;;  %v6349_v27 = vmul.f32 %v3415_v46, %v6031_v40  ;;  %v3416_v26 = vld [vmem:[%s7897_s5 + $0x200] sm:$0xff] }
 0x346   :  { %8117 = vst [vmem:[#allocation11_spill] sm:$0xff] %v6337_v6  ;;  %v6355_v20 = vmul.f32 %v3416_v26, %v6031_v40  ;;  %v3417_v6 = vld [vmem:[%s7897_s5 + $0x208] sm:$0xff] }
 0x347   :  { %8118 = vst [vmem:[#allocation12_spill] sm:$0xff] %v6343_v5  ;;  %8119 = vst [vmem:[#allocation13_spill] sm:$0xff] %v6349_v27  ;;  %v6361_v35 = vmul.f32 %v3417_v6, %v6031_v40  ;;  %v3418_v5 = vld [vmem:[%s7897_s5 + $0x210] sm:$0xff]  ;;  %v3419_v27 = vld [vmem:[%s7897_s5 + $0x218] sm:$0xff] }
 0x348   :  { %8120 = vst [vmem:[#allocation14_spill] sm:$0xff] %v6355_v20  ;;  %v6367_v46 = vmul.f32 %v3418_v5, %v6031_v40  ;;  %v6373_v26 = vmul.f32 %v3419_v27, %v6031_v40  ;;  %v3420_v20 = vld [vmem:[%s7897_s5 + $0x220] sm:$0xff] }
 0x349   :  { %8121 = vst [vmem:[#allocation15_spill] sm:$0xff] %v6361_v35  ;;  %v6379_v6 = vmul.f32 %v3420_v20, %v6031_v40  ;;  %v3421_v35 = vld [vmem:[%s7897_s5 + $0x228] sm:$0xff] }
 0x34a   :  { %8122 = vst [vmem:[#allocation16_spill] sm:$0xff] %v6367_v46  ;;  %8123 = vst [vmem:[#allocation17_spill] sm:$0xff] %v6373_v26  ;;  %v6385_v5 = vmul.f32 %v3421_v35, %v6031_v40  ;;  %v3422_v46 = vld [vmem:[%s7897_s5 + $0x230] sm:$0xff]  ;;  %v3423_v26 = vld [vmem:[%s7897_s5 + $0x238] sm:$0xff] }
 0x34b   :  { %8124 = vst [vmem:[#allocation18_spill] sm:$0xff] %v6379_v6  ;;  %v6391_v27 = vmul.f32 %v3422_v46, %v6031_v40  ;;  %v6397_v20 = vmul.f32 %v3423_v26, %v6031_v40  ;;  %v3424_v6 = vld [vmem:[%s7897_s5 + $0x240] sm:$0xff] }
 0x34c   :  { %8125 = vst [vmem:[#allocation19_spill] sm:$0xff] %v6385_v5  ;;  %v6403_v35 = vmul.f32 %v3424_v6, %v6031_v40  ;;  %v3425_v5 = vld [vmem:[%s7897_s5 + $0x248] sm:$0xff] }
 0x34d   :  { %8126 = vst [vmem:[#allocation20_spill] sm:$0xff] %v6391_v27  ;;  %8127 = vst [vmem:[#allocation21_spill] sm:$0xff] %v6397_v20  ;;  %v6409_v46 = vmul.f32 %v3425_v5, %v6031_v40  ;;  %v3426_v27 = vld [vmem:[%s7897_s5 + $0x250] sm:$0xff]  ;;  %v3427_v20 = vld [vmem:[%s7897_s5 + $0x258] sm:$0xff] }
 0x34e   :  { %8128 = vst [vmem:[#allocation22_spill] sm:$0xff] %v6403_v35  ;;  %v6415_v26 = vmul.f32 %v3426_v27, %v6031_v40  ;;  %v6421_v6 = vmul.f32 %v3427_v20, %v6031_v40  ;;  %v3428_v35 = vld [vmem:[%s7897_s5 + $0x260] sm:$0xff] }
 0x34f   :  { %8129 = vst [vmem:[#allocation23_spill] sm:$0xff] %v6409_v46  ;;  %v6427_v5 = vmul.f32 %v3428_v35, %v6031_v40  ;;  %v3429_v46 = vld [vmem:[%s7897_s5 + $0x268] sm:$0xff] }
 0x350   :  { %8130 = vst [vmem:[#allocation24_spill] sm:$0xff] %v6415_v26  ;;  %8131 = vst [vmem:[#allocation25_spill] sm:$0xff] %v6421_v6  ;;  %v6433_v27 = vmul.f32 %v3429_v46, %v6031_v40  ;;  %v3430_v26 = vld [vmem:[%s7897_s5 + $0x270] sm:$0xff]  ;;  %v3431_v6 = vld [vmem:[%s7897_s5 + $0x278] sm:$0xff] }
 0x351   :  { %8132 = vst [vmem:[#allocation26_spill] sm:$0xff] %v6427_v5  ;;  %v6439_v20 = vmul.f32 %v3430_v26, %v6031_v40  ;;  %v6445_v35 = vmul.f32 %v3431_v6, %v6031_v40  ;;  %v3432_v5 = vld [vmem:[%s7897_s5 + $0x280] sm:$0xff] }
 0x352   :  { %8133 = vst [vmem:[#allocation27_spill] sm:$0xff] %v6433_v27  ;;  %v6451_v46 = vmul.f32 %v3432_v5, %v6031_v40  ;;  %v3433_v27 = vld [vmem:[%s7897_s5 + $0x288] sm:$0xff] }
 0x353   :  { %8134 = vst [vmem:[#allocation28_spill] sm:$0xff] %v6439_v20  ;;  %8135 = vst [vmem:[#allocation29_spill] sm:$0xff] %v6445_v35  ;;  %v6457_v26 = vmul.f32 %v3433_v27, %v6031_v40  ;;  %v3434_v20 = vld [vmem:[%s7897_s5 + $0x290] sm:$0xff]  ;;  %v3435_v35 = vld [vmem:[%s7897_s5 + $0x298] sm:$0xff] }
 0x354   :  { %8136 = vst [vmem:[#allocation30_spill] sm:$0xff] %v6451_v46  ;;  %v6463_v6 = vmul.f32 %v3434_v20, %v6031_v40  ;;  %v6469_v5 = vmul.f32 %v3435_v35, %v6031_v40  ;;  %v3436_v46 = vld [vmem:[%s7897_s5 + $0x2a0] sm:$0xff] }
 0x355   :  { %8137 = vst [vmem:[#allocation31_spill] sm:$0xff] %v6457_v26  ;;  %v6475_v27 = vmul.f32 %v3436_v46, %v6031_v40  ;;  %v3437_v26 = vld [vmem:[%s7897_s5 + $0x2a8] sm:$0xff] }
 0x356   :  { %8138 = vst [vmem:[#allocation32_spill] sm:$0xff] %v6463_v6  ;;  %8139 = vst [vmem:[#allocation33_spill] sm:$0xff] %v6469_v5  ;;  %v6481_v20 = vmul.f32 %v3437_v26, %v6031_v40  ;;  %v3438_v6 = vld [vmem:[%s7897_s5 + $0x2b0] sm:$0xff]  ;;  %v3439_v5 = vld [vmem:[%s7897_s5 + $0x2b8] sm:$0xff] }
 0x357   :  { %8140 = vst [vmem:[#allocation34_spill] sm:$0xff] %v6475_v27  ;;  %v6487_v35 = vmul.f32 %v3438_v6, %v6031_v40  ;;  %v6493_v46 = vmul.f32 %v3439_v5, %v6031_v40  ;;  %v3440_v27 = vld [vmem:[%s7897_s5 + $0x2c0] sm:$0xff] }
 0x358   :  { %8141 = vst [vmem:[#allocation35_spill] sm:$0xff] %v6481_v20  ;;  %v6499_v26 = vmul.f32 %v3440_v27, %v6031_v40  ;;  %v3441_v20 = vld [vmem:[%s7897_s5 + $0x2c8] sm:$0xff] }
 0x359   :  { %8142 = vst [vmem:[#allocation36_spill] sm:$0xff] %v6487_v35  ;;  %8143 = vst [vmem:[#allocation37_spill] sm:$0xff] %v6493_v46  ;;  %v6505_v6 = vmul.f32 %v3441_v20, %v6031_v40  ;;  %v3442_v35 = vld [vmem:[%s7897_s5 + $0x2d0] sm:$0xff]  ;;  %v3443_v46 = vld [vmem:[%s7897_s5 + $0x2d8] sm:$0xff] }
 0x35a   :  { %8144 = vst [vmem:[#allocation38_spill] sm:$0xff] %v6499_v26  ;;  %v6511_v5 = vmul.f32 %v3442_v35, %v6031_v40  ;;  %v6517_v27 = vmul.f32 %v3443_v46, %v6031_v40  ;;  %v3444_v26 = vld [vmem:[%s7897_s5 + $0x2e0] sm:$0xff] }
 0x35b   :  { %8145 = vst [vmem:[#allocation39_spill] sm:$0xff] %v6505_v6  ;;  %v6523_v20 = vmul.f32 %v3444_v26, %v6031_v40  ;;  %v3445_v6 = vld [vmem:[%s7897_s5 + $0x2e8] sm:$0xff] }
 0x35c   :  { %8146 = vst [vmem:[#allocation40_spill] sm:$0xff] %v6511_v5  ;;  %8147 = vst [vmem:[#allocation41_spill] sm:$0xff] %v6517_v27  ;;  %v6529_v35 = vmul.f32 %v3445_v6, %v6031_v40  ;;  %v3446_v5 = vld [vmem:[%s7897_s5 + $0x2f0] sm:$0xff]  ;;  %v3447_v27 = vld [vmem:[%s7897_s5 + $0x2f8] sm:$0xff] }
 0x35d   :  { %8148 = vst [vmem:[#allocation42_spill] sm:$0xff] %v6523_v20  ;;  %v6535_v46 = vmul.f32 %v3446_v5, %v6031_v40  ;;  %v6541_v26 = vmul.f32 %v3447_v27, %v6031_v40  ;;  %v3448_v20 = vld [vmem:[%s7897_s5 + $0x300] sm:$0xff] }
 0x35e   :  { %8149 = vst [vmem:[#allocation43_spill] sm:$0xff] %v6529_v35  ;;  %v6547_v6 = vmul.f32 %v3448_v20, %v6031_v40  ;;  %v3449_v35 = vld [vmem:[%s7897_s5 + $0x308] sm:$0xff] }
 0x35f   :  { %8150 = vst [vmem:[#allocation44_spill] sm:$0xff] %v6535_v46  ;;  %8151 = vst [vmem:[#allocation45_spill] sm:$0xff] %v6541_v26  ;;  %v6553_v5 = vmul.f32 %v3449_v35, %v6031_v40  ;;  %v3450_v46 = vld [vmem:[%s7897_s5 + $0x310] sm:$0xff]  ;;  %v3451_v26 = vld [vmem:[%s7897_s5 + $0x318] sm:$0xff] }
 0x360   :  { %8152 = vst [vmem:[#allocation46_spill] sm:$0xff] %v6547_v6  ;;  %v6559_v27 = vmul.f32 %v3450_v46, %v6031_v40  ;;  %v6565_v20 = vmul.f32 %v3451_v26, %v6031_v40  ;;  %v3452_v6 = vld [vmem:[%s7897_s5 + $0x320] sm:$0xff] }
 0x361   :  { %8153 = vst [vmem:[#allocation47_spill] sm:$0xff] %v6553_v5  ;;  %v6571_v35 = vmul.f32 %v3452_v6, %v6031_v40  ;;  %v3453_v5 = vld [vmem:[%s7897_s5 + $0x328] sm:$0xff] }
 0x362   :  { %8154 = vst [vmem:[#allocation48_spill] sm:$0xff] %v6559_v27  ;;  %8155 = vst [vmem:[#allocation49_spill] sm:$0xff] %v6565_v20  ;;  %v6577_v46 = vmul.f32 %v3453_v5, %v6031_v40  ;;  %v3454_v27 = vld [vmem:[%s7897_s5 + $0x330] sm:$0xff]  ;;  %v3455_v20 = vld [vmem:[%s7897_s5 + $0x338] sm:$0xff] }
 0x363   :  { %8156 = vst [vmem:[#allocation50_spill] sm:$0xff] %v6571_v35  ;;  %v6583_v26 = vmul.f32 %v3454_v27, %v6031_v40  ;;  %v6589_v6 = vmul.f32 %v3455_v20, %v6031_v40  ;;  %v3456_v35 = vld [vmem:[%s7897_s5 + $0x340] sm:$0xff] }
 0x364   :  { %8157 = vst [vmem:[#allocation51_spill] sm:$0xff] %v6577_v46  ;;  %v6595_v5 = vmul.f32 %v3456_v35, %v6031_v40  ;;  %v3457_v46 = vld [vmem:[%s7897_s5 + $0x348] sm:$0xff] }
 0x365   :  { %8158 = vst [vmem:[#allocation52_spill] sm:$0xff] %v6583_v26  ;;  %8159 = vst [vmem:[#allocation53_spill] sm:$0xff] %v6589_v6  ;;  %v6601_v27 = vmul.f32 %v3457_v46, %v6031_v40  ;;  %v3458_v26 = vld [vmem:[%s7897_s5 + $0x350] sm:$0xff]  ;;  %v3459_v6 = vld [vmem:[%s7897_s5 + $0x358] sm:$0xff] }
 0x366   :  { %8160 = vst [vmem:[#allocation54_spill] sm:$0xff] %v6595_v5  ;;  %v6607_v20 = vmul.f32 %v3458_v26, %v6031_v40  ;;  %v6613_v35 = vmul.f32 %v3459_v6, %v6031_v40  ;;  %v3460_v5 = vld [vmem:[%s7897_s5 + $0x360] sm:$0xff] }
 0x367   :  { %8161 = vst [vmem:[#allocation55_spill] sm:$0xff] %v6601_v27  ;;  %v6619_v46 = vmul.f32 %v3460_v5, %v6031_v40  ;;  %v3461_v27 = vld [vmem:[%s7897_s5 + $0x368] sm:$0xff] }
 0x368   :  { %8162 = vst [vmem:[#allocation56_spill] sm:$0xff] %v6607_v20  ;;  %8163 = vst [vmem:[#allocation57_spill] sm:$0xff] %v6613_v35  ;;  %v6625_v26 = vmul.f32 %v3461_v27, %v6031_v40  ;;  %v3462_v20 = vld [vmem:[%s7897_s5 + $0x370] sm:$0xff]  ;;  %v3463_v35 = vld [vmem:[%s7897_s5 + $0x378] sm:$0xff] }
 0x369   :  { %8164 = vst [vmem:[#allocation58_spill] sm:$0xff] %v6619_v46  ;;  %v6631_v6 = vmul.f32 %v3462_v20, %v6031_v40  ;;  %v6637_v5 = vmul.f32 %v3463_v35, %v6031_v40  ;;  %v3464_v46 = vld [vmem:[%s7897_s5 + $0x380] sm:$0xff] }
 0x36a   :  { %8165 = vst [vmem:[#allocation59_spill] sm:$0xff] %v6625_v26  ;;  %v6643_v27 = vmul.f32 %v3464_v46, %v6031_v40  ;;  %v3465_v26 = vld [vmem:[%s7897_s5 + $0x388] sm:$0xff] }
 0x36b   :  { %8166 = vst [vmem:[#allocation60_spill] sm:$0xff] %v6631_v6  ;;  %8167 = vst [vmem:[#allocation61_spill] sm:$0xff] %v6637_v5  ;;  %v6649_v20 = vmul.f32 %v3465_v26, %v6031_v40  ;;  %v3466_v6 = vld [vmem:[%s7897_s5 + $0x390] sm:$0xff]  ;;  %v3467_v5 = vld [vmem:[%s7897_s5 + $0x398] sm:$0xff] }
 0x36c   :  { %8168 = vst [vmem:[#allocation62_spill] sm:$0xff] %v6643_v27  ;;  %v6655_v35 = vmul.f32 %v3466_v6, %v6031_v40  ;;  %v6661_v46 = vmul.f32 %v3467_v5, %v6031_v40  ;;  %v3468_v27 = vld [vmem:[%s7897_s5 + $0x3a0] sm:$0xff] }
 0x36d   :  { %8169 = vst [vmem:[#allocation63_spill] sm:$0xff] %v6649_v20  ;;  %v6667_v26 = vmul.f32 %v3468_v27, %v6031_v40  ;;  %v3469_v20 = vld [vmem:[%s7897_s5 + $0x3a8] sm:$0xff] }
 0x36e   :  { %8170 = vst [vmem:[#allocation64_spill] sm:$0xff] %v6655_v35  ;;  %8171 = vst [vmem:[#allocation65_spill] sm:$0xff] %v6661_v46  ;;  %v6673_v6 = vmul.f32 %v3469_v20, %v6031_v40  ;;  %v3470_v35 = vld [vmem:[%s7897_s5 + $0x3b0] sm:$0xff]  ;;  %v3471_v46 = vld [vmem:[%s7897_s5 + $0x3b8] sm:$0xff] }
 0x36f   :  { %8172 = vst [vmem:[#allocation66_spill] sm:$0xff] %v6667_v26  ;;  %v6679_v5 = vmul.f32 %v3470_v35, %v6031_v40  ;;  %v6685_v27 = vmul.f32 %v3471_v46, %v6031_v40  ;;  %v3472_v26 = vld [vmem:[%s7897_s5 + $0x3c0] sm:$0xff] }
 0x370   :  { %8173 = vst [vmem:[#allocation67_spill] sm:$0xff] %v6673_v6  ;;  %v6691_v20 = vmul.f32 %v3472_v26, %v6031_v40  ;;  %v3473_v6 = vld [vmem:[%s7897_s5 + $0x3c8] sm:$0xff] }
 0x371   :  { %8174 = vst [vmem:[#allocation68_spill] sm:$0xff] %v6679_v5  ;;  %8175 = vst [vmem:[#allocation69_spill] sm:$0xff] %v6685_v27  ;;  %v6697_v35 = vmul.f32 %v3473_v6, %v6031_v40  ;;  %v3474_v5 = vld [vmem:[%s7897_s5 + $0x3d0] sm:$0xff]  ;;  %v3475_v27 = vld [vmem:[%s7897_s5 + $0x3d8] sm:$0xff]  ;;  %v8180_v6 = vsub.f32 %v6024_v9, %v6027_v10 }
 0x372   :  { %8176 = vst [vmem:[#allocation70_spill] sm:$0xff] %v6691_v20  ;;  %v6703_v46 = vmul.f32 %v3474_v5, %v6031_v40  ;;  %v6709_v26 = vmul.f32 %v3475_v27, %v6031_v40  ;;  %v8179_v20 = vsub.s32 0, %v6015_v32  ;;  %v6722_v5 = vmul.f32 %v3476_v22, %v6031_v40  ;;  %v3478_v32 = vld [vmem:[%s7897_s5 + $0x3f0] sm:$0xff]  ;;  %v3479_v10 = vld [vmem:[%s7897_s5 + $0x3f8] sm:$0xff] }
 0x373   :  { %8177 = vst [vmem:[#allocation71_spill] sm:$0xff] %v6697_v35  ;;  %v6734_v9 = vmul.f32 %v3478_v32, %v6031_v40  ;;  %v6740_v22 = vmul.f32 %v3479_v10, %v6031_v40  ;;  %v8186_v10 = vld [vmem:[#allocation2_spill] sm:$0xff] }
 0x374   :  { %8178 = vst [vmem:[#allocation72_spill] sm:$0xff] %v6703_v46  ;;  %v6716_v35 = vrot.slane %v8180_v6, %v8179_v20  ;;  %v3477_v46 = vld [vmem:[%s7897_s5 + $0x3e8] sm:$0xff] }
 0x375   :  { %v6728_v27 = vmul.f32 %v3477_v46, %v6031_v40 }
 0x376   :  { %v6744_v20 = vadd.f32 %v6716_v35, %v6039_v43  ;;  %v6748_v46 = vadd.f32 %v6716_v35, %v6045_v29  ;;  %v6752_v6 = vadd.f32 %v6716_v35, %v6051_v21  ;;  %v6756_v32 = vadd.f32 %v6716_v35, %v6057_v61 }
 0x377   :  { %v6760_v40 = vadd.f32 %v6716_v35, %v6063_v28  ;;  %v6764_v43 = vadd.f32 %v6716_v35, %v6069_v0  ;;  %v6768_v29 = vadd.f32 %v6716_v35, %v6075_v30  ;;  %v6772_v21 = vadd.f32 %v6716_v35, %v6081_v8 }
 0x378   :  { %v6776_v61 = vadd.f32 %v6716_v35, %v6087_v36  ;;  %v6780_v28 = vadd.f32 %v6716_v35, %v6093_v39  ;;  %v6784_v0 = vadd.f32 %v6716_v35, %v6099_v42  ;;  %v6788_v30 = vadd.f32 %v6716_v35, %v6105_v34 }
 0x379   :  { %v6792_v8 = vadd.f32 %v6716_v35, %v6111_v50  ;;  %v6796_v36 = vadd.f32 %v6716_v35, %v6117_v4  ;;  %v6800_v39 = vadd.f32 %v6716_v35, %v6121_v52  ;;  %v6804_v42 = vadd.f32 %v6716_v35, %v6125_v58 }
 0x37a   :  { %v6808_v34 = vadd.f32 %v6716_v35, %v6129_v60  ;;  %v6812_v50 = vadd.f32 %v6716_v35, %v6133_v53  ;;  %v6816_v4 = vadd.f32 %v6716_v35, %v6137_v2  ;;  %v6820_v52 = vadd.f32 %v6716_v35, %v6141_v23 }
 0x37b   :  { %v6824_v58 = vadd.f32 %v6716_v35, %v6145_v11  ;;  %v6828_v60 = vadd.f32 %v6716_v35, %v6149_v3  ;;  %v6832_v53 = vadd.f32 %v6716_v35, %v6153_v15  ;;  %v6836_v2 = vadd.f32 %v6716_v35, %v6157_v38 }
 0x37c   :  { %v6840_v23 = vadd.f32 %v6716_v35, %v6161_v47  ;;  %v6844_v11 = vadd.f32 %v6716_v35, %v6165_v1  ;;  %v6848_v3 = vadd.f32 %v6716_v35, %v6169_v41  ;;  %v6852_v15 = vadd.f32 %v6716_v35, %v6173_v7 }
 0x37d   :  { %v6856_v38 = vadd.f32 %v6716_v35, %v6177_v62  ;;  %v6860_v47 = vadd.f32 %v6716_v35, %v6181_v31  ;;  %v6864_v1 = vadd.f32 %v6716_v35, %v6185_v57  ;;  %v6868_v41 = vadd.f32 %v6716_v35, %v6189_v59 }
 0x37e   :  { %v6872_v7 = vadd.f32 %v6716_v35, %v6193_v37  ;;  %v6876_v62 = vadd.f32 %v6716_v35, %v6197_v44  ;;  %v6880_v31 = vadd.f32 %v6716_v35, %v6201_v14  ;;  %v6884_v57 = vadd.f32 %v6716_v35, %v6205_v12 }
 0x37f   :  { %v6888_v59 = vadd.f32 %v6716_v35, %v6209_v49  ;;  %v6892_v37 = vadd.f32 %v6716_v35, %v6213_v17  ;;  %v6896_v44 = vadd.f32 %v6716_v35, %v6217_v48  ;;  %v6900_v14 = vadd.f32 %v6716_v35, %v6221_v16 }
 0x380   :  { %v6904_v12 = vadd.f32 %v6716_v35, %v6225_v63  ;;  %v6908_v49 = vadd.f32 %v6716_v35, %v6229_v25  ;;  %v6912_v17 = vadd.f32 %v6716_v35, %v6233_v24  ;;  %v6916_v48 = vadd.f32 %v6716_v35, %v6237_v18 }
 0x381   :  { %v6920_v16 = vadd.f32 %v6716_v35, %v6241_v33  ;;  %v6924_v63 = vadd.f32 %v6716_v35, %v6245_v13  ;;  %v6928_v25 = vadd.f32 %v6716_v35, %v6249_v45  ;;  %v6932_v24 = vadd.f32 %v6716_v35, %v6253_v51 }
 0x382   :  { %v6936_v18 = vadd.f32 %v6716_v35, %v6259_v55  ;;  %v6940_v33 = vadd.f32 %v6716_v35, %v6265_v19  ;;  %v6944_v13 = vadd.f32 %v6716_v35, %v6271_v54  ;;  %v6948_v45 = vadd.f32 %v6716_v35, %v6277_v56 }
 0x383   :  { %8181 = vst [vmem:[#allocation73_spill] sm:$0xff] %v6932_v24  ;;  %v6952_v51 = vadd.f32 %v6716_v35, %v8186_v10  ;;  %v8188_v24 = vld [vmem:[#allocation3_spill] sm:$0xff] }
 0x384   :  { %8182 = vst [vmem:[#allocation74_spill] sm:$0xff] %v6936_v18  ;;  %8183 = vst [vmem:[#allocation75_spill] sm:$0xff] %v6940_v33  ;;  %v6956_v55 = vadd.f32 %v6716_v35, %v8188_v24  ;;  %v8190_v18 = vld [vmem:[#allocation4_spill] sm:$0xff]  ;;  %v8192_v33 = vld [vmem:[#allocation5_spill] sm:$0xff] }
 0x385   :  { %8184 = vst [vmem:[#allocation76_spill] sm:$0xff] %v6944_v13  ;;  %8185 = vst [vmem:[#allocation77_spill] sm:$0xff] %v6948_v45  ;;  %v6960_v19 = vadd.f32 %v6716_v35, %v8190_v18  ;;  %v6964_v54 = vadd.f32 %v6716_v35, %v8192_v33  ;;  %v8194_v13 = vld [vmem:[#allocation6_spill] sm:$0xff]  ;;  %v8196_v45 = vld [vmem:[#allocation7_spill] sm:$0xff] }
 0x386   :  { %8187 = vst [vmem:[#allocation2_spill] sm:$0xff] %v6952_v51  ;;  %8189 = vst [vmem:[#allocation3_spill] sm:$0xff] %v6956_v55  ;;  %v6968_v56 = vadd.f32 %v6716_v35, %v8194_v13  ;;  %v6972_v10 = vadd.f32 %v6716_v35, %v8196_v45  ;;  %v8198_v51 = vld [vmem:[#allocation8_spill] sm:$0xff]  ;;  %v8200_v55 = vld [vmem:[#allocation9_spill] sm:$0xff] }
 0x387   :  { %8191 = vst [vmem:[#allocation4_spill] sm:$0xff] %v6960_v19  ;;  %8193 = vst [vmem:[#allocation5_spill] sm:$0xff] %v6964_v54  ;;  %v6976_v24 = vadd.f32 %v6716_v35, %v8198_v51  ;;  %v6980_v18 = vadd.f32 %v6716_v35, %v8200_v55  ;;  %v8202_v19 = vld [vmem:[#allocation10_spill] sm:$0xff]  ;;  %v8204_v54 = vld [vmem:[#allocation11_spill] sm:$0xff] }
 0x388   :  { %8195 = vst [vmem:[#allocation6_spill] sm:$0xff] %v6968_v56  ;;  %8197 = vst [vmem:[#allocation7_spill] sm:$0xff] %v6972_v10  ;;  %v6984_v33 = vadd.f32 %v6716_v35, %v8202_v19  ;;  %v6988_v13 = vadd.f32 %v6716_v35, %v8204_v54  ;;  %v8206_v56 = vld [vmem:[#allocation12_spill] sm:$0xff]  ;;  %v8208_v10 = vld [vmem:[#allocation13_spill] sm:$0xff] }
 0x389   :  { %8199 = vst [vmem:[#allocation8_spill] sm:$0xff] %v6976_v24  ;;  %8201 = vst [vmem:[#allocation9_spill] sm:$0xff] %v6980_v18  ;;  %v6992_v45 = vadd.f32 %v6716_v35, %v8206_v56  ;;  %v6996_v51 = vadd.f32 %v6716_v35, %v8208_v10  ;;  %v8210_v24 = vld [vmem:[#allocation14_spill] sm:$0xff]  ;;  %v8212_v18 = vld [vmem:[#allocation15_spill] sm:$0xff] }
 0x38a   :  { %8203 = vst [vmem:[#allocation10_spill] sm:$0xff] %v6984_v33  ;;  %8205 = vst [vmem:[#allocation11_spill] sm:$0xff] %v6988_v13  ;;  %v7000_v55 = vadd.f32 %v6716_v35, %v8210_v24  ;;  %v7004_v19 = vadd.f32 %v6716_v35, %v8212_v18  ;;  %v8214_v33 = vld [vmem:[#allocation16_spill] sm:$0xff]  ;;  %v8216_v13 = vld [vmem:[#allocation17_spill] sm:$0xff] }
 0x38b   :  { %8207 = vst [vmem:[#allocation12_spill] sm:$0xff] %v6992_v45  ;;  %8209 = vst [vmem:[#allocation13_spill] sm:$0xff] %v6996_v51  ;;  %v7008_v54 = vadd.f32 %v6716_v35, %v8214_v33  ;;  %v7012_v56 = vadd.f32 %v6716_v35, %v8216_v13  ;;  %v8218_v45 = vld [vmem:[#allocation18_spill] sm:$0xff]  ;;  %v8220_v51 = vld [vmem:[#allocation19_spill] sm:$0xff] }
 0x38c   :  { %8211 = vst [vmem:[#allocation14_spill] sm:$0xff] %v7000_v55  ;;  %8213 = vst [vmem:[#allocation15_spill] sm:$0xff] %v7004_v19  ;;  %v7016_v10 = vadd.f32 %v6716_v35, %v8218_v45  ;;  %v7020_v24 = vadd.f32 %v6716_v35, %v8220_v51  ;;  %v8222_v55 = vld [vmem:[#allocation20_spill] sm:$0xff]  ;;  %v8224_v19 = vld [vmem:[#allocation21_spill] sm:$0xff] }
 0x38d   :  { %8215 = vst [vmem:[#allocation16_spill] sm:$0xff] %v7008_v54  ;;  %8217 = vst [vmem:[#allocation17_spill] sm:$0xff] %v7012_v56  ;;  %v7024_v18 = vadd.f32 %v6716_v35, %v8222_v55  ;;  %v7028_v33 = vadd.f32 %v6716_v35, %v8224_v19  ;;  %v8226_v54 = vld [vmem:[#allocation22_spill] sm:$0xff]  ;;  %v8228_v56 = vld [vmem:[#allocation23_spill] sm:$0xff] }
 0x38e   :  { %8219 = vst [vmem:[#allocation18_spill] sm:$0xff] %v7016_v10  ;;  %8221 = vst [vmem:[#allocation19_spill] sm:$0xff] %v7020_v24  ;;  %v7032_v13 = vadd.f32 %v6716_v35, %v8226_v54  ;;  %v7036_v45 = vadd.f32 %v6716_v35, %v8228_v56  ;;  %v8230_v10 = vld [vmem:[#allocation24_spill] sm:$0xff]  ;;  %v8232_v24 = vld [vmem:[#allocation25_spill] sm:$0xff] }
 0x38f   :  { %8223 = vst [vmem:[#allocation20_spill] sm:$0xff] %v7024_v18  ;;  %8225 = vst [vmem:[#allocation21_spill] sm:$0xff] %v7028_v33  ;;  %v7040_v51 = vadd.f32 %v6716_v35, %v8230_v10  ;;  %v7044_v55 = vadd.f32 %v6716_v35, %v8232_v24  ;;  %v8234_v18 = vld [vmem:[#allocation26_spill] sm:$0xff]  ;;  %v8236_v33 = vld [vmem:[#allocation27_spill] sm:$0xff] }
 0x390   :  { %8227 = vst [vmem:[#allocation22_spill] sm:$0xff] %v7032_v13  ;;  %8229 = vst [vmem:[#allocation23_spill] sm:$0xff] %v7036_v45  ;;  %v7048_v19 = vadd.f32 %v6716_v35, %v8234_v18  ;;  %v7052_v54 = vadd.f32 %v6716_v35, %v8236_v33  ;;  %v8238_v13 = vld [vmem:[#allocation28_spill] sm:$0xff]  ;;  %v8240_v45 = vld [vmem:[#allocation29_spill] sm:$0xff] }
 0x391   :  { %8231 = vst [vmem:[#allocation24_spill] sm:$0xff] %v7040_v51  ;;  %8233 = vst [vmem:[#allocation25_spill] sm:$0xff] %v7044_v55  ;;  %v7056_v56 = vadd.f32 %v6716_v35, %v8238_v13  ;;  %v7060_v10 = vadd.f32 %v6716_v35, %v8240_v45  ;;  %v8242_v51 = vld [vmem:[#allocation30_spill] sm:$0xff]  ;;  %v8244_v55 = vld [vmem:[#allocation31_spill] sm:$0xff] }
 0x392   :  { %8235 = vst [vmem:[#allocation26_spill] sm:$0xff] %v7048_v19  ;;  %8237 = vst [vmem:[#allocation27_spill] sm:$0xff] %v7052_v54  ;;  %v7064_v24 = vadd.f32 %v6716_v35, %v8242_v51  ;;  %v7068_v18 = vadd.f32 %v6716_v35, %v8244_v55  ;;  %v8246_v19 = vld [vmem:[#allocation32_spill] sm:$0xff]  ;;  %v8248_v54 = vld [vmem:[#allocation33_spill] sm:$0xff] }
 0x393   :  { %8239 = vst [vmem:[#allocation28_spill] sm:$0xff] %v7056_v56  ;;  %8241 = vst [vmem:[#allocation29_spill] sm:$0xff] %v7060_v10  ;;  %v7072_v33 = vadd.f32 %v6716_v35, %v8246_v19  ;;  %v7076_v13 = vadd.f32 %v6716_v35, %v8248_v54  ;;  %v8250_v56 = vld [vmem:[#allocation34_spill] sm:$0xff]  ;;  %v8252_v10 = vld [vmem:[#allocation35_spill] sm:$0xff] }
 0x394   :  { %8243 = vst [vmem:[#allocation30_spill] sm:$0xff] %v7064_v24  ;;  %8245 = vst [vmem:[#allocation31_spill] sm:$0xff] %v7068_v18  ;;  %v7080_v45 = vadd.f32 %v6716_v35, %v8250_v56  ;;  %v7084_v51 = vadd.f32 %v6716_v35, %v8252_v10  ;;  %v8254_v24 = vld [vmem:[#allocation36_spill] sm:$0xff]  ;;  %v8256_v18 = vld [vmem:[#allocation37_spill] sm:$0xff] }
 0x395   :  { %8247 = vst [vmem:[#allocation32_spill] sm:$0xff] %v7072_v33  ;;  %8249 = vst [vmem:[#allocation33_spill] sm:$0xff] %v7076_v13  ;;  %v7088_v55 = vadd.f32 %v6716_v35, %v8254_v24  ;;  %v7092_v19 = vadd.f32 %v6716_v35, %v8256_v18  ;;  %v8258_v33 = vld [vmem:[#allocation38_spill] sm:$0xff]  ;;  %v8260_v13 = vld [vmem:[#allocation39_spill] sm:$0xff] }
 0x396   :  { %8251 = vst [vmem:[#allocation34_spill] sm:$0xff] %v7080_v45  ;;  %8253 = vst [vmem:[#allocation35_spill] sm:$0xff] %v7084_v51  ;;  %v7096_v54 = vadd.f32 %v6716_v35, %v8258_v33  ;;  %v7100_v56 = vadd.f32 %v6716_v35, %v8260_v13  ;;  %v8262_v45 = vld [vmem:[#allocation40_spill] sm:$0xff]  ;;  %v8264_v51 = vld [vmem:[#allocation41_spill] sm:$0xff] }
 0x397   :  { %8255 = vst [vmem:[#allocation36_spill] sm:$0xff] %v7088_v55  ;;  %8257 = vst [vmem:[#allocation37_spill] sm:$0xff] %v7092_v19  ;;  %v7104_v10 = vadd.f32 %v6716_v35, %v8262_v45  ;;  %v7108_v24 = vadd.f32 %v6716_v35, %v8264_v51  ;;  %v8266_v55 = vld [vmem:[#allocation42_spill] sm:$0xff]  ;;  %v8268_v19 = vld [vmem:[#allocation43_spill] sm:$0xff] }
 0x398   :  { %8259 = vst [vmem:[#allocation38_spill] sm:$0xff] %v7096_v54  ;;  %8261 = vst [vmem:[#allocation39_spill] sm:$0xff] %v7100_v56  ;;  %v7112_v18 = vadd.f32 %v6716_v35, %v8266_v55  ;;  %v7116_v33 = vadd.f32 %v6716_v35, %v8268_v19  ;;  %v8270_v54 = vld [vmem:[#allocation44_spill] sm:$0xff]  ;;  %v8272_v56 = vld [vmem:[#allocation45_spill] sm:$0xff] }
 0x399   :  { %8263 = vst [vmem:[#allocation40_spill] sm:$0xff] %v7104_v10  ;;  %8265 = vst [vmem:[#allocation41_spill] sm:$0xff] %v7108_v24  ;;  %v7120_v13 = vadd.f32 %v6716_v35, %v8270_v54  ;;  %v7124_v45 = vadd.f32 %v6716_v35, %v8272_v56  ;;  %v8274_v10 = vld [vmem:[#allocation46_spill] sm:$0xff]  ;;  %v8276_v24 = vld [vmem:[#allocation47_spill] sm:$0xff] }
 0x39a   :  { %8267 = vst [vmem:[#allocation42_spill] sm:$0xff] %v7112_v18  ;;  %8269 = vst [vmem:[#allocation43_spill] sm:$0xff] %v7116_v33  ;;  %v7128_v51 = vadd.f32 %v6716_v35, %v8274_v10  ;;  %v7132_v55 = vadd.f32 %v6716_v35, %v8276_v24  ;;  %v8278_v18 = vld [vmem:[#allocation48_spill] sm:$0xff]  ;;  %v8280_v33 = vld [vmem:[#allocation49_spill] sm:$0xff] }
 0x39b   :  { %8271 = vst [vmem:[#allocation44_spill] sm:$0xff] %v7120_v13  ;;  %8273 = vst [vmem:[#allocation45_spill] sm:$0xff] %v7124_v45  ;;  %v7136_v19 = vadd.f32 %v6716_v35, %v8278_v18  ;;  %v7140_v54 = vadd.f32 %v6716_v35, %v8280_v33  ;;  %v8282_v13 = vld [vmem:[#allocation50_spill] sm:$0xff]  ;;  %v8284_v45 = vld [vmem:[#allocation51_spill] sm:$0xff] }
 0x39c   :  { %8275 = vst [vmem:[#allocation46_spill] sm:$0xff] %v7128_v51  ;;  %8277 = vst [vmem:[#allocation47_spill] sm:$0xff] %v7132_v55  ;;  %v7144_v56 = vadd.f32 %v6716_v35, %v8282_v13  ;;  %v7148_v10 = vadd.f32 %v6716_v35, %v8284_v45  ;;  %v8286_v51 = vld [vmem:[#allocation52_spill] sm:$0xff]  ;;  %v8288_v55 = vld [vmem:[#allocation53_spill] sm:$0xff] }
 0x39d   :  { %8279 = vst [vmem:[#allocation48_spill] sm:$0xff] %v7136_v19  ;;  %8281 = vst [vmem:[#allocation49_spill] sm:$0xff] %v7140_v54  ;;  %v7152_v24 = vadd.f32 %v6716_v35, %v8286_v51  ;;  %v7156_v18 = vadd.f32 %v6716_v35, %v8288_v55  ;;  %v8290_v19 = vld [vmem:[#allocation54_spill] sm:$0xff]  ;;  %v8292_v54 = vld [vmem:[#allocation55_spill] sm:$0xff] }
 0x39e   :  { %8283 = vst [vmem:[#allocation50_spill] sm:$0xff] %v7144_v56  ;;  %8285 = vst [vmem:[#allocation51_spill] sm:$0xff] %v7148_v10  ;;  %v7160_v33 = vadd.f32 %v6716_v35, %v8290_v19  ;;  %v7164_v13 = vadd.f32 %v6716_v35, %v8292_v54  ;;  %v8294_v56 = vld [vmem:[#allocation56_spill] sm:$0xff]  ;;  %v8296_v10 = vld [vmem:[#allocation57_spill] sm:$0xff] }
 0x39f   :  { %8287 = vst [vmem:[#allocation52_spill] sm:$0xff] %v7152_v24  ;;  %8289 = vst [vmem:[#allocation53_spill] sm:$0xff] %v7156_v18  ;;  %v7168_v45 = vadd.f32 %v6716_v35, %v8294_v56  ;;  %v7172_v51 = vadd.f32 %v6716_v35, %v8296_v10  ;;  %v8298_v24 = vld [vmem:[#allocation58_spill] sm:$0xff]  ;;  %v8300_v18 = vld [vmem:[#allocation59_spill] sm:$0xff] }
 0x3a0   :  { %8291 = vst [vmem:[#allocation54_spill] sm:$0xff] %v7160_v33  ;;  %8293 = vst [vmem:[#allocation55_spill] sm:$0xff] %v7164_v13  ;;  %v7176_v55 = vadd.f32 %v6716_v35, %v8298_v24  ;;  %v7180_v19 = vadd.f32 %v6716_v35, %v8300_v18  ;;  %v8302_v33 = vld [vmem:[#allocation60_spill] sm:$0xff]  ;;  %v8304_v13 = vld [vmem:[#allocation61_spill] sm:$0xff] }
 0x3a1   :  { %8295 = vst [vmem:[#allocation56_spill] sm:$0xff] %v7168_v45  ;;  %8297 = vst [vmem:[#allocation57_spill] sm:$0xff] %v7172_v51  ;;  %v7184_v54 = vadd.f32 %v6716_v35, %v8302_v33  ;;  %v7188_v56 = vadd.f32 %v6716_v35, %v8304_v13  ;;  %v8306_v45 = vld [vmem:[#allocation62_spill] sm:$0xff]  ;;  %v8308_v51 = vld [vmem:[#allocation63_spill] sm:$0xff] }
 0x3a2   :  { %8299 = vst [vmem:[#allocation58_spill] sm:$0xff] %v7176_v55  ;;  %8301 = vst [vmem:[#allocation59_spill] sm:$0xff] %v7180_v19  ;;  %v7192_v10 = vadd.f32 %v6716_v35, %v8306_v45  ;;  %v7196_v24 = vadd.f32 %v6716_v35, %v8308_v51  ;;  %v8310_v55 = vld [vmem:[#allocation64_spill] sm:$0xff]  ;;  %v8312_v19 = vld [vmem:[#allocation65_spill] sm:$0xff] }
 0x3a3   :  { %8303 = vst [vmem:[#allocation60_spill] sm:$0xff] %v7184_v54  ;;  %8305 = vst [vmem:[#allocation61_spill] sm:$0xff] %v7188_v56  ;;  %v7200_v18 = vadd.f32 %v6716_v35, %v8310_v55  ;;  %v7204_v33 = vadd.f32 %v6716_v35, %v8312_v19  ;;  %v8314_v54 = vld [vmem:[#allocation66_spill] sm:$0xff]  ;;  %v8316_v56 = vld [vmem:[#allocation67_spill] sm:$0xff] }
 0x3a4   :  { %8307 = vst [vmem:[#allocation62_spill] sm:$0xff] %v7192_v10  ;;  %8309 = vst [vmem:[#allocation63_spill] sm:$0xff] %v7196_v24  ;;  %v7208_v13 = vadd.f32 %v6716_v35, %v8314_v54  ;;  %v7212_v45 = vadd.f32 %v6716_v35, %v8316_v56  ;;  %v8317_v10 = vld [vmem:[#allocation68_spill] sm:$0xff]  ;;  %v8318_v24 = vld [vmem:[#allocation69_spill] sm:$0xff] }
 0x3a5   :  { %8311 = vst [vmem:[#allocation64_spill] sm:$0xff] %v7200_v18  ;;  %8313 = vst [vmem:[#allocation65_spill] sm:$0xff] %v7204_v33  ;;  %v7216_v51 = vadd.f32 %v6716_v35, %v8317_v10  ;;  %v7220_v55 = vadd.f32 %v6716_v35, %v8318_v24  ;;  %v8319_v18 = vld [vmem:[#allocation70_spill] sm:$0xff]  ;;  %v8320_v33 = vld [vmem:[#allocation71_spill] sm:$0xff]  ;;  %v7236_v10 = vadd.f32 %v6716_v35, %v6709_v26  ;;  %v2583_v26 = vmax.f32 %v6748_v46, 0.0 }
 0x3a6   :  { %8315 = vst [vmem:[#allocation66_spill] sm:$0xff] %v7208_v13  ;;  %v7224_v19 = vadd.f32 %v6716_v35, %v8319_v18  ;;  %v7228_v54 = vadd.f32 %v6716_v35, %v8320_v33  ;;  %v8321_v13 = vld [vmem:[#allocation72_spill] sm:$0xff]  ;;  %v7240_v24 = vadd.f32 %v6716_v35, %v6722_v5  ;;  %v7244_v18 = vadd.f32 %v6716_v35, %v6728_v27 }
 0x3a7   :  { %v7232_v56 = vadd.f32 %v6716_v35, %v8321_v13  ;;  %8323 = vst [vmem:[#allocation68_spill] sm:$0xff] %v7236_v10  ;;  %v7248_v33 = vadd.f32 %v6716_v35, %v6734_v9  ;;  %v7252_v13 = vadd.f32 %v6716_v35, %v6740_v22  ;;  %v2584_v10 = vmax.f32 %v6752_v6, 0.0  ;;  %2711 = vst.msk [vmem:[%s7897_s5 + $0x8] sm:$0xff] %vm1258_vm2, %v2583_v26  ;;  %v8335_v26 = vld [vmem:[#allocation5_spill] sm:$0xff] }
 0x3a8   :  { %8324 = vst [vmem:[#allocation69_spill] sm:$0xff] %v7240_v24  ;;  %8325 = vst [vmem:[#allocation70_spill] sm:$0xff] %v7244_v18  ;;  %v2585_v5 = vmax.f32 %v6756_v32, 0.0  ;;  %v2586_v24 = vmax.f32 %v6760_v40, 0.0  ;;  %v2587_v27 = vmax.f32 %v6764_v43, 0.0  ;;  %v2588_v18 = vmax.f32 %v6768_v29, 0.0 }
 0x3a9   :  { %8322 = vst [vmem:[#allocation67_spill] sm:$0xff] %v7232_v56  ;;  %8326 = vst [vmem:[#allocation71_spill] sm:$0xff] %v7248_v33  ;;  %v2582_v56 = vmax.f32 %v6744_v20, 0.0  ;;  %v2589_v9 = vmax.f32 %v6772_v21, 0.0  ;;  %v2590_v33 = vmax.f32 %v6776_v61, 0.0  ;;  %v2591_v35 = vmax.f32 %v6780_v28, 0.0 }
 0x3aa   :  { %v2592_v22 = vmax.f32 %v6784_v0, 0.0  ;;  %v2593_v20 = vmax.f32 %v6788_v30, 0.0  ;;  %2712 = vst.msk [vmem:[%s7897_s5 + $0x10] sm:$0xff] %vm1258_vm2, %v2584_v10  ;;  %2713 = vst.msk [vmem:[%s7897_s5 + $0x18] sm:$0xff] %vm1258_vm2, %v2585_v5  ;;  %v2594_v46 = vmax.f32 %v6792_v8, 0.0  ;;  %v2595_v6 = vmax.f32 %v6796_v36, 0.0 }
 0x3ab   :  { %2710 = vst.msk [vmem:[%s7897_s5] sm:$0xff] %vm1258_vm2, %v2582_v56  ;;  %v2596_v32 = vmax.f32 %v6800_v39, 0.0  ;;  %v2597_v40 = vmax.f32 %v6804_v42, 0.0  ;;  %2714 = vst.msk [vmem:[%s7897_s5 + $0x20] sm:$0xff] %vm1258_vm2, %v2586_v24  ;;  %v2598_v43 = vmax.f32 %v6808_v34, 0.0  ;;  %v2599_v29 = vmax.f32 %v6812_v50, 0.0 }
 0x3ac   :  { %2715 = vst.msk [vmem:[%s7897_s5 + $0x28] sm:$0xff] %vm1258_vm2, %v2587_v27  ;;  %2716 = vst.msk [vmem:[%s7897_s5 + $0x30] sm:$0xff] %vm1258_vm2, %v2588_v18  ;;  %v2600_v21 = vmax.f32 %v6816_v4, 0.0  ;;  %v2601_v61 = vmax.f32 %v6820_v52, 0.0  ;;  %v2602_v28 = vmax.f32 %v6824_v58, 0.0  ;;  %v2603_v0 = vmax.f32 %v6828_v60, 0.0 }
 0x3ad   :  { %2717 = vst.msk [vmem:[%s7897_s5 + $0x38] sm:$0xff] %vm1258_vm2, %v2589_v9  ;;  %2718 = vst.msk [vmem:[%s7897_s5 + $0x40] sm:$0xff] %vm1258_vm2, %v2590_v33  ;;  %v2604_v30 = vmax.f32 %v6832_v53, 0.0  ;;  %v2605_v8 = vmax.f32 %v6836_v2, 0.0  ;;  %v2606_v36 = vmax.f32 %v6840_v23, 0.0  ;;  %v2607_v39 = vmax.f32 %v6844_v11, 0.0 }
 0x3ae   :  { %2719 = vst.msk [vmem:[%s7897_s5 + $0x48] sm:$0xff] %vm1258_vm2, %v2591_v35  ;;  %2720 = vst.msk [vmem:[%s7897_s5 + $0x50] sm:$0xff] %vm1258_vm2, %v2592_v22  ;;  %v2608_v42 = vmax.f32 %v6848_v3, 0.0  ;;  %v2609_v34 = vmax.f32 %v6852_v15, 0.0  ;;  %v2610_v50 = vmax.f32 %v6856_v38, 0.0  ;;  %v2611_v4 = vmax.f32 %v6860_v47, 0.0 }
 0x3af   :  { %2721 = vst.msk [vmem:[%s7897_s5 + $0x58] sm:$0xff] %vm1258_vm2, %v2593_v20  ;;  %2722 = vst.msk [vmem:[%s7897_s5 + $0x60] sm:$0xff] %vm1258_vm2, %v2594_v46  ;;  %v2612_v52 = vmax.f32 %v6864_v1, 0.0  ;;  %v2613_v58 = vmax.f32 %v6868_v41, 0.0  ;;  %v2614_v60 = vmax.f32 %v6872_v7, 0.0  ;;  %v2615_v53 = vmax.f32 %v6876_v62, 0.0 }
 0x3b0   :  { %2723 = vst.msk [vmem:[%s7897_s5 + $0x68] sm:$0xff] %vm1258_vm2, %v2595_v6  ;;  %2724 = vst.msk [vmem:[%s7897_s5 + $0x70] sm:$0xff] %vm1258_vm2, %v2596_v32  ;;  %v2616_v2 = vmax.f32 %v6880_v31, 0.0  ;;  %v2617_v23 = vmax.f32 %v6884_v57, 0.0  ;;  %v2618_v11 = vmax.f32 %v6888_v59, 0.0  ;;  %v2619_v3 = vmax.f32 %v6892_v37, 0.0 }
 0x3b1   :  { %2725 = vst.msk [vmem:[%s7897_s5 + $0x78] sm:$0xff] %vm1258_vm2, %v2597_v40  ;;  %2726 = vst.msk [vmem:[%s7897_s5 + $0x80] sm:$0xff] %vm1258_vm2, %v2598_v43  ;;  %v2620_v15 = vmax.f32 %v6896_v44, 0.0  ;;  %v2621_v38 = vmax.f32 %v6900_v14, 0.0  ;;  %v2622_v47 = vmax.f32 %v6904_v12, 0.0  ;;  %v2623_v1 = vmax.f32 %v6908_v49, 0.0 }
 0x3b2   :  { %2727 = vst.msk [vmem:[%s7897_s5 + $0x88] sm:$0xff] %vm1258_vm2, %v2599_v29  ;;  %2728 = vst.msk [vmem:[%s7897_s5 + $0x90] sm:$0xff] %vm1258_vm2, %v2600_v21  ;;  %v2624_v41 = vmax.f32 %v6912_v17, 0.0  ;;  %v2625_v7 = vmax.f32 %v6916_v48, 0.0  ;;  %v2626_v62 = vmax.f32 %v6920_v16, 0.0  ;;  %v2627_v31 = vmax.f32 %v6924_v63, 0.0 }
 0x3b3   :  { %2729 = vst.msk [vmem:[%s7897_s5 + $0x98] sm:$0xff] %vm1258_vm2, %v2601_v61  ;;  %2730 = vst.msk [vmem:[%s7897_s5 + $0xa0] sm:$0xff] %vm1258_vm2, %v2602_v28  ;;  %v2628_v57 = vmax.f32 %v6928_v25, 0.0  ;;  %v8327_v59 = vld [vmem:[#allocation73_spill] sm:$0xff]  ;;  %v8328_v44 = vld [vmem:[#allocation74_spill] sm:$0xff]  ;;  %v2637_v5 = vmax.f32 %v8335_v26, 0.0 }
 0x3b4   :  { %2731 = vst.msk [vmem:[%s7897_s5 + $0xa8] sm:$0xff] %vm1258_vm2, %v2603_v0  ;;  %2732 = vst.msk [vmem:[%s7897_s5 + $0xb0] sm:$0xff] %vm1258_vm2, %v2604_v30  ;;  %v2629_v37 = vmax.f32 %v8327_v59, 0.0  ;;  %v2630_v14 = vmax.f32 %v8328_v44, 0.0  ;;  %v8329_v12 = vld [vmem:[#allocation75_spill] sm:$0xff]  ;;  %v8330_v17 = vld [vmem:[#allocation76_spill] sm:$0xff] }
 0x3b5   :  { %2733 = vst.msk [vmem:[%s7897_s5 + $0xb8] sm:$0xff] %vm1258_vm2, %v2605_v8  ;;  %2734 = vst.msk [vmem:[%s7897_s5 + $0xc0] sm:$0xff] %vm1258_vm2, %v2606_v36  ;;  %v2631_v49 = vmax.f32 %v8329_v12, 0.0  ;;  %v2632_v48 = vmax.f32 %v8330_v17, 0.0  ;;  %v8331_v16 = vld [vmem:[#allocation77_spill] sm:$0xff]  ;;  %v8332_v25 = vld [vmem:[#allocation2_spill] sm:$0xff] }
 0x3b6   :  { %2735 = vst.msk [vmem:[%s7897_s5 + $0xc8] sm:$0xff] %vm1258_vm2, %v2607_v39  ;;  %2736 = vst.msk [vmem:[%s7897_s5 + $0xd0] sm:$0xff] %vm1258_vm2, %v2608_v42  ;;  %v2633_v63 = vmax.f32 %v8331_v16, 0.0  ;;  %v2634_v56 = vmax.f32 %v8332_v25, 0.0  ;;  %v8333_v10 = vld [vmem:[#allocation3_spill] sm:$0xff]  ;;  %v8334_v18 = vld [vmem:[#allocation4_spill] sm:$0xff] }
 0x3b7   :  { %2737 = vst.msk [vmem:[%s7897_s5 + $0xd8] sm:$0xff] %vm1258_vm2, %v2609_v34  ;;  %2738 = vst.msk [vmem:[%s7897_s5 + $0xe0] sm:$0xff] %vm1258_vm2, %v2610_v50  ;;  %v2635_v24 = vmax.f32 %v8333_v10, 0.0  ;;  %v2636_v33 = vmax.f32 %v8334_v18, 0.0  ;;  %v8336_v27 = vld [vmem:[#allocation6_spill] sm:$0xff]  ;;  %v8337_v35 = vld [vmem:[#allocation7_spill] sm:$0xff] }
 0x3b8   :  { %2739 = vst.msk [vmem:[%s7897_s5 + $0xe8] sm:$0xff] %vm1258_vm2, %v2611_v4  ;;  %2740 = vst.msk [vmem:[%s7897_s5 + $0xf0] sm:$0xff] %vm1258_vm2, %v2612_v52  ;;  %v2638_v9 = vmax.f32 %v8336_v27, 0.0  ;;  %v2639_v22 = vmax.f32 %v8337_v35, 0.0  ;;  %v8338_v20 = vld [vmem:[#allocation8_spill] sm:$0xff]  ;;  %v8339_v6 = vld [vmem:[#allocation9_spill] sm:$0xff] }
 0x3b9   :  { %2741 = vst.msk [vmem:[%s7897_s5 + $0xf8] sm:$0xff] %vm1258_vm2, %v2613_v58  ;;  %2742 = vst.msk [vmem:[%s7897_s5 + $0x100] sm:$0xff] %vm1258_vm2, %v2614_v60  ;;  %v2640_v46 = vmax.f32 %v8338_v20, 0.0  ;;  %v2641_v32 = vmax.f32 %v8339_v6, 0.0  ;;  %v8340_v40 = vld [vmem:[#allocation10_spill] sm:$0xff]  ;;  %v8341_v29 = vld [vmem:[#allocation11_spill] sm:$0xff] }
 0x3ba   :  { %2743 = vst.msk [vmem:[%s7897_s5 + $0x108] sm:$0xff] %vm1258_vm2, %v2615_v53  ;;  %2744 = vst.msk [vmem:[%s7897_s5 + $0x110] sm:$0xff] %vm1258_vm2, %v2616_v2  ;;  %v2642_v43 = vmax.f32 %v8340_v40, 0.0  ;;  %v2643_v21 = vmax.f32 %v8341_v29, 0.0  ;;  %v8342_v61 = vld [vmem:[#allocation12_spill] sm:$0xff]  ;;  %v8343_v0 = vld [vmem:[#allocation13_spill] sm:$0xff] }
 0x3bb   :  { %2745 = vst.msk [vmem:[%s7897_s5 + $0x118] sm:$0xff] %vm1258_vm2, %v2617_v23  ;;  %2746 = vst.msk [vmem:[%s7897_s5 + $0x120] sm:$0xff] %vm1258_vm2, %v2618_v11  ;;  %v2644_v28 = vmax.f32 %v8342_v61, 0.0  ;;  %v2645_v30 = vmax.f32 %v8343_v0, 0.0  ;;  %v8344_v8 = vld [vmem:[#allocation14_spill] sm:$0xff]  ;;  %v8345_v39 = vld [vmem:[#allocation15_spill] sm:$0xff] }
 0x3bc   :  { %2747 = vst.msk [vmem:[%s7897_s5 + $0x128] sm:$0xff] %vm1258_vm2, %v2619_v3  ;;  %2748 = vst.msk [vmem:[%s7897_s5 + $0x130] sm:$0xff] %vm1258_vm2, %v2620_v15  ;;  %v2646_v36 = vmax.f32 %v8344_v8, 0.0  ;;  %v2647_v42 = vmax.f32 %v8345_v39, 0.0  ;;  %v8346_v34 = vld [vmem:[#allocation16_spill] sm:$0xff]  ;;  %v8347_v4 = vld [vmem:[#allocation17_spill] sm:$0xff] }
 0x3bd   :  { %2749 = vst.msk [vmem:[%s7897_s5 + $0x138] sm:$0xff] %vm1258_vm2, %v2621_v38  ;;  %2750 = vst.msk [vmem:[%s7897_s5 + $0x140] sm:$0xff] %vm1258_vm2, %v2622_v47  ;;  %v2648_v50 = vmax.f32 %v8346_v34, 0.0  ;;  %v2649_v52 = vmax.f32 %v8347_v4, 0.0  ;;  %v8348_v58 = vld [vmem:[#allocation18_spill] sm:$0xff]  ;;  %v8349_v53 = vld [vmem:[#allocation19_spill] sm:$0xff] }
 0x3be   :  { %2751 = vst.msk [vmem:[%s7897_s5 + $0x148] sm:$0xff] %vm1258_vm2, %v2623_v1  ;;  %2752 = vst.msk [vmem:[%s7897_s5 + $0x150] sm:$0xff] %vm1258_vm2, %v2624_v41  ;;  %v2650_v60 = vmax.f32 %v8348_v58, 0.0  ;;  %v2651_v2 = vmax.f32 %v8349_v53, 0.0  ;;  %v8350_v23 = vld [vmem:[#allocation20_spill] sm:$0xff]  ;;  %v8351_v3 = vld [vmem:[#allocation21_spill] sm:$0xff] }
 0x3bf   :  { %2753 = vst.msk [vmem:[%s7897_s5 + $0x158] sm:$0xff] %vm1258_vm2, %v2625_v7  ;;  %2754 = vst.msk [vmem:[%s7897_s5 + $0x160] sm:$0xff] %vm1258_vm2, %v2626_v62  ;;  %v2652_v11 = vmax.f32 %v8350_v23, 0.0  ;;  %v2653_v15 = vmax.f32 %v8351_v3, 0.0  ;;  %v8352_v38 = vld [vmem:[#allocation22_spill] sm:$0xff]  ;;  %v8353_v1 = vld [vmem:[#allocation23_spill] sm:$0xff] }
 0x3c0   :  { %2755 = vst.msk [vmem:[%s7897_s5 + $0x168] sm:$0xff] %vm1258_vm2, %v2627_v31  ;;  %2756 = vst.msk [vmem:[%s7897_s5 + $0x170] sm:$0xff] %vm1258_vm2, %v2628_v57  ;;  %v2654_v47 = vmax.f32 %v8352_v38, 0.0  ;;  %v2655_v41 = vmax.f32 %v8353_v1, 0.0  ;;  %v8354_v7 = vld [vmem:[#allocation24_spill] sm:$0xff]  ;;  %v8355_v31 = vld [vmem:[#allocation25_spill] sm:$0xff] }
 0x3c1   :  { %2757 = vst.msk [vmem:[%s7897_s5 + $0x178] sm:$0xff] %vm1258_vm2, %v2629_v37  ;;  %2758 = vst.msk [vmem:[%s7897_s5 + $0x180] sm:$0xff] %vm1258_vm2, %v2630_v14  ;;  %v2656_v62 = vmax.f32 %v8354_v7, 0.0  ;;  %v2657_v57 = vmax.f32 %v8355_v31, 0.0  ;;  %v8356_v59 = vld [vmem:[#allocation26_spill] sm:$0xff]  ;;  %v8357_v44 = vld [vmem:[#allocation27_spill] sm:$0xff] }
 0x3c2   :  { %2759 = vst.msk [vmem:[%s7897_s5 + $0x188] sm:$0xff] %vm1258_vm2, %v2631_v49  ;;  %2760 = vst.msk [vmem:[%s7897_s5 + $0x190] sm:$0xff] %vm1258_vm2, %v2632_v48  ;;  %v2658_v37 = vmax.f32 %v8356_v59, 0.0  ;;  %v2659_v14 = vmax.f32 %v8357_v44, 0.0  ;;  %v8358_v12 = vld [vmem:[#allocation28_spill] sm:$0xff]  ;;  %v8359_v17 = vld [vmem:[#allocation29_spill] sm:$0xff] }
 0x3c3   :  { %2761 = vst.msk [vmem:[%s7897_s5 + $0x198] sm:$0xff] %vm1258_vm2, %v2633_v63  ;;  %2762 = vst.msk [vmem:[%s7897_s5 + $0x1a0] sm:$0xff] %vm1258_vm2, %v2634_v56  ;;  %v2660_v49 = vmax.f32 %v8358_v12, 0.0  ;;  %v2661_v48 = vmax.f32 %v8359_v17, 0.0  ;;  %v8360_v16 = vld [vmem:[#allocation30_spill] sm:$0xff]  ;;  %v8361_v25 = vld [vmem:[#allocation31_spill] sm:$0xff] }
 0x3c4   :  { %2763 = vst.msk [vmem:[%s7897_s5 + $0x1a8] sm:$0xff] %vm1258_vm2, %v2635_v24  ;;  %2764 = vst.msk [vmem:[%s7897_s5 + $0x1b0] sm:$0xff] %vm1258_vm2, %v2636_v33  ;;  %v2662_v63 = vmax.f32 %v8360_v16, 0.0  ;;  %v2663_v56 = vmax.f32 %v8361_v25, 0.0  ;;  %v8362_v10 = vld [vmem:[#allocation32_spill] sm:$0xff]  ;;  %v8363_v18 = vld [vmem:[#allocation33_spill] sm:$0xff] }
 0x3c5   :  { %2765 = vst.msk [vmem:[%s7897_s5 + $0x1b8] sm:$0xff] %vm1258_vm2, %v2637_v5  ;;  %2766 = vst.msk [vmem:[%s7897_s5 + $0x1c0] sm:$0xff] %vm1258_vm2, %v2638_v9  ;;  %v2664_v24 = vmax.f32 %v8362_v10, 0.0  ;;  %v2665_v33 = vmax.f32 %v8363_v18, 0.0  ;;  %v8364_v26 = vld [vmem:[#allocation34_spill] sm:$0xff]  ;;  %v8365_v27 = vld [vmem:[#allocation35_spill] sm:$0xff] }
 0x3c6   :  { %2767 = vst.msk [vmem:[%s7897_s5 + $0x1c8] sm:$0xff] %vm1258_vm2, %v2639_v22  ;;  %2768 = vst.msk [vmem:[%s7897_s5 + $0x1d0] sm:$0xff] %vm1258_vm2, %v2640_v46  ;;  %v2666_v5 = vmax.f32 %v8364_v26, 0.0  ;;  %v2667_v9 = vmax.f32 %v8365_v27, 0.0  ;;  %v8366_v35 = vld [vmem:[#allocation36_spill] sm:$0xff]  ;;  %v8367_v20 = vld [vmem:[#allocation37_spill] sm:$0xff] }
 0x3c7   :  { %2769 = vst.msk [vmem:[%s7897_s5 + $0x1d8] sm:$0xff] %vm1258_vm2, %v2641_v32  ;;  %2770 = vst.msk [vmem:[%s7897_s5 + $0x1e0] sm:$0xff] %vm1258_vm2, %v2642_v43  ;;  %v2668_v22 = vmax.f32 %v8366_v35, 0.0  ;;  %v2669_v46 = vmax.f32 %v8367_v20, 0.0  ;;  %v8368_v6 = vld [vmem:[#allocation38_spill] sm:$0xff]  ;;  %v8369_v40 = vld [vmem:[#allocation39_spill] sm:$0xff] }
 0x3c8   :  { %2771 = vst.msk [vmem:[%s7897_s5 + $0x1e8] sm:$0xff] %vm1258_vm2, %v2643_v21  ;;  %2772 = vst.msk [vmem:[%s7897_s5 + $0x1f0] sm:$0xff] %vm1258_vm2, %v2644_v28  ;;  %v2670_v32 = vmax.f32 %v8368_v6, 0.0  ;;  %v2671_v43 = vmax.f32 %v8369_v40, 0.0  ;;  %v8370_v29 = vld [vmem:[#allocation40_spill] sm:$0xff]  ;;  %v8371_v61 = vld [vmem:[#allocation41_spill] sm:$0xff] }
 0x3c9   :  { %2773 = vst.msk [vmem:[%s7897_s5 + $0x1f8] sm:$0xff] %vm1258_vm2, %v2645_v30  ;;  %2774 = vst.msk [vmem:[%s7897_s5 + $0x200] sm:$0xff] %vm1258_vm2, %v2646_v36  ;;  %v2672_v21 = vmax.f32 %v8370_v29, 0.0  ;;  %v2673_v28 = vmax.f32 %v8371_v61, 0.0  ;;  %v8372_v0 = vld [vmem:[#allocation42_spill] sm:$0xff]  ;;  %v8373_v8 = vld [vmem:[#allocation43_spill] sm:$0xff] }
 0x3ca   :  { %2775 = vst.msk [vmem:[%s7897_s5 + $0x208] sm:$0xff] %vm1258_vm2, %v2647_v42  ;;  %2776 = vst.msk [vmem:[%s7897_s5 + $0x210] sm:$0xff] %vm1258_vm2, %v2648_v50  ;;  %v2674_v30 = vmax.f32 %v8372_v0, 0.0  ;;  %v2675_v36 = vmax.f32 %v8373_v8, 0.0  ;;  %v8374_v39 = vld [vmem:[#allocation44_spill] sm:$0xff]  ;;  %v8375_v34 = vld [vmem:[#allocation45_spill] sm:$0xff] }
 0x3cb   :  { %2777 = vst.msk [vmem:[%s7897_s5 + $0x218] sm:$0xff] %vm1258_vm2, %v2649_v52  ;;  %2778 = vst.msk [vmem:[%s7897_s5 + $0x220] sm:$0xff] %vm1258_vm2, %v2650_v60  ;;  %v2676_v42 = vmax.f32 %v8374_v39, 0.0  ;;  %v2677_v50 = vmax.f32 %v8375_v34, 0.0  ;;  %v8376_v4 = vld [vmem:[#allocation46_spill] sm:$0xff]  ;;  %v8377_v58 = vld [vmem:[#allocation47_spill] sm:$0xff] }
 0x3cc   :  { %2779 = vst.msk [vmem:[%s7897_s5 + $0x228] sm:$0xff] %vm1258_vm2, %v2651_v2  ;;  %2780 = vst.msk [vmem:[%s7897_s5 + $0x230] sm:$0xff] %vm1258_vm2, %v2652_v11  ;;  %v2678_v52 = vmax.f32 %v8376_v4, 0.0  ;;  %v2679_v60 = vmax.f32 %v8377_v58, 0.0  ;;  %v8378_v53 = vld [vmem:[#allocation48_spill] sm:$0xff]  ;;  %v8379_v23 = vld [vmem:[#allocation49_spill] sm:$0xff] }
 0x3cd   :  { %2781 = vst.msk [vmem:[%s7897_s5 + $0x238] sm:$0xff] %vm1258_vm2, %v2653_v15  ;;  %2782 = vst.msk [vmem:[%s7897_s5 + $0x240] sm:$0xff] %vm1258_vm2, %v2654_v47  ;;  %v2680_v2 = vmax.f32 %v8378_v53, 0.0  ;;  %v2681_v11 = vmax.f32 %v8379_v23, 0.0  ;;  %v8380_v3 = vld [vmem:[#allocation50_spill] sm:$0xff]  ;;  %v8381_v38 = vld [vmem:[#allocation51_spill] sm:$0xff] }
 0x3ce   :  { %2783 = vst.msk [vmem:[%s7897_s5 + $0x248] sm:$0xff] %vm1258_vm2, %v2655_v41  ;;  %2784 = vst.msk [vmem:[%s7897_s5 + $0x250] sm:$0xff] %vm1258_vm2, %v2656_v62  ;;  %v2682_v15 = vmax.f32 %v8380_v3, 0.0  ;;  %v2683_v47 = vmax.f32 %v8381_v38, 0.0  ;;  %v8382_v1 = vld [vmem:[#allocation52_spill] sm:$0xff]  ;;  %v8383_v7 = vld [vmem:[#allocation53_spill] sm:$0xff] }
 0x3cf   :  { %2785 = vst.msk [vmem:[%s7897_s5 + $0x258] sm:$0xff] %vm1258_vm2, %v2657_v57  ;;  %2786 = vst.msk [vmem:[%s7897_s5 + $0x260] sm:$0xff] %vm1258_vm2, %v2658_v37  ;;  %v2684_v41 = vmax.f32 %v8382_v1, 0.0  ;;  %v2685_v62 = vmax.f32 %v8383_v7, 0.0  ;;  %v8384_v31 = vld [vmem:[#allocation54_spill] sm:$0xff]  ;;  %v8385_v59 = vld [vmem:[#allocation55_spill] sm:$0xff] }
 0x3d0   :  { %2787 = vst.msk [vmem:[%s7897_s5 + $0x268] sm:$0xff] %vm1258_vm2, %v2659_v14  ;;  %2788 = vst.msk [vmem:[%s7897_s5 + $0x270] sm:$0xff] %vm1258_vm2, %v2660_v49  ;;  %v2686_v57 = vmax.f32 %v8384_v31, 0.0  ;;  %v2687_v37 = vmax.f32 %v8385_v59, 0.0  ;;  %v8386_v44 = vld [vmem:[#allocation56_spill] sm:$0xff]  ;;  %v8387_v12 = vld [vmem:[#allocation57_spill] sm:$0xff] }
 0x3d1   :  { %2789 = vst.msk [vmem:[%s7897_s5 + $0x278] sm:$0xff] %vm1258_vm2, %v2661_v48  ;;  %2790 = vst.msk [vmem:[%s7897_s5 + $0x280] sm:$0xff] %vm1258_vm2, %v2662_v63  ;;  %v2688_v14 = vmax.f32 %v8386_v44, 0.0  ;;  %v2689_v49 = vmax.f32 %v8387_v12, 0.0  ;;  %v8388_v17 = vld [vmem:[#allocation58_spill] sm:$0xff]  ;;  %v8389_v16 = vld [vmem:[#allocation59_spill] sm:$0xff] }
 0x3d2   :  { %2791 = vst.msk [vmem:[%s7897_s5 + $0x288] sm:$0xff] %vm1258_vm2, %v2663_v56  ;;  %2792 = vst.msk [vmem:[%s7897_s5 + $0x290] sm:$0xff] %vm1258_vm2, %v2664_v24  ;;  %v2690_v48 = vmax.f32 %v8388_v17, 0.0  ;;  %v2691_v63 = vmax.f32 %v8389_v16, 0.0  ;;  %v8390_v25 = vld [vmem:[#allocation60_spill] sm:$0xff]  ;;  %v8391_v10 = vld [vmem:[#allocation61_spill] sm:$0xff] }
 0x3d3   :  { %2793 = vst.msk [vmem:[%s7897_s5 + $0x298] sm:$0xff] %vm1258_vm2, %v2665_v33  ;;  %2794 = vst.msk [vmem:[%s7897_s5 + $0x2a0] sm:$0xff] %vm1258_vm2, %v2666_v5  ;;  %v2692_v56 = vmax.f32 %v8390_v25, 0.0  ;;  %v2693_v24 = vmax.f32 %v8391_v10, 0.0  ;;  %v8392_v18 = vld [vmem:[#allocation62_spill] sm:$0xff]  ;;  %v8393_v26 = vld [vmem:[#allocation63_spill] sm:$0xff] }
 0x3d4   :  { %2795 = vst.msk [vmem:[%s7897_s5 + $0x2a8] sm:$0xff] %vm1258_vm2, %v2667_v9  ;;  %2796 = vst.msk [vmem:[%s7897_s5 + $0x2b0] sm:$0xff] %vm1258_vm2, %v2668_v22  ;;  %v2694_v33 = vmax.f32 %v8392_v18, 0.0  ;;  %v2695_v5 = vmax.f32 %v8393_v26, 0.0  ;;  %v8394_v27 = vld [vmem:[#allocation64_spill] sm:$0xff]  ;;  %v8395_v35 = vld [vmem:[#allocation65_spill] sm:$0xff] }
 0x3d5   :  { %2797 = vst.msk [vmem:[%s7897_s5 + $0x2b8] sm:$0xff] %vm1258_vm2, %v2669_v46  ;;  %2798 = vst.msk [vmem:[%s7897_s5 + $0x2c0] sm:$0xff] %vm1258_vm2, %v2670_v32  ;;  %v2696_v9 = vmax.f32 %v8394_v27, 0.0  ;;  %v2697_v22 = vmax.f32 %v8395_v35, 0.0  ;;  %v8396_v20 = vld [vmem:[#allocation66_spill] sm:$0xff]  ;;  %v2699_v6 = vmax.f32 %v7212_v45, 0.0 }
 0x3d6   :  { %2799 = vst.msk [vmem:[%s7897_s5 + $0x2c8] sm:$0xff] %vm1258_vm2, %v2671_v43  ;;  %2800 = vst.msk [vmem:[%s7897_s5 + $0x2d0] sm:$0xff] %vm1258_vm2, %v2672_v21  ;;  %v2698_v46 = vmax.f32 %v8396_v20, 0.0  ;;  %v2700_v32 = vmax.f32 %v7216_v51, 0.0  ;;  %v2701_v40 = vmax.f32 %v7220_v55, 0.0  ;;  %v2702_v45 = vmax.f32 %v7224_v19, 0.0 }
 0x3d7   :  { %2801 = vst.msk [vmem:[%s7897_s5 + $0x2d8] sm:$0xff] %vm1258_vm2, %v2673_v28  ;;  %2802 = vst.msk [vmem:[%s7897_s5 + $0x2e0] sm:$0xff] %vm1258_vm2, %v2674_v30  ;;  %v2703_v51 = vmax.f32 %v7228_v54, 0.0  ;;  %v8397_v55 = vld [vmem:[#allocation67_spill] sm:$0xff]  ;;  %v8398_v29 = vld [vmem:[#allocation68_spill] sm:$0xff]  ;;  %v2709_v8 = vmax.f32 %v7252_v13, 0.0 }
 0x3d8   :  { %2803 = vst.msk [vmem:[%s7897_s5 + $0x2e8] sm:$0xff] %vm1258_vm2, %v2675_v36  ;;  %2804 = vst.msk [vmem:[%s7897_s5 + $0x2f0] sm:$0xff] %vm1258_vm2, %v2676_v42  ;;  %v2704_v43 = vmax.f32 %v8397_v55, 0.0  ;;  %v2705_v21 = vmax.f32 %v8398_v29, 0.0  ;;  %v8399_v19 = vld [vmem:[#allocation69_spill] sm:$0xff]  ;;  %v8400_v61 = vld [vmem:[#allocation70_spill] sm:$0xff] }
 0x3d9   :  { %2805 = vst.msk [vmem:[%s7897_s5 + $0x2f8] sm:$0xff] %vm1258_vm2, %v2677_v50  ;;  %2806 = vst.msk [vmem:[%s7897_s5 + $0x300] sm:$0xff] %vm1258_vm2, %v2678_v52  ;;  %v2706_v54 = vmax.f32 %v8399_v19, 0.0  ;;  %v2707_v28 = vmax.f32 %v8400_v61, 0.0  ;;  %v8401_v0 = vld [vmem:[#allocation71_spill] sm:$0xff] }
 0x3da   :  { %2807 = vst.msk [vmem:[%s7897_s5 + $0x308] sm:$0xff] %vm1258_vm2, %v2679_v60  ;;  %2808 = vst.msk [vmem:[%s7897_s5 + $0x310] sm:$0xff] %vm1258_vm2, %v2680_v2  ;;  %v2708_v30 = vmax.f32 %v8401_v0, 0.0 }
 0x3db   :  { %2809 = vst.msk [vmem:[%s7897_s5 + $0x318] sm:$0xff] %vm1258_vm2, %v2681_v11  ;;  %2810 = vst.msk [vmem:[%s7897_s5 + $0x320] sm:$0xff] %vm1258_vm2, %v2682_v15 }
 0x3dc   :  { %2811 = vst.msk [vmem:[%s7897_s5 + $0x328] sm:$0xff] %vm1258_vm2, %v2683_v47  ;;  %2812 = vst.msk [vmem:[%s7897_s5 + $0x330] sm:$0xff] %vm1258_vm2, %v2684_v41 }
 0x3dd   :  { %2813 = vst.msk [vmem:[%s7897_s5 + $0x338] sm:$0xff] %vm1258_vm2, %v2685_v62  ;;  %2814 = vst.msk [vmem:[%s7897_s5 + $0x340] sm:$0xff] %vm1258_vm2, %v2686_v57 }
 0x3de   :  { %2815 = vst.msk [vmem:[%s7897_s5 + $0x348] sm:$0xff] %vm1258_vm2, %v2687_v37  ;;  %2816 = vst.msk [vmem:[%s7897_s5 + $0x350] sm:$0xff] %vm1258_vm2, %v2688_v14 }
 0x3df   :  { %2817 = vst.msk [vmem:[%s7897_s5 + $0x358] sm:$0xff] %vm1258_vm2, %v2689_v49  ;;  %2818 = vst.msk [vmem:[%s7897_s5 + $0x360] sm:$0xff] %vm1258_vm2, %v2690_v48 }
 0x3e0   :  { %2819 = vst.msk [vmem:[%s7897_s5 + $0x368] sm:$0xff] %vm1258_vm2, %v2691_v63  ;;  %2820 = vst.msk [vmem:[%s7897_s5 + $0x370] sm:$0xff] %vm1258_vm2, %v2692_v56 }
 0x3e1   :  { %2821 = vst.msk [vmem:[%s7897_s5 + $0x378] sm:$0xff] %vm1258_vm2, %v2693_v24  ;;  %2822 = vst.msk [vmem:[%s7897_s5 + $0x380] sm:$0xff] %vm1258_vm2, %v2694_v33 }
 0x3e2   :  { %2823 = vst.msk [vmem:[%s7897_s5 + $0x388] sm:$0xff] %vm1258_vm2, %v2695_v5  ;;  %2824 = vst.msk [vmem:[%s7897_s5 + $0x390] sm:$0xff] %vm1258_vm2, %v2696_v9 }
 0x3e3   :  { %2825 = vst.msk [vmem:[%s7897_s5 + $0x398] sm:$0xff] %vm1258_vm2, %v2697_v22  ;;  %2826 = vst.msk [vmem:[%s7897_s5 + $0x3a0] sm:$0xff] %vm1258_vm2, %v2698_v46 }
 0x3e4   :  { %2827 = vst.msk [vmem:[%s7897_s5 + $0x3a8] sm:$0xff] %vm1258_vm2, %v2699_v6  ;;  %2828 = vst.msk [vmem:[%s7897_s5 + $0x3b0] sm:$0xff] %vm1258_vm2, %v2700_v32 }
 0x3e5   :  { %2829 = vst.msk [vmem:[%s7897_s5 + $0x3b8] sm:$0xff] %vm1258_vm2, %v2701_v40  ;;  %2830 = vst.msk [vmem:[%s7897_s5 + $0x3c0] sm:$0xff] %vm1258_vm2, %v2702_v45 }
 0x3e6   :  { %2831 = vst.msk [vmem:[%s7897_s5 + $0x3c8] sm:$0xff] %vm1258_vm2, %v2703_v51  ;;  %2832 = vst.msk [vmem:[%s7897_s5 + $0x3d0] sm:$0xff] %vm1258_vm2, %v2704_v43 }
 0x3e7   :  { %2833 = vst.msk [vmem:[%s7897_s5 + $0x3d8] sm:$0xff] %vm1258_vm2, %v2705_v21  ;;  %2834 = vst.msk [vmem:[%s7897_s5 + $0x3e0] sm:$0xff] %vm1258_vm2, %v2706_v54 }
 0x3e8   :  { %2835 = vst.msk [vmem:[%s7897_s5 + $0x3e8] sm:$0xff] %vm1258_vm2, %v2707_v28  ;;  %2836 = vst.msk [vmem:[%s7897_s5 + $0x3f0] sm:$0xff] %vm1258_vm2, %v2708_v30 }
 0x3e9   :  { %2837 = vst.msk [vmem:[%s7897_s5 + $0x3f8] sm:$0xff] %vm1258_vm2, %v2709_v8 }

// kernel: conv3dnet_forward.5
= control target key start
LH: loop header
LB: loop body
LE: loop exit
PB: predicated region body
PF: predicated region fallthrough
CT: control target
= control target key end

     0   :  { %vm57_vm0 = vcmask 883712   ;;  %vm106_vm1 = vcmask 1043456   ;;  %vm646_vm2 = vmmov 1   ;;  %vm257_vm4 = vcmask 64512   ;;  %s1099_s1 = inlined_call_operand.vmem [shape: f32[108,8], index: 1, kind: input, shape index: {}]   ;;  %s1100_s0 = inlined_call_operand.vmem [shape: f32[128,108], index: 0, kind: input, shape index: {}]   ;;  %s1101_s2 = inlined_call_operand.vmem [shape: f32[1,8], index: 2, kind: input, shape index: {}]   ;;  %s1102_s5 = inlined_call_operand.vmem [shape: f32[128,8], index: 5, kind: output, shape index: {}]   ;;  %s1103_s3 = inlined_call_operand.vmem [shape: f32[1,8], index: 3, kind: input, shape index: {}]   ;;  %s1104_s4 = inlined_call_operand.vmem [shape: f32[1,8], index: 4, kind: input, shape index: {}]  }
   0x1   :  { %v36_v0 = vld [vmem:[%s1099_s1] sm:$0xff]  ;;  %v37_v1 = vld [vmem:[%s1099_s1 + $0x8] sm:$0xff]  ;;  %v38_v2 = vld [vmem:[%s1099_s1 + $0x10] sm:$0xff] }
   0x2   :  { %v597_v3 = vpack.c.bf16 %v37_v1, %v36_v0  ;;  %v39_v4 = vld [vmem:[%s1099_s1 + $0x18] sm:$0xff]  ;;  %v40_v6 = vld [vmem:[%s1099_s1 + $0x20] sm:$0xff]  ;;  %v41_v7 = vld [vmem:[%s1099_s1 + $0x28] sm:$0xff] }
   0x3   :  { %v601_v5 = vpack.c.bf16 %v39_v4, %v38_v2  ;;  %v605_v8 = vpack.c.bf16 %v41_v7, %v40_v6  ;;  %v20_v9 = vld [vmem:[%s1100_s0] sm:$0xff]  ;;  %v42_v10 = vld [vmem:[%s1099_s1 + $0x30] sm:$0xff]  ;;  %v43_v11 = vld [vmem:[%s1099_s1 + $0x38] sm:$0xff] }
   0x4   :  { %598 = vmatprep.subr.bf16.mxu0 %v597_v3  ;;  %627 = vmatprep.subr.bf16.mxu1 %v597_v3  ;;  %v28_v12 = vld [vmem:[%s1100_s0 + $0x40] sm:$0xff]  ;;  %v609_v13 = vpack.c.bf16 %v43_v11, %v42_v10  ;;  %v45_v15 = vld [vmem:[%s1099_s1 + $0x48] sm:$0xff]  ;;  %v46_v17 = vld [vmem:[%s1099_s1 + $0x50] sm:$0xff] }
   0x5   :  { %600 = vmatpush3.bf16.msra.mxu0 %v597_v3  ;;  %634 = vmatpush3.bf16.msra.mxu1 %v597_v3  ;;  %v44_v14 = vld [vmem:[%s1099_s1 + $0x40] sm:$0xff]  ;;  %v47_v18 = vld [vmem:[%s1099_s1 + $0x58] sm:$0xff]  ;;  %v49_v21 = vld [vmem:[%s1099_s1 + $0x68] sm:$0xf] }
   0x6   :  { %602 = vmatprep.subr.bf16.mxu0 %v601_v5  ;;  %628 = vmatprep.subr.bf16.mxu1 %v601_v5  ;;  %v613_v16 = vpack.c.bf16 %v45_v15, %v44_v14  ;;  %v617_v19 = vpack.c.bf16 %v47_v18, %v46_v17  ;;  %v48_v20 = vld [vmem:[%s1099_s1 + $0x60] sm:$0xff]  ;;  %vm622_vm3 = vmpackc.low %vm106_vm1, %vm646_vm2  ;;  %v21_v23 = vld [vmem:[%s1100_s0 + $0x8] sm:$0xff] }
   0x7   :  { %573 = vmatprep.mubr.msk.f32.mxu0 %vm57_vm0, %v20_v9  ;;  %585 = vmatprep.mubr.msk.f32.mxu1 %vm57_vm0, %v28_v12  ;;  %v621_v22 = vpack.c.bf16 %v49_v21, %v48_v20  ;;  %v29_v24 = vld [vmem:[%s1100_s0 + $0x48] sm:$0xff]  ;;  %v22_v25 = vld [vmem:[%s1100_s0 + $0x10] sm:$0xff]  ;;  %v23_v27 = vld [vmem:[%s1100_s0 + $0x18] sm:$0xff] }
   0x8   :  { %v30_v26 = vld [vmem:[%s1100_s0 + $0x50] sm:$0xff]  ;;  %v31_v28 = vld [vmem:[%s1100_s0 + $0x58] sm:$0xff]  ;;  %v24_v29 = vld [vmem:[%s1100_s0 + $0x20] sm:$0xff] }
   0x9   :  { %604 = vmatpush3.bf16.msra.mxu0 %v601_v5  ;;  %635 = vmatpush3.bf16.msra.mxu1 %v601_v5  ;;  %v32_v30 = vld [vmem:[%s1100_s0 + $0x60] sm:$0xff]  ;;  %v25_v31 = vld [vmem:[%s1100_s0 + $0x28] sm:$0xff]  ;;  %v26_v33 = vld [vmem:[%s1100_s0 + $0x30] sm:$0xff] }
   0xa   :  { %606 = vmatprep.subr.bf16.mxu0 %v605_v8  ;;  %629 = vmatprep.subr.bf16.mxu1 %v605_v8  ;;  %v33_v32 = vld [vmem:[%s1100_s0 + $0x68] sm:$0xff]  ;;  %v34_v34 = vld [vmem:[%s1100_s0 + $0x70] sm:$0xff]  ;;  %v27_v35 = vld [vmem:[%s1100_s0 + $0x38] sm:$0xff] }
   0xb   :  { %v35_v36 = vld [vmem:[%s1100_s0 + $0x78] sm:$0xff]  ;;  %v497_v37 = vld [vmem:[%s1101_s2] ss:$0 sm:$0xff] }
   0xd   :  { %608 = vmatpush3.bf16.msra.mxu0 %v605_v8  ;;  %636 = vmatpush3.bf16.msra.mxu1 %v605_v8 }
   0xe   :  { %610 = vmatprep.subr.bf16.mxu0 %v609_v13  ;;  %630 = vmatprep.subr.bf16.mxu1 %v609_v13 }
  0x11   :  { %612 = vmatpush3.bf16.msra.mxu0 %v609_v13  ;;  %637 = vmatpush3.bf16.msra.mxu1 %v609_v13 }
  0x12   :  { %614 = vmatprep.subr.bf16.mxu0 %v613_v16  ;;  %631 = vmatprep.subr.bf16.mxu1 %v613_v16 }
  0x15   :  { %616 = vmatpush3.bf16.msra.mxu0 %v613_v16  ;;  %638 = vmatpush3.bf16.msra.mxu1 %v613_v16 }
  0x16   :  { %618 = vmatprep.subr.bf16.mxu0 %v617_v19  ;;  %632 = vmatprep.subr.bf16.mxu1 %v617_v19 }
  0x19   :  { %620 = vmatpush3.bf16.msra.mxu0 %v617_v19  ;;  %639 = vmatpush3.bf16.msra.mxu1 %v617_v19 }
  0x1a   :  { %623 = vmatprep.subr.msk.bf16.mxu0 %vm622_vm3, %v621_v22  ;;  %633 = vmatprep.subr.msk.bf16.mxu1 %vm622_vm3, %v621_v22 }
  0x1d   :  { %626 = vmatpush3.bf16.msk.msra.mxu0 %vm622_vm3, %v621_v22  ;;  %640 = vmatpush3.bf16.msk.msra.mxu1 %vm622_vm3, %v621_v22 }
  0x20   :  { %574 = vmatmul.mubr.msk.f32.vlgmr.msra.gmra.mrb[0].mxu0 %vm57_vm0, %v21_v23  ;;  %586 = vmatmul.mubr.msk.f32.vlgmr.msra.gmra.mrb[0].mxu1 %vm57_vm0, %v29_v24 }
  0x21   :  { %576 = vmatprep.mubr.msk.f32.mxu0 %vm57_vm0, %v22_v25  ;;  %588 = vmatprep.mubr.msk.f32.mxu1 %vm57_vm0, %v30_v26 }
  0x24   :  { %577 = vmatmul.mubr.msk.f32.gmra.mrb[2].mxu0 %vm57_vm0, %v23_v27  ;;  %589 = vmatmul.mubr.msk.f32.gmra.mrb[2].mxu1 %vm57_vm0, %v31_v28 }
  0x25   :  { %579 = vmatprep.mubr.msk.f32.mxu0 %vm57_vm0, %v24_v29  ;;  %591 = vmatprep.mubr.msk.f32.mxu1 %vm57_vm0, %v32_v30 }
  0x28   :  { %580 = vmatmul.mubr.msk.f32.gmra.mrb[4].mxu0 %vm57_vm0, %v25_v31  ;;  %592 = vmatmul.mubr.msk.f32.gmra.mrb[4].mxu1 %vm57_vm0, %v33_v32 }
  0x29   :  { %582 = vmatprep.mubr.msk.f32.mxu0 %vm57_vm0, %v26_v33  ;;  %594 = vmatprep.mubr.msk.f32.mxu1 %vm57_vm0, %v34_v34 }
  0x2c   :  { %583 = vmatmul.mubr.msk.f32.gmra.mrb[6].mxu0 %vm57_vm0, %v27_v35  ;;  %595 = vmatmul.mubr.msk.f32.gmra.mrb[6].mxu1 %vm57_vm0, %v35_v36 }
  0xf3   :  { %v575_v38 = vpop.f32.mrb[0].mxu0  ;;  %v587_v39 = vpop.f32.mrb[0].mxu1 }
  0xf4   :  { %v182_v40 = vadd.f32 %v575_v38, %v497_v37  ;;  %v176_v41 = vpop.f32.mrb[1].mxu0  ;;  %v222_v42 = vadd.f32 %v587_v39, %v497_v37  ;;  %v216_v43 = vpop.f32.mrb[1].mxu1 }
  0xf5   :  { %v177_v44 = vadd.f32 %v497_v37, %v176_v41  ;;  %v217_v45 = vadd.f32 %v497_v37, %v216_v43 }
  0xf6   :  { %259 = vst.msk [vmem:[%s1102_s5 + $0x8] sm:$0xff] %vm257_vm4, %v182_v40  ;;  %267 = vst.msk [vmem:[%s1102_s5 + $0x48] sm:$0xff] %vm257_vm4, %v222_v42 }
  0xf7   :  { %258 = vst.msk [vmem:[%s1102_s5] sm:$0xff] %vm257_vm4, %v177_v44  ;;  %v578_v46 = vpop.f32.mrb[2].mxu0  ;;  %266 = vst.msk [vmem:[%s1102_s5 + $0x40] sm:$0xff] %vm257_vm4, %v217_v45  ;;  %v590_v47 = vpop.f32.mrb[2].mxu1 }
  0xf8   :  { %v192_v48 = vadd.f32 %v578_v46, %v497_v37  ;;  %v186_v49 = vpop.f32.mrb[3].mxu0  ;;  %v232_v50 = vadd.f32 %v590_v47, %v497_v37  ;;  %v226_v51 = vpop.f32.mrb[3].mxu1 }
  0xf9   :  { %v187_v52 = vadd.f32 %v497_v37, %v186_v49  ;;  %v227_v53 = vadd.f32 %v497_v37, %v226_v51 }
  0xfa   :  { %261 = vst.msk [vmem:[%s1102_s5 + $0x18] sm:$0xff] %vm257_vm4, %v192_v48  ;;  %269 = vst.msk [vmem:[%s1102_s5 + $0x58] sm:$0xff] %vm257_vm4, %v232_v50 }
  0xfb   :  { %260 = vst.msk [vmem:[%s1102_s5 + $0x10] sm:$0xff] %vm257_vm4, %v187_v52  ;;  %v581_v54 = vpop.f32.mrb[4].mxu0  ;;  %268 = vst.msk [vmem:[%s1102_s5 + $0x50] sm:$0xff] %vm257_vm4, %v227_v53  ;;  %v593_v55 = vpop.f32.mrb[4].mxu1 }
  0xfc   :  { %v202_v56 = vadd.f32 %v581_v54, %v497_v37  ;;  %v196_v57 = vpop.f32.mrb[5].mxu0  ;;  %v242_v58 = vadd.f32 %v593_v55, %v497_v37  ;;  %v236_v59 = vpop.f32.mrb[5].mxu1 }
  0xfd   :  { %v821_v60 = vld [vmem:[%s1102_s5 + $0x8] sm:$0xff]  ;;  %v197_v61 = vadd.f32 %v497_v37, %v196_v57  ;;  %v237_v62 = vadd.f32 %v497_v37, %v236_v59 }
  0xfe   :  { %v826_v63 = vld [vmem:[%s1102_s5] sm:$0xff]  ;;  %263 = vst.msk [vmem:[%s1102_s5 + $0x28] sm:$0xff] %vm257_vm4, %v202_v56  ;;  %271 = vst.msk [vmem:[%s1102_s5 + $0x68] sm:$0xff] %vm257_vm4, %v242_v58  ;;  %v295_v0 = vsel %vm257_vm4, %v821_v60, 0.0  ;;  %v916_v30 = vld [vmem:[%s1102_s5 + $0x48] sm:$0xff] }
  0xff   :  { %v294_v1 = vsel %vm257_vm4, %v826_v63, 0.0  ;;  %262 = vst.msk [vmem:[%s1102_s5 + $0x20] sm:$0xff] %vm257_vm4, %v197_v61  ;;  %v584_v2 = vpop.f32.mrb[6].mxu0  ;;  %270 = vst.msk [vmem:[%s1102_s5 + $0x60] sm:$0xff] %vm257_vm4, %v237_v62  ;;  %v596_v3 = vpop.f32.mrb[6].mxu1  ;;  %v905_v24 = vld [vmem:[%s1102_s5 + $0x40] sm:$0xff] }
 0x100   :  { %v212_v4 = vadd.f32 %v584_v2, %v497_v37  ;;  %v206_v5 = vpop.f32.mrb[7].mxu0  ;;  %v252_v6 = vadd.f32 %v596_v3, %v497_v37  ;;  %v246_v7 = vpop.f32.mrb[7].mxu1  ;;  %v296_v10 = vadd.f32 %v295_v0, %v294_v1  ;;  %v309_v29 = vsel %vm257_vm4, %v905_v24, 0.0 }
 0x101   :  { %v207_v8 = vadd.f32 %v497_v37, %v206_v5  ;;  %v247_v9 = vadd.f32 %v497_v37, %v246_v7  ;;  %v851_v11 = vld [vmem:[%s1102_s5 + $0x18] sm:$0xff]  ;;  %v311_v34 = vsel %vm257_vm4, %v916_v30, 0.0 }
 0x102   :  { %v856_v12 = vld [vmem:[%s1102_s5 + $0x10] sm:$0xff]  ;;  %265 = vst.msk [vmem:[%s1102_s5 + $0x38] sm:$0xff] %vm257_vm4, %v212_v4  ;;  %273 = vst.msk [vmem:[%s1102_s5 + $0x78] sm:$0xff] %vm257_vm4, %v252_v6  ;;  %v299_v15 = vsel %vm257_vm4, %v851_v11, 0.0  ;;  %v930_v36 = vld [vmem:[%s1102_s5 + $0x58] sm:$0xff] }
 0x103   :  { %v297_v13 = vsel %vm257_vm4, %v856_v12, 0.0  ;;  %264 = vst.msk [vmem:[%s1102_s5 + $0x30] sm:$0xff] %vm257_vm4, %v207_v8  ;;  %272 = vst.msk [vmem:[%s1102_s5 + $0x70] sm:$0xff] %vm257_vm4, %v247_v9  ;;  %v921_v31 = vld [vmem:[%s1102_s5 + $0x50] sm:$0xff]  ;;  %v315_v40 = vsel %vm257_vm4, %v930_v36, 0.0 }
 0x104   :  { %v298_v14 = vadd.f32 %v297_v13, %v296_v10  ;;  %v313_v35 = vsel %vm257_vm4, %v921_v31, 0.0 }
 0x105   :  { %v881_v16 = vld [vmem:[%s1102_s5 + $0x28] sm:$0xff] }
 0x106   :  { %v886_v17 = vld [vmem:[%s1102_s5 + $0x20] sm:$0xff]  ;;  %v300_v18 = vadd.f32 %v299_v15, %v298_v14  ;;  %v303_v21 = vsel %vm257_vm4, %v881_v16, 0.0  ;;  %v944_v42 = vld [vmem:[%s1102_s5 + $0x68] sm:$0xff] }
 0x107   :  { %v301_v19 = vsel %vm257_vm4, %v886_v17, 0.0  ;;  %v935_v37 = vld [vmem:[%s1102_s5 + $0x60] sm:$0xff]  ;;  %v319_v46 = vsel %vm257_vm4, %v944_v42, 0.0 }
 0x108   :  { %v302_v20 = vadd.f32 %v301_v19, %v300_v18  ;;  %v317_v41 = vsel %vm257_vm4, %v935_v37, 0.0 }
 0x109   :  { %v895_v22 = vld [vmem:[%s1102_s5 + $0x38] sm:$0xff] }
 0x10a   :  { %v900_v23 = vld [vmem:[%s1102_s5 + $0x30] sm:$0xff]  ;;  %v304_v25 = vadd.f32 %v303_v21, %v302_v20  ;;  %v307_v28 = vsel %vm257_vm4, %v895_v22, 0.0  ;;  %v958_v48 = vld [vmem:[%s1102_s5 + $0x78] sm:$0xff] }
 0x10b   :  { %v305_v26 = vsel %vm257_vm4, %v900_v23, 0.0  ;;  %v949_v43 = vld [vmem:[%s1102_s5 + $0x70] sm:$0xff]  ;;  %v323_v51 = vsel %vm257_vm4, %v958_v48, 0.0 }
 0x10c   :  { %v306_v27 = vadd.f32 %v305_v26, %v304_v25  ;;  %v321_v47 = vsel %vm257_vm4, %v949_v43, 0.0 }
 0x10e   :  { %v308_v32 = vadd.f32 %v307_v28, %v306_v27 }
 0x110   :  { %v310_v33 = vadd.f32 %v309_v29, %v308_v32 }
 0x112   :  { %v312_v38 = vadd.f32 %v311_v34, %v310_v33 }
 0x114   :  { %v314_v39 = vadd.f32 %v313_v35, %v312_v38 }
 0x116   :  { %v316_v44 = vadd.f32 %v315_v40, %v314_v39 }
 0x118   :  { %v318_v45 = vadd.f32 %v317_v41, %v316_v44 }
 0x11a   :  { %v320_v49 = vadd.f32 %v319_v46, %v318_v45 }
 0x11c   :  { %v322_v50 = vadd.f32 %v321_v47, %v320_v49 }
 0x11e   :  { %v324_v52 = vadd.f32 %v323_v51, %v322_v50 }
 0x120   :  { %v325_v53 = vrot.slane %v324_v52, 4 }
 0x122   :  { %v326_v54 = vadd.f32 %v325_v53, %v324_v52 }
 0x124   :  { %v327_v55 = vrot.slane %v326_v54, 2 }
 0x126   :  { %v328_v56 = vadd.f32 %v327_v55, %v326_v54 }
 0x128   :  { %v329_v57 = vrot.slane %v328_v56, 1 }
 0x12a   :  { %v330_v58 = vadd.f32 %v329_v57, %v328_v56 }
 0x12c   :  { %v962_v59 = vmul.f32 0.0078125, %v330_v58 }
 0x12e   :  { %v333_v61 = vsub.f32 %v826_v63, %v962_v59  ;;  %v334_v62 = vsub.f32 %v821_v60, %v962_v59  ;;  %v335_v0 = vsub.f32 %v856_v12, %v962_v59  ;;  %v336_v1 = vsub.f32 %v851_v11, %v962_v59 }
 0x12f   :  { %v337_v4 = vsub.f32 %v886_v17, %v962_v59  ;;  %v338_v6 = vsub.f32 %v881_v16, %v962_v59  ;;  %v339_v13 = vsub.f32 %v900_v23, %v962_v59  ;;  %v340_v19 = vsub.f32 %v895_v22, %v962_v59 }
 0x130   :  { %v349_v2 = vmul.f32 %v333_v61, %v333_v61  ;;  %v350_v3 = vmul.f32 %v334_v62, %v334_v62  ;;  %v351_v5 = vmul.f32 %v335_v0, %v335_v0  ;;  %v352_v7 = vmul.f32 %v336_v1, %v336_v1 }
 0x131   :  { %v353_v14 = vmul.f32 %v337_v4, %v337_v4  ;;  %v354_v20 = vmul.f32 %v338_v6, %v338_v6  ;;  %v341_v26 = vsub.f32 %v905_v24, %v962_v59  ;;  %v355_v27 = vmul.f32 %v339_v13, %v339_v13 }
 0x132   :  { %v365_v8 = vsel %vm257_vm4, %v349_v2, 0.0  ;;  %v366_v9 = vsel %vm257_vm4, %v350_v3, 0.0  ;;  %v368_v15 = vsel %vm257_vm4, %v351_v5, 0.0  ;;  %v370_v21 = vsel %vm257_vm4, %v352_v7, 0.0 }
 0x133   :  { %v367_v10 = vadd.f32 %v366_v9, %v365_v8  ;;  %v372_v28 = vsel %vm257_vm4, %v353_v14, 0.0  ;;  %v342_v32 = vsub.f32 %v916_v30, %v962_v59  ;;  %v356_v33 = vmul.f32 %v340_v19, %v340_v19 }
 0x134   :  { %v374_v34 = vsel %vm257_vm4, %v354_v20, 0.0  ;;  %v343_v38 = vsub.f32 %v921_v31, %v962_v59  ;;  %v357_v39 = vmul.f32 %v341_v26, %v341_v26  ;;  %v376_v40 = vsel %vm257_vm4, %v355_v27, 0.0 }
 0x135   :  { %v369_v18 = vadd.f32 %v368_v15, %v367_v10  ;;  %v344_v44 = vsub.f32 %v930_v36, %v962_v59  ;;  %v358_v45 = vmul.f32 %v342_v32, %v342_v32  ;;  %v378_v46 = vsel %vm257_vm4, %v356_v33, 0.0 }
 0x136   :  { %v345_v49 = vsub.f32 %v935_v37, %v962_v59  ;;  %v359_v50 = vmul.f32 %v343_v38, %v343_v38  ;;  %v380_v51 = vsel %vm257_vm4, %v357_v39, 0.0  ;;  %v346_v53 = vsub.f32 %v944_v42, %v962_v59 }
 0x137   :  { %v371_v25 = vadd.f32 %v370_v21, %v369_v18  ;;  %v360_v54 = vmul.f32 %v344_v44, %v344_v44  ;;  %v382_v55 = vsel %vm257_vm4, %v358_v45, 0.0  ;;  %v347_v57 = vsub.f32 %v949_v43, %v962_v59 }
 0x138   :  { %v361_v58 = vmul.f32 %v345_v49, %v345_v49  ;;  %v384_v61 = vsel %vm257_vm4, %v359_v50, 0.0  ;;  %v348_v0 = vsub.f32 %v958_v48, %v962_v59  ;;  %v362_v1 = vmul.f32 %v346_v53, %v346_v53 }
 0x139   :  { %v373_v29 = vadd.f32 %v372_v28, %v371_v25  ;;  %v386_v2 = vsel %vm257_vm4, %v360_v54, 0.0  ;;  %v363_v4 = vmul.f32 %v347_v57, %v347_v57  ;;  %v418_v38 = vlaneseq }
 0x13a   :  { %v388_v5 = vsel %vm257_vm4, %v361_v58, 0.0  ;;  %v364_v7 = vmul.f32 %v348_v0, %v348_v0  ;;  %v390_v8 = vsel %vm257_vm4, %v362_v1, 0.0 }
 0x13b   :  { %v375_v35 = vadd.f32 %v374_v34, %v373_v29  ;;  %v392_v10 = vsel %vm257_vm4, %v363_v4, 0.0  ;;  %v419_v39 = vshrl.u32 %v418_v38, 7 }
 0x13c   :  { %v394_v14 = vsel %vm257_vm4, %v364_v7, 0.0 }
 0x13d   :  { %v377_v41 = vadd.f32 %v376_v40, %v375_v35  ;;  %v403_v40 = vld [vmem:[%s1103_s3] sm:$0x1] }
 0x13f   :  { %v379_v47 = vadd.f32 %v378_v46, %v377_v41  ;;  %v420_v41 = vsub.s32 0, %v419_v39  ;;  %v414_v46 = vld [vmem:[%s1104_s4] sm:$0x1] }
 0x141   :  { %v381_v52 = vadd.f32 %v380_v51, %v379_v47 }
 0x143   :  { %v383_v56 = vadd.f32 %v382_v55, %v381_v52 }
 0x145   :  { %v385_v62 = vadd.f32 %v384_v61, %v383_v56 }
 0x147   :  { %v387_v3 = vadd.f32 %v386_v2, %v385_v62 }
 0x149   :  { %v389_v6 = vadd.f32 %v388_v5, %v387_v3 }
 0x14b   :  { %v391_v9 = vadd.f32 %v390_v8, %v389_v6 }
 0x14d   :  { %v393_v13 = vadd.f32 %v392_v10, %v391_v9 }
 0x14f   :  { %v395_v15 = vadd.f32 %v394_v14, %v393_v13 }
 0x151   :  { %v396_v18 = vrot.slane %v395_v15, 4 }
 0x153   :  { %v397_v19 = vadd.f32 %v396_v18, %v395_v15 }
 0x155   :  { %v398_v20 = vrot.slane %v397_v19, 2 }
 0x157   :  { %v399_v21 = vadd.f32 %v398_v20, %v397_v19 }
 0x159   :  { %v400_v25 = vrot.slane %v399_v21, 1 }
 0x15b   :  { %v401_v26 = vadd.f32 %v400_v25, %v399_v21 }
 0x15d   :  { %v402_v27 = vmul.f32 0.0078125, %v401_v26 }
 0x15f   :  { %v404_v28 = vadd.f32 1e-05, %v402_v27 }
 0x161   :  { %642 = vrsqrt.f32 %v404_v28  ;;  %vm407_vm5 = vcmp.eq.f32.partialorder %v404_v28, inf  ;;  %v410_v33 = vand.u32 2147483648, %v404_v28  ;;  %vm409_vm6 = vcmp.eq.f32.partialorder %v404_v28, 0.0 }
 0x16b   :  { %v643_v29 = vpop.eup %642 }
 0x16c   :  { %v406_v32 = vmul.f32 %v643_v29, %v404_v28 }
 0x16e   :  { %v408_v34 = vsel %vm407_vm5, %v404_v28, %v406_v32 }
 0x16f   :  { %v411_v35 = vsel %vm409_vm6, %v410_v33, %v408_v34 }
 0x170   :  { %644 = vrcp.f32 %v411_v35 }
 0x17a   :  { %v645_v44 = vpop.eup %644 }
 0x17b   :  { %v413_v45 = vmul.f32 %v645_v44, %v403_v40 }
 0x17d   :  { %v415_v47 = vmul.f32 %v413_v45, %v962_v59  ;;  %v421_v49 = vrot.slane %v413_v45, %v420_v41 }
 0x17f   :  { %v416_v50 = vsub.f32 %v414_v46, %v415_v47  ;;  %v423_v51 = vmul.f32 %v421_v49, %v826_v63  ;;  %v424_v52 = vmul.f32 %v421_v49, %v821_v60  ;;  %v425_v53 = vmul.f32 %v421_v49, %v856_v12 }
 0x180   :  { %v426_v54 = vmul.f32 %v421_v49, %v851_v11  ;;  %v427_v55 = vmul.f32 %v421_v49, %v886_v17  ;;  %v428_v56 = vmul.f32 %v421_v49, %v881_v16  ;;  %v429_v57 = vmul.f32 %v421_v49, %v900_v23 }
 0x181   :  { %v430_v58 = vmul.f32 %v421_v49, %v895_v22  ;;  %v431_v59 = vmul.f32 %v421_v49, %v905_v24  ;;  %v432_v61 = vmul.f32 %v421_v49, %v916_v30  ;;  %v433_v63 = vmul.f32 %v421_v49, %v921_v31 }
 0x182   :  { %v434_v60 = vmul.f32 %v421_v49, %v930_v36  ;;  %v443_v62 = vrot.slane %v416_v50, %v420_v41  ;;  %v435_v12 = vmul.f32 %v421_v49, %v935_v37  ;;  %v436_v11 = vmul.f32 %v421_v49, %v944_v42 }
 0x183   :  { %v437_v17 = vmul.f32 %v421_v49, %v949_v43  ;;  %v438_v16 = vmul.f32 %v421_v49, %v958_v48 }
 0x184   :  { %v445_v23 = vadd.f32 %v443_v62, %v423_v51  ;;  %v446_v0 = vadd.f32 %v443_v62, %v424_v52  ;;  %v447_v22 = vadd.f32 %v443_v62, %v425_v53  ;;  %v448_v1 = vadd.f32 %v443_v62, %v426_v54 }
 0x185   :  { %v449_v24 = vadd.f32 %v443_v62, %v427_v55  ;;  %v450_v2 = vadd.f32 %v443_v62, %v428_v56  ;;  %v451_v30 = vadd.f32 %v443_v62, %v429_v57  ;;  %v452_v3 = vadd.f32 %v443_v62, %v430_v58 }
 0x186   :  { %v453_v31 = vadd.f32 %v443_v62, %v431_v59  ;;  %v454_v4 = vadd.f32 %v443_v62, %v432_v61  ;;  %v455_v36 = vadd.f32 %v443_v62, %v433_v63  ;;  %v456_v5 = vadd.f32 %v443_v62, %v434_v60 }
 0x187   :  { %v457_v6 = vadd.f32 %v443_v62, %v435_v12  ;;  %v458_v37 = vadd.f32 %v443_v62, %v436_v11  ;;  %v459_v7 = vadd.f32 %v443_v62, %v437_v17  ;;  %v460_v42 = vadd.f32 %v443_v62, %v438_v16 }
 0x188   :  { %v461_v8 = vmax.f32 %v445_v23, 0.0  ;;  %v462_v43 = vmax.f32 %v446_v0, 0.0  ;;  %v463_v9 = vmax.f32 %v447_v22, 0.0  ;;  %v464_v48 = vmax.f32 %v448_v1, 0.0 }
 0x189   :  { %v465_v10 = vmax.f32 %v449_v24, 0.0  ;;  %v466_v13 = vmax.f32 %v450_v2, 0.0  ;;  %v467_v14 = vmax.f32 %v451_v30, 0.0  ;;  %v468_v15 = vmax.f32 %v452_v3, 0.0 }
 0x18a   :  { %v469_v18 = vmax.f32 %v453_v31, 0.0  ;;  %v470_v19 = vmax.f32 %v454_v4, 0.0  ;;  %v471_v20 = vmax.f32 %v455_v36, 0.0  ;;  %v472_v21 = vmax.f32 %v456_v5, 0.0  ;;  %477 = vst.msk [vmem:[%s1102_s5] sm:$0xff] %vm257_vm4, %v461_v8  ;;  %478 = vst.msk [vmem:[%s1102_s5 + $0x8] sm:$0xff] %vm257_vm4, %v462_v43 }
 0x18b   :  { %479 = vst.msk [vmem:[%s1102_s5 + $0x10] sm:$0xff] %vm257_vm4, %v463_v9  ;;  %480 = vst.msk [vmem:[%s1102_s5 + $0x18] sm:$0xff] %vm257_vm4, %v464_v48  ;;  %v473_v25 = vmax.f32 %v457_v6, 0.0  ;;  %v474_v26 = vmax.f32 %v458_v37, 0.0  ;;  %v475_v27 = vmax.f32 %v459_v7, 0.0  ;;  %v476_v28 = vmax.f32 %v460_v42, 0.0 }
 0x18c   :  { %481 = vst.msk [vmem:[%s1102_s5 + $0x20] sm:$0xff] %vm257_vm4, %v465_v10  ;;  %482 = vst.msk [vmem:[%s1102_s5 + $0x28] sm:$0xff] %vm257_vm4, %v466_v13 }
 0x18d   :  { %483 = vst.msk [vmem:[%s1102_s5 + $0x30] sm:$0xff] %vm257_vm4, %v467_v14  ;;  %484 = vst.msk [vmem:[%s1102_s5 + $0x38] sm:$0xff] %vm257_vm4, %v468_v15 }
 0x18e   :  { %485 = vst.msk [vmem:[%s1102_s5 + $0x40] sm:$0xff] %vm257_vm4, %v469_v18  ;;  %486 = vst.msk [vmem:[%s1102_s5 + $0x48] sm:$0xff] %vm257_vm4, %v470_v19 }
 0x18f   :  { %487 = vst.msk [vmem:[%s1102_s5 + $0x50] sm:$0xff] %vm257_vm4, %v471_v20  ;;  %488 = vst.msk [vmem:[%s1102_s5 + $0x58] sm:$0xff] %vm257_vm4, %v472_v21 }
 0x190   :  { %489 = vst.msk [vmem:[%s1102_s5 + $0x60] sm:$0xff] %vm257_vm4, %v473_v25  ;;  %490 = vst.msk [vmem:[%s1102_s5 + $0x68] sm:$0xff] %vm257_vm4, %v474_v26 }
 0x191   :  { %491 = vst.msk [vmem:[%s1102_s5 + $0x70] sm:$0xff] %vm257_vm4, %v475_v27  ;;  %492 = vst.msk [vmem:[%s1102_s5 + $0x78] sm:$0xff] %vm257_vm4, %v476_v28 }

// kernel: conv3dnet_forward.6
= control target key start
LH: loop header
LB: loop body
LE: loop exit
PB: predicated region body
PF: predicated region fallthrough
CT: control target
= control target key end

     0   :  { %v290_v0 = vmov 0.0|0.0   ;;  %vm58_vm0 = vcmask 719872   ;;  %v291_v42 = vmov 0.0   ;;  %vm142_vm1 = vcmask 130048   ;;  %s476_s1 = inlined_call_operand.vmem [shape: f32[216,16], index: 1, kind: input, shape index: {}]   ;;  %s477_s0 = inlined_call_operand.vmem [shape: f32[16,216], index: 0, kind: input, shape index: {}]   ;;  %s478_s2 = inlined_call_operand.vmem [shape: f32[1,16], index: 2, kind: input, shape index: {}]   ;;  %s479_s5 = inlined_call_operand.vmem [shape: f32[16,16], index: 5, kind: output, shape index: {}]   ;;  %s480_s3 = inlined_call_operand.vmem [shape: f32[1,16], index: 3, kind: input, shape index: {}]   ;;  %s481_s4 = inlined_call_operand.vmem [shape: f32[1,16], index: 4, kind: input, shape index: {}]  }
   0x1   :  { %217 = vmatprep.subr.bf16.mxu0 %v290_v0  ;;  %256 = vmatprep.subr.bf16.mxu1 %v290_v0  ;;  %v24_v1 = vld [vmem:[%s476_s1] sm:$0xff]  ;;  %v25_v2 = vld [vmem:[%s476_s1 + $0x8] sm:$0xff]  ;;  %v26_v3 = vld [vmem:[%s476_s1 + $0x10] sm:$0xff] }
   0x2   :  { %v218_v4 = vpack.c.bf16 %v25_v2, %v24_v1  ;;  %v27_v5 = vld [vmem:[%s476_s1 + $0x18] sm:$0xff]  ;;  %v28_v7 = vld [vmem:[%s476_s1 + $0x20] sm:$0xff]  ;;  %v29_v8 = vld [vmem:[%s476_s1 + $0x28] sm:$0xff] }
   0x3   :  { %v221_v6 = vpack.c.bf16 %v27_v5, %v26_v3  ;;  %v224_v9 = vpack.c.bf16 %v29_v8, %v28_v7  ;;  %v30_v10 = vld [vmem:[%s476_s1 + $0x30] sm:$0xff]  ;;  %v31_v11 = vld [vmem:[%s476_s1 + $0x38] sm:$0xff]  ;;  %v21_v12 = vld [vmem:[%s477_s0 + $0x8] sm:$0xff] }
   0x4   :  { %219 = vmatpush1.bf16.msra.mxu0 %v218_v4  ;;  %270 = vmatpush1.bf16.msra.mxu1 %v218_v4  ;;  %v23_v13 = vld [vmem:[%s477_s0 + $0x18] sm:$0xff]  ;;  %v227_v14 = vpack.c.bf16 %v31_v11, %v30_v10  ;;  %v32_v15 = vld [vmem:[%s476_s1 + $0x40] sm:$0xff]  ;;  %v33_v16 = vld [vmem:[%s476_s1 + $0x48] sm:$0xff] }
   0x5   :  { %220 = vmatprep.subr.bf16.mxu0 %v290_v0  ;;  %257 = vmatprep.subr.bf16.mxu1 %v290_v0  ;;  %v230_v17 = vpack.c.bf16 %v33_v16, %v32_v15  ;;  %v34_v18 = vld [vmem:[%s476_s1 + $0x50] sm:$0xff]  ;;  %v35_v19 = vld [vmem:[%s476_s1 + $0x58] sm:$0xff]  ;;  %v36_v21 = vld [vmem:[%s476_s1 + $0x60] sm:$0xff] }
   0x6   :  { %215 = vmatprep.mubr.msk.f32.mxu0 %vm58_vm0, %v21_v12  ;;  %216 = vmatprep.mubr.msk.f32.mxu1 %vm58_vm0, %v23_v13  ;;  %v233_v20 = vpack.c.bf16 %v35_v19, %v34_v18  ;;  %v37_v22 = vld [vmem:[%s476_s1 + $0x68] sm:$0xff]  ;;  %v38_v24 = vld [vmem:[%s476_s1 + $0x70] sm:$0xff]  ;;  %v39_v25 = vld [vmem:[%s476_s1 + $0x78] sm:$0xff] }
   0x7   :  { %v236_v23 = vpack.c.bf16 %v37_v22, %v36_v21  ;;  %v239_v26 = vpack.c.bf16 %v39_v25, %v38_v24  ;;  %v40_v27 = vld [vmem:[%s476_s1 + $0x80] sm:$0xff]  ;;  %v41_v28 = vld [vmem:[%s476_s1 + $0x88] sm:$0xff]  ;;  %v42_v30 = vld [vmem:[%s476_s1 + $0x90] sm:$0xff]  ;;  %v191_v21 = vlaneseq }
   0x8   :  { %222 = vmatpush1.bf16.msra.mxu0 %v221_v6  ;;  %271 = vmatpush1.bf16.msra.mxu1 %v221_v6  ;;  %v242_v29 = vpack.c.bf16 %v41_v28, %v40_v27  ;;  %v43_v31 = vld [vmem:[%s476_s1 + $0x98] sm:$0xff]  ;;  %v44_v33 = vld [vmem:[%s476_s1 + $0xa0] sm:$0xff]  ;;  %v45_v34 = vld [vmem:[%s476_s1 + $0xa8] sm:$0xff] }
   0x9   :  { %223 = vmatprep.subr.bf16.mxu0 %v290_v0  ;;  %258 = vmatprep.subr.bf16.mxu1 %v290_v0  ;;  %v245_v32 = vpack.c.bf16 %v43_v31, %v42_v30  ;;  %v248_v35 = vpack.c.bf16 %v45_v34, %v44_v33  ;;  %v46_v36 = vld [vmem:[%s476_s1 + $0xb0] sm:$0xff]  ;;  %v47_v37 = vld [vmem:[%s476_s1 + $0xb8] sm:$0xff]  ;;  %v48_v39 = vld [vmem:[%s476_s1 + $0xc0] sm:$0xff]  ;;  %v192_v22 = vshrl.u32 %v191_v21, 7 }
   0xa   :  { %v251_v38 = vpack.c.bf16 %v47_v37, %v46_v36  ;;  %v49_v40 = vld [vmem:[%s476_s1 + $0xc8] sm:$0xff]  ;;  %v50_v43 = vld [vmem:[%s476_s1 + $0xd0] sm:$0xff]  ;;  %v20_v44 = vld [vmem:[%s477_s0] sm:$0xff] }
   0xb   :  { %v254_v41 = vpack.c.bf16 %v49_v40, %v48_v39  ;;  %v22_v45 = vld [vmem:[%s477_s0 + $0x10] sm:$0xff]  ;;  %v214_v46 = vld [vmem:[%s478_s2] ss:$0 sm:$0xff]  ;;  %v193_v24 = vsub.s32 0, %v192_v22 }
   0xc   :  { %225 = vmatpush1.bf16.msra.mxu0 %v224_v9  ;;  %272 = vmatpush1.bf16.msra.mxu1 %v224_v9  ;;  %v187_v27 = vld [vmem:[%s481_s4] sm:$0x1] }
   0xd   :  { %226 = vmatprep.subr.bf16.mxu0 %v290_v0  ;;  %259 = vmatprep.subr.bf16.mxu1 %v290_v0 }
  0x10   :  { %228 = vmatpush1.bf16.msra.mxu0 %v227_v14  ;;  %273 = vmatpush1.bf16.msra.mxu1 %v227_v14 }
  0x11   :  { %229 = vmatprep.subr.bf16.mxu0 %v290_v0  ;;  %260 = vmatprep.subr.bf16.mxu1 %v290_v0 }
  0x14   :  { %231 = vmatpush1.bf16.msra.mxu0 %v230_v17  ;;  %274 = vmatpush1.bf16.msra.mxu1 %v230_v17 }
  0x15   :  { %232 = vmatprep.subr.bf16.mxu0 %v290_v0  ;;  %261 = vmatprep.subr.bf16.mxu1 %v290_v0 }
  0x18   :  { %234 = vmatpush1.bf16.msra.mxu0 %v233_v20  ;;  %275 = vmatpush1.bf16.msra.mxu1 %v233_v20 }
  0x19   :  { %235 = vmatprep.subr.bf16.mxu0 %v290_v0  ;;  %262 = vmatprep.subr.bf16.mxu1 %v290_v0 }
  0x1c   :  { %237 = vmatpush1.bf16.msra.mxu0 %v236_v23  ;;  %276 = vmatpush1.bf16.msra.mxu1 %v236_v23  ;;  %v176_v23 = vld [vmem:[%s480_s3] sm:$0x1] }
  0x1d   :  { %238 = vmatprep.subr.bf16.mxu0 %v290_v0  ;;  %263 = vmatprep.subr.bf16.mxu1 %v290_v0 }
  0x20   :  { %240 = vmatpush1.bf16.msra.mxu0 %v239_v26  ;;  %277 = vmatpush1.bf16.msra.mxu1 %v239_v26 }
  0x21   :  { %241 = vmatprep.subr.bf16.mxu0 %v290_v0  ;;  %264 = vmatprep.subr.bf16.mxu1 %v290_v0 }
  0x24   :  { %243 = vmatpush1.bf16.msra.mxu0 %v242_v29  ;;  %278 = vmatpush1.bf16.msra.mxu1 %v242_v29 }
  0x25   :  { %244 = vmatprep.subr.bf16.mxu0 %v290_v0  ;;  %265 = vmatprep.subr.bf16.mxu1 %v290_v0 }
  0x28   :  { %246 = vmatpush1.bf16.msra.mxu0 %v245_v32  ;;  %279 = vmatpush1.bf16.msra.mxu1 %v245_v32 }
  0x29   :  { %247 = vmatprep.subr.bf16.mxu0 %v290_v0  ;;  %266 = vmatprep.subr.bf16.mxu1 %v290_v0 }
  0x2c   :  { %249 = vmatpush1.bf16.msra.mxu0 %v248_v35  ;;  %280 = vmatpush1.bf16.msra.mxu1 %v248_v35 }
  0x2d   :  { %250 = vmatprep.subr.bf16.mxu0 %v290_v0  ;;  %267 = vmatprep.subr.bf16.mxu1 %v290_v0 }
  0x30   :  { %252 = vmatpush1.bf16.msra.mxu0 %v251_v38  ;;  %281 = vmatpush1.bf16.msra.mxu1 %v251_v38 }
  0x31   :  { %253 = vmatprep.subr.bf16.mxu0 %v290_v0  ;;  %268 = vmatprep.subr.bf16.mxu1 %v290_v0 }
  0x34   :  { %255 = vmatpush1.bf16.msra.mxu0 %v254_v41  ;;  %282 = vmatpush1.bf16.msra.mxu1 %v254_v41 }
  0x35   :  { %117 = vmatprep.subr.mxu0 %v291_v42  ;;  %269 = vmatprep.subr.mxu1 %v291_v42 }
  0x38   :  { %118 = vmatpush1.msra.mxu0 %v50_v43  ;;  %283 = vmatpush1.msra.mxu1 %v50_v43 }
  0x39   :  { %130 = vmatmul.mubr.f32.vlgmr.msra.gmra.mrb[0].mxu0 %v20_v44  ;;  %135 = vmatmul.mubr.f32.vlgmr.msra.gmra.mrb[0].mxu1 %v22_v45 }
 0x10c   :  { %v131_v47 = vpop.f32.mrb[0].mxu0  ;;  %v136_v48 = vpop.f32.mrb[0].mxu1 }
 0x10d   :  { %v132_v49 = vadd.f32 %v214_v46, %v131_v47  ;;  %v137_v50 = vadd.f32 %v214_v46, %v136_v48  ;;  %v133_v51 = vpop.f32.mrb[1].mxu0  ;;  %v138_v52 = vpop.f32.mrb[1].mxu1 }
 0x10f   :  { %143 = vst.msk [vmem:[%s479_s5] sm:$0xff] %vm142_vm1, %v132_v49  ;;  %144 = vst.msk [vmem:[%s479_s5 + $0x8] sm:$0xff] %vm142_vm1, %v137_v50 }
 0x116   :  { %v149_v53 = vld [vmem:[%s479_s5] sm:$0xff]  ;;  %v150_v54 = vld [vmem:[%s479_s5 + $0x8] sm:$0xff] }
 0x117   :  { %v151_v55 = vsel %vm142_vm1, %v149_v53, 0.0  ;;  %v152_v56 = vsel %vm142_vm1, %v150_v54, 0.0 }
 0x118   :  { %v153_v57 = vadd.f32 %v152_v56, %v151_v55 }
 0x11a   :  { %v154_v58 = vrot.slane %v153_v57, 4 }
 0x11c   :  { %v155_v59 = vadd.f32 %v154_v58, %v153_v57 }
 0x11e   :  { %v156_v60 = vrot.slane %v155_v59, 2 }
 0x120   :  { %v157_v61 = vadd.f32 %v156_v60, %v155_v59 }
 0x122   :  { %v158_v62 = vrot.slane %v157_v61, 1 }
 0x124   :  { %v159_v63 = vadd.f32 %v158_v62, %v157_v61 }
 0x126   :  { %v161_v0 = vmul.f32 0.0625, %v159_v63 }
 0x128   :  { %v162_v1 = vsub.f32 %v149_v53, %v161_v0  ;;  %v163_v2 = vsub.f32 %v150_v54, %v161_v0 }
 0x12a   :  { %v164_v3 = vmul.f32 %v162_v1, %v162_v1  ;;  %v165_v4 = vmul.f32 %v163_v2, %v163_v2 }
 0x12c   :  { %v166_v5 = vsel %vm142_vm1, %v164_v3, 0.0  ;;  %v167_v6 = vsel %vm142_vm1, %v165_v4, 0.0 }
 0x12d   :  { %v168_v7 = vadd.f32 %v167_v6, %v166_v5 }
 0x12f   :  { %v169_v8 = vrot.slane %v168_v7, 4 }
 0x131   :  { %v170_v9 = vadd.f32 %v169_v8, %v168_v7 }
 0x133   :  { %v171_v10 = vrot.slane %v170_v9, 2 }
 0x135   :  { %v172_v11 = vadd.f32 %v171_v10, %v170_v9 }
 0x137   :  { %v173_v12 = vrot.slane %v172_v11, 1 }
 0x139   :  { %v174_v13 = vadd.f32 %v173_v12, %v172_v11 }
 0x13b   :  { %v175_v14 = vmul.f32 0.0625, %v174_v13 }
 0x13d   :  { %v177_v15 = vadd.f32 1e-05, %v175_v14 }
 0x13f   :  { %286 = vrsqrt.f32 %v177_v15  ;;  %vm180_vm2 = vcmp.eq.f32.partialorder %v177_v15, inf  ;;  %v183_v18 = vand.u32 2147483648, %v177_v15  ;;  %vm182_vm3 = vcmp.eq.f32.partialorder %v177_v15, 0.0 }
 0x149   :  { %v287_v16 = vpop.eup %286 }
 0x14a   :  { %v179_v17 = vmul.f32 %v287_v16, %v177_v15 }
 0x14c   :  { %v181_v19 = vsel %vm180_vm2, %v177_v15, %v179_v17 }
 0x14d   :  { %v184_v20 = vsel %vm182_vm3, %v183_v18, %v181_v19 }
 0x14e   :  { %288 = vrcp.f32 %v184_v20 }
 0x158   :  { %v289_v25 = vpop.eup %288 }
 0x159   :  { %v186_v26 = vmul.f32 %v289_v25, %v176_v23 }
 0x15b   :  { %v188_v28 = vmul.f32 %v186_v26, %v161_v0  ;;  %v194_v29 = vrot.slane %v186_v26, %v193_v24 }
 0x15d   :  { %v189_v30 = vsub.f32 %v187_v27, %v188_v28  ;;  %v196_v31 = vmul.f32 %v194_v29, %v149_v53  ;;  %v197_v32 = vmul.f32 %v194_v29, %v150_v54 }
 0x15f   :  { %v202_v33 = vrot.slane %v189_v30, %v193_v24 }
 0x161   :  { %v204_v34 = vadd.f32 %v202_v33, %v196_v31  ;;  %v205_v35 = vadd.f32 %v202_v33, %v197_v32 }
 0x163   :  { %v206_v36 = vmax.f32 %v204_v34, 0.0  ;;  %v207_v37 = vmax.f32 %v205_v35, 0.0 }
 0x165   :  { %208 = vst.msk [vmem:[%s479_s5] sm:$0xff] %vm142_vm1, %v206_v36  ;;  %209 = vst.msk [vmem:[%s479_s5 + $0x8] sm:$0xff] %vm142_vm1, %v207_v37 }

// kernel: conv3dnet_forward.7
= control target key start
LH: loop header
LB: loop body
LE: loop exit
PB: predicated region body
PF: predicated region fallthrough
CT: control target
= control target key end

     0   :  { %v230_v3 = vmov 0.0|0.0   ;;  %vm231_vm0 = vmmov 0   ;;  %v232_v6 = vmov 0.0   ;;  %s320_s0 = inlined_call_operand.vmem [shape: f32[2,128], index: 0, kind: input, shape index: {}]   ;;  %s321_s1 = inlined_call_operand.vmem [shape: f32[128,10], index: 1, kind: input, shape index: {}]   ;;  %s322_s2 = inlined_call_operand.vmem [shape: f32[1,10], index: 2, kind: input, shape index: {}]   ;;  %s323_s3 = inlined_call_operand.hbm [shape: f32[2,10], index: 3, kind: output, shape index: {}]  }
   0x1   :  { %v16_v0 = vld [vmem:[%s321_s1] sm:$0xff]  ;;  %v17_v1 = vld [vmem:[%s321_s1 + $0x8] sm:$0xff]  ;;  %v18_v2 = vld [vmem:[%s321_s1 + $0x10] sm:$0xff]  ;;  %178 = vmatprep.subr.bf16.mxu0 %v230_v3  ;;  %175 = vmatprep.mubr.msk.f32.mxu0 %vm231_vm0, %v232_v6 }
   0x2   :  { %v179_v4 = vpack.c.bf16 %v17_v1, %v16_v0  ;;  %v19_v5 = vld [vmem:[%s321_s1 + $0x18] sm:$0xff]  ;;  %v20_v8 = vld [vmem:[%s321_s1 + $0x20] sm:$0xff]  ;;  %v21_v9 = vld [vmem:[%s321_s1 + $0x28] sm:$0xff] }
   0x3   :  { %v182_v7 = vpack.c.bf16 %v19_v5, %v18_v2 }
   0x4   :  { %180 = vmatpush3.bf16.msra.mxu0 %v179_v4 }
   0x5   :  { %181 = vmatprep.subr.bf16.mxu0 %v230_v3 }
   0x6   :  { %8 = vsyncpa [#allocation3], 0  ;;  %v185_v10 = vpack.c.bf16 %v21_v9, %v20_v8  ;;  %v22_v11 = vld [vmem:[%s321_s1 + $0x30] sm:$0xff]  ;;  %v23_v12 = vld [vmem:[%s321_s1 + $0x38] sm:$0xff]  ;;  %s233_s21 = smov [#allocation2]   ;;  %vm109_vm1 = vcmask 74752  }
   0x7   :  { %v188_v13 = vpack.c.bf16 %v23_v12, %v22_v11  ;;  %v24_v14 = vld [vmem:[%s321_s1 + $0x40] sm:$0xff]  ;;  %v25_v15 = vld [vmem:[%s321_s1 + $0x48] sm:$0xff]  ;;  %v26_v17 = vld [vmem:[%s321_s1 + $0x50] sm:$0xff]  ;;  %s117_s22 = sshll.u32 %s233_s21, 4  ;;  %s118_s22 = int_to_ptr.vmem [resolvable:$true] %s117_s22 }
   0x8   :  { %183 = vmatpush3.bf16.msra.mxu0 %v182_v7  ;;  %v191_v16 = vpack.c.bf16 %v25_v15, %v24_v14  ;;  %v27_v18 = vld [vmem:[%s321_s1 + $0x58] sm:$0xff]  ;;  %v28_v20 = vld [vmem:[%s321_s1 + $0x60] sm:$0xff]  ;;  %v29_v21 = vld [vmem:[%s321_s1 + $0x68] sm:$0xff]  ;;  %p211_p1 = scmp.lt.s32.totalorder %s118_s22, %s118_s22 }
   0x9   :  { %184 = vmatprep.subr.bf16.mxu0 %v230_v3  ;;  %v194_v19 = vpack.c.bf16 %v27_v18, %v26_v17  ;;  %v197_v22 = vpack.c.bf16 %v29_v21, %v28_v20  ;;  %v30_v23 = vld [vmem:[%s321_s1 + $0x70] sm:$0xff]  ;;  %v31_v24 = vld [vmem:[%s321_s1 + $0x78] sm:$0xff]  ;;  %v15_v26 = vld [vmem:[%s320_s0] sm:$0x3]  ;;  %s206_s1 = scalar_lea.vmem %s118_s22, 32 }
   0xa   :  { %v200_v25 = vpack.c.bf16 %v31_v24, %v30_v23  ;;  %v125_v27 = vld [vmem:[%s322_s2] ss:$0 sm:$0xff]  ;;  %p207_p0 = scmp.ne.s32.totalorder %s118_s22, %s206_s1  ;;  %p212_p2 = scmp.lt.s32.totalorder %s206_s1, %s206_s1 }
   0xc   :  { %186 = vmatpush3.bf16.msra.mxu0 %v185_v10  ;;  %p213_p3 = por %p212_p2, %p211_p1 }
   0xd   :  { %187 = vmatprep.subr.bf16.mxu0 %v230_v3 }
   0xe   :  { %p214_p4 = pnand %p213_p3, %p207_p0 }
  0x10   :  { %189 = vmatpush3.bf16.msra.mxu0 %v188_v13 }
  0x11   :  { %190 = vmatprep.subr.bf16.mxu0 %v230_v3 }
  0x14   :  { %192 = vmatpush3.bf16.msra.mxu0 %v191_v16 }
  0x15   :  { %193 = vmatprep.subr.bf16.mxu0 %v230_v3 }
  0x18   :  { %195 = vmatpush3.bf16.msra.mxu0 %v194_v19 }
  0x19   :  { %196 = vmatprep.subr.bf16.mxu0 %v230_v3 }
  0x1c   :  { %198 = vmatpush3.bf16.msra.mxu0 %v197_v22 }
  0x1d   :  { %199 = vmatprep.subr.bf16.mxu0 %v230_v3 }
  0x20   :  { %201 = vmatpush3.bf16.msra.mxu0 %v200_v25 }
  0x23   :  { %176 = vmatmul.mubr.f32.vlgmr.msra.gmra.mrb[0].mxu0 %v15_v26 }
  0xf6   :  { %v105_v28 = vpop.f32.mrb[0].mxu0 }
  0xf7   :  { %v106_v29 = vadd.f32 %v125_v27, %v105_v28  ;;  %v177_v30 = vpop.f32.mrb[1].mxu0 }
  0xf9   :  { %110 = vst.msk [vmem:[#allocation2] sm:$0x3] %vm109_vm1, %v106_v29 }
  0xfa   :  { %217 = shalt.err (!%p214_p4)
}
  0xfb   :  { %s218_s24 = scalar_lea.hbm %s323_s3, 32 }
  0xfc   :  { %p219_p5 = scmp.ne.s32.totalorder %s323_s3, %s218_s24  ;;  %p222_p6 = scmp.lt.u32.totalorder %s218_s24, %s323_s3 }
  0xfe   :  { %p224_p7 = pnand %p222_p6, %p219_p5 }
 0x100   :  { %227 = shalt.err (!%p224_p7)
}
 0x101   :  { %120 = dma.vmem_to_hbm [thread:$0]  %s118_s22, 32, %s323_s3, [#allocation3]  }
 0x102   :  { %228 = dma.done.wait [#allocation3], 32  }
 0x103   :  { %229 = vsyncadd [#allocation3], 4294967264 }
 0x104   :  { %124 = vsyncpa [#allocation3], 1 }

</bundles_post_ra>
